<compile_context>
chip_gen: v7x
topology: tpu7x:2x2x1
jax: 0.10.0
libtpu: 0.0.40
codegen_flags: <defaults>
</compile_context>

<pallas_src>
import functools
import numpy as np
import jax
import jax.numpy as jnp
from jax.experimental import pallas as pl
from jax.experimental.pallas import tpu as pltpu

BBOX_REG_WEIGHTS = (10.0, 10.0, 5.0, 5.0)   # Detectron MODEL.BBOX_REG_WEIGHTS
GT_LANES = 128                              # max gt boxes (sublane axis of kernel 1)
_GT_SENTINEL = -1e8                         # padded gt rows -> IoU exactly 0
_VMEM_LIMIT = 32 * 1024 * 1024              # explicit scoped-VMEM budget (all gens)


def _round_up(x, m):
    return ((x + m - 1) // m) * m


@functools.lru_cache(maxsize=1)
def _row_tile():
    """Candidate-row tile (lane axis) for kernel 1.  Single grid step whenever
    N <= tile; when the grid is split, every step carries >= 512 rows so the
    'parallel' axis is worth its per-step (~0.35us) cost on v7x megacore.
    128-MiB-VMEM parts (v5e/v6e) take 1024-row tiles; 64-MiB v7x / unknown
    hardware stays at 512 to preserve pipeline depth."""
    try:
        vmem = getattr(pltpu.get_tpu_info(), "vmem_capacity_bytes", 0) or 0
    except Exception:
        vmem = 0
    return 1024 if vmem >= 96 * 1024 * 1024 else 512


# ---------------------------------------------------------------------------
# Pallas kernel 1: all-pairs IoU (gt x candidates) with fused max / argmax,
# transposed layout -> lane-dense (1, tile) outputs.
# ---------------------------------------------------------------------------
def _iou_max_argmax_kernel(boxes_ref, gt_ref, max_ref, arg_ref):
    # boxes_ref: (8, T) f32, rows 0..3 = x1,y1,x2,y2 (candidates on the LANE axis)
    # gt_ref   : (GT_LANES, 8) f32, cols 0..3 = x1,y1,x2,y2 (gt on the SUBLANE axis)
    bx1 = boxes_ref[0:1, :]
    by1 = boxes_ref[1:2, :]
    bx2 = boxes_ref[2:3, :]
    by2 = boxes_ref[3:4, :]
    gx1 = gt_ref[:, 0:1]
    gy1 = gt_ref[:, 1:2]
    gx2 = gt_ref[:, 2:3]
    gy2 = gt_ref[:, 3:4]

    b_area = (bx2 - bx1 + 1.0) * (by2 - by1 + 1.0)                           # (1, T)
    g_area = (gx2 - gx1 + 1.0) * (gy2 - gy1 + 1.0)                           # (G, 1)
    iw = jnp.maximum(jnp.minimum(bx2, gx2) - jnp.maximum(bx1, gx1) + 1.0, 0.0)
    ih = jnp.maximum(jnp.minimum(by2, gy2) - jnp.maximum(by1, gy1) + 1.0, 0.0)
    inter = iw * ih                                                          # (G, T)
    iou = inter / (b_area + g_area - inter)   # exact divide (tie / threshold safety)

    # Sentinel-padded gt rows score exactly 0 and can never win the
    # first-occurrence tie-break (real gt index 0 also scores >= 0).
    m = jnp.max(iou, axis=0, keepdims=True)                                  # (1, T)
    row_f = jax.lax.broadcasted_iota(jnp.int32, iou.shape, 0).astype(jnp.float32)
    arg = jnp.min(jnp.where(iou == m, row_f, float(GT_LANES)),
                  axis=0, keepdims=True)                                     # first max
    max_ref[...] = m                         # lane-dense unmasked stores
    arg_ref[...] = arg.astype(jnp.int32)


def pallas_iou_max_argmax(cand, gt_padded):
    """cand: (Np, 4) f32 (Np a multiple of the row tile); gt_padded: (GT_LANES, 4)
    f32 with sentinel padding rows.  Returns (Np,) max IoU and (Np,) i32 argmax."""
    Np = cand.shape[0]
    tile = _row_tile()
    assert Np % tile == 0, (Np, tile)

    boxes_t = jnp.zeros((8, Np), jnp.float32).at[:4, :].set(cand.T)
    gt_cols = jnp.zeros((GT_LANES, 8), jnp.float32).at[:, :4].set(gt_padded)

    max_o, arg_o = pl.pallas_call(
        _iou_max_argmax_kernel,
        grid=(Np // tile,),
        in_specs=[
            pl.BlockSpec((8, tile), lambda i: (0, i)),
            pl.BlockSpec((GT_LANES, 8), lambda i: (0, 0)),   # invariant, fetched once
        ],
        out_specs=[
            pl.BlockSpec((1, tile), lambda i: (0, i)),       # lane-dense outputs
            pl.BlockSpec((1, tile), lambda i: (0, i)),
        ],
        out_shape=[
            jax.ShapeDtypeStruct((1, Np), jnp.float32),
            jax.ShapeDtypeStruct((1, Np), jnp.int32),
        ],
        compiler_params=pltpu.CompilerParams(
            dimension_semantics=("parallel",),
            vmem_limit_bytes=_VMEM_LIMIT),
    )(boxes_t, gt_cols)
    return max_o[0], arg_o[0]


# ---------------------------------------------------------------------------
# Pallas kernel 2 (fused): bbox regression targets + per-class mask targets
# written directly in the final (F, C*M*M) mask_int32 layout.
# ---------------------------------------------------------------------------
def _bbox_mask_kernel(ex_ref, gt_ref, lbl_ref, meta_ref, bbox_ref, mask_ref,
                      *, mask_size):
    wx, wy, ww, wh = BBOX_REG_WEIGHTS
    inv_m = 1.0 / float(mask_size)

    ex1 = ex_ref[:, 0:1]
    ey1 = ex_ref[:, 1:2]
    ex2 = ex_ref[:, 2:3]
    ey2 = ex_ref[:, 3:4]
    gx1 = gt_ref[:, 0:1]
    gy1 = gt_ref[:, 1:2]
    gx2 = gt_ref[:, 2:3]
    gy2 = gt_ref[:, 3:4]

    # ---- bbox_transform_inv (Detectron) ----
    ew = ex2 - ex1 + 1.0
    eh = ey2 - ey1 + 1.0
    ecx = ex1 + 0.5 * ew
    ecy = ey1 + 0.5 * eh
    gw = gx2 - gx1 + 1.0
    gh = gy2 - gy1 + 1.0
    gcx = gx1 + 0.5 * gw
    gcy = gy1 + 0.5 * gh
    dx = wx * (gcx - ecx) / ew
    dy = wy * (gcy - ecy) / eh
    dw = ww * jnp.log(gw / ew)
    dh = wh * jnp.log(gh / eh)

    # Independent masked terms (parallel VALU selects), lane-dense (T,128) store.
    lane = jax.lax.broadcasted_iota(jnp.int32, bbox_ref.shape, 1)
    bbox_ref[...] = (jnp.where(lane == 0, dx, 0.0) + jnp.where(lane == 1, dy, 0.0) +
                     jnp.where(lane == 2, dw, 0.0) + jnp.where(lane == 3, dh, 0.0))

    # ---- fused per-class mask scatter ----
    # Precomputed per-column metadata (no int // or % by the non-pow2 mask size
    # or class stride in-kernel): class id, mask row, mask col.
    cls = meta_ref[0:1, :]                    # (1, C*M*M)
    row = meta_ref[1:2, :]
    col = meta_ref[2:3, :]
    lbl = lbl_ref[...]                        # (T, 1) assigned class per fg roi

    # TODO(synk): mask is rasterized from the assigned gt *box* (inside test),
    #             not gt segmentation polygons; width uses x2-x1 (no +1) crop
    #             convention — verify against the reference RoI-crop code.
    w = jnp.maximum(ex2 - ex1, 1.0)
    h = jnp.maximum(ey2 - ey1, 1.0)
    px = ex1 + (col + 0.5) * (w * inv_m)      # cell-center sample points (T, C*M*M)
    py = ey1 + (row + 0.5) * (h * inv_m)
    inside = ((px >= gx1) & (px <= gx2) & (py >= gy1) & (py <= gy2)).astype(jnp.float32)
    mask_ref[...] = jnp.where(cls == lbl, inside, -1.0)


def _choose_fg_tile(num_fg, width):
    fp8 = _round_up(max(num_fg, 1), 8)
    # Keep ~16 live (tile, width) f32 slabs (incl. double-buffered output block)
    # under ~16 MiB so the kernel fits v7x's smaller VMEM without squeezing
    # pipeline depth.
    cap = max(8, min(256, ((16 * 1024 * 1024) // max(width * 4 * 16, 1)) // 8 * 8))
    return min(fp8, cap)


def pallas_bbox_and_mask(fg_ex, fg_gt, fg_lbl, num_classes, mask_size):
    """fg_ex/fg_gt: (F,4) f32, fg_lbl: (F,) int class labels ->
    ((F,4) bbox deltas, (F, C*M*M) mask targets: -1 everywhere except the
    assigned-class slab which holds the {0,1} rasterized gt-box mask)."""
    F = fg_ex.shape[0]
    MM = mask_size * mask_size
    W = num_classes * MM
    tile = _choose_fg_tile(F, W)
    Fp = _round_up(max(F, 1), tile)

    def pad_rows(x):
        if x.shape[0] == Fp:
            return x
        return jnp.zeros((Fp,) + x.shape[1:], x.dtype).at[:x.shape[0]].set(x)

    ex_p = pad_rows(fg_ex.astype(jnp.float32))
    gt_p = pad_rows(fg_gt.astype(jnp.float32))
    lbl_p = pad_rows(fg_lbl.astype(jnp.float32).reshape(F, 1))

    # Static per-column metadata of the flattened (C*M*M) output (host numpy).
    j = np.arange(W)
    within = j % MM
    meta_np = np.zeros((8, W), np.float32)
    meta_np[0] = j // MM              # class id of this column
    meta_np[1] = within // mask_size  # mask row within the class slab
    meta_np[2] = within % mask_size   # mask col within the class slab
    meta = jnp.asarray(meta_np)

    bbox_o, mask_o = pl.pallas_call(
        functools.partial(_bbox_mask_kernel, mask_size=mask_size),
        grid=(Fp // tile,),
        in_specs=[
            pl.BlockSpec((tile, 4), lambda i: (i, 0)),
            pl.BlockSpec((tile, 4), lambda i: (i, 0)),
            pl.BlockSpec((tile, 1), lambda i: (i, 0)),
            pl.BlockSpec((8, W), lambda i: (0, 0)),          # invariant, fetched once
        ],
        out_specs=[
            pl.BlockSpec((tile, 128), lambda i: (i, 0)),
            pl.BlockSpec((tile, W), lambda i: (i, 0)),
        ],
        out_shape=[
            jax.ShapeDtypeStruct((Fp, 128), jnp.float32),
            jax.ShapeDtypeStruct((Fp, W), jnp.float32),
        ],
        compiler_params=pltpu.CompilerParams(
            dimension_semantics=("parallel",),
            vmem_limit_bytes=_VMEM_LIMIT),
    )(ex_p, gt_p, lbl_p, meta)
    return bbox_o[:F, :4], mask_o[:F]


# ---------------------------------------------------------------------------
# Single jitted device pipeline (no host round-trips between the kernels)
# ---------------------------------------------------------------------------
@functools.partial(jax.jit,
                   static_argnames=("num_fg", "num_bg", "num_classes", "mask_size"))
def _proposal_mask_target_device(cand, gt_boxes_p, gt_classes_p, im_scale,
                                 n_valid, n_gt, *,
                                 num_fg, num_bg, num_classes, mask_size):
    R = num_fg + num_bg
    Np = cand.shape[0]

    # ---- Pallas hot path 1: IoU + fused row max / argmax ----
    max_ov, gt_assign = pallas_iou_max_argmax(cand, gt_boxes_p)

    # ---- fg / bg sampling via two top-k calls (cheaper than full argsort) ----
    ridx = jnp.arange(Np, dtype=jnp.int32)
    valid = ridx < n_valid
    # TODO(synk): reference sample_rois uses FG_THRESH / BG_THRESH_HI/LO windows
    #             plus np.random.choice; deterministic IoU top/bottom-k here.
    _, fg_inds = jax.lax.top_k(jnp.where(valid, max_ov, -jnp.inf), num_fg)
    _, bg_inds = jax.lax.top_k(jnp.where(valid, -max_ov, -jnp.inf), num_bg)
    keep = jnp.concatenate([fg_inds, bg_inds], axis=0)

    sampled_boxes = cand[keep]
    labels = gt_classes_p[gt_assign[keep]]
    labels = labels.at[num_fg:].set(0)                     # background label
    sampled_rois = sampled_boxes * im_scale
    rois_blob = jnp.concatenate(
        [jnp.zeros((R, 1), jnp.float32), sampled_rois], axis=1)

    # ---- Pallas hot path 2 (fused): bbox targets + per-class mask targets ----
    fg_ex = cand[fg_inds]
    fg_gt = gt_boxes_p[gt_assign[fg_inds]]
    fg_lbl = labels[:num_fg]
    tgt_fg, mask_int32 = pallas_bbox_and_mask(fg_ex, fg_gt, fg_lbl,
                                              num_classes, mask_size)

    # Class-expanded bbox targets / weights (tiny: R x 4C).
    cls_ids = jnp.arange(num_classes, dtype=labels.dtype)
    oh = ((fg_lbl[:, None] == cls_ids[None, :]) &
          (fg_lbl[:, None] > 0)).astype(jnp.float32)
    bbox_tgt_fg = (oh[:, :, None] * tgt_fg[:, None, :]).reshape(num_fg, 4 * num_classes)
    bbox_in_fg = jnp.repeat(oh, 4, axis=1)
    zeros_bg = jnp.zeros((num_bg, 4 * num_classes), jnp.float32)
    bbox_targets = jnp.concatenate([bbox_tgt_fg, zeros_bg], axis=0)
    bbox_inside = jnp.concatenate([bbox_in_fg, zeros_bg], axis=0)
    bbox_outside = (bbox_inside > 0).astype(jnp.float32)

    mask_rois = rois_blob[:num_fg]
    roi_has_mask = jnp.concatenate(
        [jnp.ones((num_fg,), jnp.uint8), jnp.zeros((num_bg,), jnp.uint8)], axis=0)

    # ---- nongt_inds computed on device, fixed size (no blocking D2H of keep) ----
    r_idx = jnp.arange(R, dtype=jnp.int32)
    is_nongt = (keep >= n_gt) & (keep < n_valid)
    order = jnp.argsort(jnp.where(is_nongt, r_idx, r_idx + R))
    n_nongt = jnp.sum(is_nongt.astype(jnp.int32))
    # TODO(synk): reference returns a variable-length int64 index tensor; this is
    #             a fixed-size int32 array, valid entries first, padded with -1.
    nongt_inds = jnp.where(r_idx < n_nongt, order.astype(jnp.int32), -1)

    return (rois_blob, labels, bbox_targets, bbox_inside, bbox_outside,
            mask_rois, mask_int32, roi_has_mask, nongt_inds)


# ---------------------------------------------------------------------------
# Module-equivalent wrapper
# ---------------------------------------------------------------------------
class ProposalMaskTarget:
    def __init__(self, num_classes, batch_images, batch_rois, fg_fraction,
                 mask_size, binary_thresh):
        self.num_classes = num_classes
        self.batch_images = batch_images
        self.batch_rois = batch_rois
        self.fg_fraction = fg_fraction
        self.mask_size = mask_size
        self.binary_thresh = binary_thresh  # TODO(synk): unused (mask from gt box, not polygons)

    def __call__(self, rois, roidb, im_info):
        assert self.batch_rois == -1 or self.batch_rois % self.batch_images == 0, \
            "batchimages {} must devide batch_rois {}".format(self.batch_images, self.batch_rois)

        im_scale = float(np.asarray(im_info)[0, 2])
        proposals = np.asarray(rois, np.float32)[:, 1:5] / im_scale  # add_proposals: back to orig scale
        gt_boxes = np.asarray(roidb["boxes"], np.float32)
        gt_classes = np.asarray(roidb["gt_classes"], np.int32)
        G = gt_boxes.shape[0]
        assert G <= GT_LANES, f"at most {GT_LANES} gt boxes supported, got {G}"

        # add_proposals appends the proposals after the gt boxes in roidb['boxes']
        cand = np.concatenate([gt_boxes, proposals], axis=0).astype(np.float32)
        N = cand.shape[0]

        if self.batch_rois == -1:
            rois_per_image = N
        else:
            rois_per_image = self.batch_rois // self.batch_images
        num_fg = int(round(self.fg_fraction * rois_per_image))
        num_bg = rois_per_image - num_fg

        # Shape bucketing: pad the candidate count to a multiple of the row tile
        # and the gt count to a fixed 128 rows so the jitted pipeline (and both
        # Pallas kernels) compile once per bucket, not once per distinct N / G.
        tile = _row_tile()
        Np = _round_up(max(N, 1), tile)
        cand_p = np.zeros((Np, 4), np.float32)
        cand_p[:N] = cand
        gt_p = np.full((GT_LANES, 4), _GT_SENTINEL, np.float32)
        gt_p[:G] = gt_boxes
        gt_cls_p = np.zeros((GT_LANES,), np.int32)
        gt_cls_p[:G] = gt_classes

        outs = _proposal_mask_target_device(
            jnp.asarray(cand_p), jnp.asarray(gt_p), jnp.asarray(gt_cls_p),
            jnp.asarray(im_scale, jnp.float32),
            jnp.asarray(N, jnp.int32), jnp.asarray(G, jnp.int32),
            num_fg=num_fg, num_bg=num_bg,
            num_classes=self.num_classes, mask_size=self.mask_size)

        # TODO(synk): reference returns int64 labels / nongt_inds; TPU keeps int32
        #             (x64 disabled) — cast at the API boundary if int64 is required.
        return outs   # rois, labels, bbox_t, bbox_in_w, bbox_out_w,
                      # mask_rois, mask_int32, roi_has_mask, nongt_inds


if __name__ == "__main__":
    key = jax.random.PRNGKey(0)
    num_classes = 4
    mask_size = 14
    op = ProposalMaskTarget(num_classes=num_classes, batch_images=1, batch_rois=16,
                            fg_fraction=0.25, mask_size=mask_size, binary_thresh=0.4)

    H = W_IM = 128.0
    im_info = jnp.array([[H, W_IM, 1.0]], jnp.float32)

    gt_boxes = np.array([[10., 12., 50., 60.],
                         [64., 20., 120., 90.],
                         [30., 70., 80., 120.]], np.float32)
    gt_classes = np.array([1, 2, 3], np.int32)
    roidb = {"boxes": gt_boxes, "gt_classes": gt_classes}

    K = 61  # -> 3 gt + 61 proposals = 64 candidate boxes
    k1, k2, k3 = jax.random.split(key, 3)
    jit_idx = np.array([0, 1, 2, 0, 1, 2, 0, 1], np.int32)
    jitter = np.asarray(jax.random.uniform(k1, (8, 4), jnp.float32, -2.0, 2.0))
    near_gt = gt_boxes[jit_idx] + jitter                       # guaranteed fg proposals
    xy1 = np.asarray(jax.random.uniform(k2, (K - 8, 2), jnp.float32, 0.0, 100.0))
    wh = np.asarray(jax.random.uniform(k3, (K - 8, 2), jnp.float32, 4.0, 24.0))
    rand_boxes = np.concatenate([xy1, np.minimum(xy1 + wh, W_IM - 1.0)], axis=1)
    prop_boxes = np.clip(np.concatenate([near_gt, rand_boxes], axis=0),
                         0.0, W_IM - 1.0).astype(np.float32)
    rois = jnp.asarray(np.hstack([np.zeros((K, 1), np.float32), prop_boxes]), jnp.float32)

    outs = op(rois, roidb, im_info)
    for o in outs:
        jax.block_until_ready(o)
    print("KERNEL_OK")
</pallas_src>

<mosaic_0001>
module attributes {stable_mosaic.version = 11 : i64} {
  func.func @_iou_max_argmax_kernel(%arg0: i32, %arg1: memref<8x512xf32, #tpu.memory_space<vmem>>, %arg2: memref<128x8xf32, #tpu.memory_space<vmem>>, %arg3: memref<1x512xf32, #tpu.memory_space<vmem>>, %arg4: memref<1x512xi32, #tpu.memory_space<vmem>>) attributes {dimension_semantics = [#tpu.dimension_semantics<parallel>], iteration_bounds = array<i64: 1>, scalar_prefetch = 0 : i64, scratch_operands = 0 : i64, tpu.core_type = #tpu.core_type<tc>, window_params = [{transform_indices = @transform_0, window_bounds = array<i64: 8, 512>}, {pipeline_mode = #tpu.pipeline_mode<synchronous>, transform_indices = @transform_1, window_bounds = array<i64: 128, 8>}, {transform_indices = @transform_2, window_bounds = array<i64: 1, 512>}, {transform_indices = @transform_3, window_bounds = array<i64: 1, 512>}]} {
    %c0 = arith.constant 0 : index
    %c0_0 = arith.constant 0 : index
    %0 = vector.load %arg1[%c0, %c0_0] : memref<8x512xf32, #tpu.memory_space<vmem>>, vector<1x512xf32>
    %c1 = arith.constant 1 : index
    %c0_1 = arith.constant 0 : index
    %1 = vector.load %arg1[%c1, %c0_1] : memref<8x512xf32, #tpu.memory_space<vmem>>, vector<1x512xf32>
    %c2 = arith.constant 2 : index
    %c0_2 = arith.constant 0 : index
    %2 = vector.load %arg1[%c2, %c0_2] : memref<8x512xf32, #tpu.memory_space<vmem>>, vector<1x512xf32>
    %c3 = arith.constant 3 : index
    %c0_3 = arith.constant 0 : index
    %3 = vector.load %arg1[%c3, %c0_3] : memref<8x512xf32, #tpu.memory_space<vmem>>, vector<1x512xf32>
    %c0_4 = arith.constant 0 : index
    %c0_5 = arith.constant 0 : index
    %4 = vector.load %arg2[%c0_4, %c0_5] : memref<128x8xf32, #tpu.memory_space<vmem>>, vector<128x1xf32>
    %c0_6 = arith.constant 0 : index
    %c1_7 = arith.constant 1 : index
    %5 = vector.load %arg2[%c0_6, %c1_7] : memref<128x8xf32, #tpu.memory_space<vmem>>, vector<128x1xf32>
    %c0_8 = arith.constant 0 : index
    %c2_9 = arith.constant 2 : index
    %6 = vector.load %arg2[%c0_8, %c2_9] : memref<128x8xf32, #tpu.memory_space<vmem>>, vector<128x1xf32>
    %c0_10 = arith.constant 0 : index
    %c3_11 = arith.constant 3 : index
    %7 = vector.load %arg2[%c0_10, %c3_11] : memref<128x8xf32, #tpu.memory_space<vmem>>, vector<128x1xf32>
    %8 = arith.subf %2, %0 : vector<1x512xf32>
    %cst = arith.constant 1.000000e+00 : f32
    %9 = vector.broadcast %cst : f32 to vector<1x512xf32>
    %10 = arith.addf %8, %9 : vector<1x512xf32>
    %11 = arith.subf %3, %1 : vector<1x512xf32>
    %cst_12 = arith.constant 1.000000e+00 : f32
    %12 = vector.broadcast %cst_12 : f32 to vector<1x512xf32>
    %13 = arith.addf %11, %12 : vector<1x512xf32>
    %14 = arith.mulf %10, %13 : vector<1x512xf32>
    %15 = arith.subf %6, %4 : vector<128x1xf32>
    %cst_13 = arith.constant 1.000000e+00 : f32
    %16 = vector.broadcast %cst_13 : f32 to vector<128x1xf32>
    %17 = arith.addf %15, %16 : vector<128x1xf32>
    %18 = arith.subf %7, %5 : vector<128x1xf32>
    %cst_14 = arith.constant 1.000000e+00 : f32
    %19 = vector.broadcast %cst_14 : f32 to vector<128x1xf32>
    %20 = arith.addf %18, %19 : vector<128x1xf32>
    %21 = arith.mulf %17, %20 : vector<128x1xf32>
    %22 = vector.broadcast %2 : vector<1x512xf32> to vector<128x512xf32>
    %23 = vector.broadcast %6 : vector<128x1xf32> to vector<128x512xf32>
    %24 = arith.minimumf %22, %23 : vector<128x512xf32>
    %25 = vector.broadcast %0 : vector<1x512xf32> to vector<128x512xf32>
    %26 = vector.broadcast %4 : vector<128x1xf32> to vector<128x512xf32>
    %27 = arith.maximumf %25, %26 : vector<128x512xf32>
    %28 = arith.subf %24, %27 : vector<128x512xf32>
    %cst_15 = arith.constant 1.000000e+00 : f32
    %29 = vector.broadcast %cst_15 : f32 to vector<128x512xf32>
    %30 = arith.addf %28, %29 : vector<128x512xf32>
    %cst_16 = arith.constant 0.000000e+00 : f32
    %31 = vector.broadcast %cst_16 : f32 to vector<128x512xf32>
    %32 = arith.maximumf %30, %31 : vector<128x512xf32>
    %33 = vector.broadcast %3 : vector<1x512xf32> to vector<128x512xf32>
    %34 = vector.broadcast %7 : vector<128x1xf32> to vector<128x512xf32>
    %35 = arith.minimumf %33, %34 : vector<128x512xf32>
    %36 = vector.broadcast %1 : vector<1x512xf32> to vector<128x512xf32>
    %37 = vector.broadcast %5 : vector<128x1xf32> to vector<128x512xf32>
    %38 = arith.maximumf %36, %37 : vector<128x512xf32>
    %39 = arith.subf %35, %38 : vector<128x512xf32>
    %cst_17 = arith.constant 1.000000e+00 : f32
    %40 = vector.broadcast %cst_17 : f32 to vector<128x512xf32>
    %41 = arith.addf %39, %40 : vector<128x512xf32>
    %cst_18 = arith.constant 0.000000e+00 : f32
    %42 = vector.broadcast %cst_18 : f32 to vector<128x512xf32>
    %43 = arith.maximumf %41, %42 : vector<128x512xf32>
    %44 = arith.mulf %32, %43 : vector<128x512xf32>
    %45 = vector.broadcast %14 : vector<1x512xf32> to vector<128x512xf32>
    %46 = vector.broadcast %21 : vector<128x1xf32> to vector<128x512xf32>
    %47 = arith.addf %45, %46 : vector<128x512xf32>
    %48 = arith.subf %47, %44 : vector<128x512xf32>
    %49 = arith.divf %44, %48 : vector<128x512xf32>
    %cst_19 = arith.constant dense<0xFF800000> : vector<512xf32>
    %50 = vector.multi_reduction <maximumf>, %49, %cst_19 [0] : vector<128x512xf32> to vector<512xf32>
    %51 = vector.shape_cast %50 : vector<512xf32> to vector<1x512xf32>
    %52 = tpu.iota {dimensions = array<i32: 0>} : vector<128x512xi32>
    %53 = arith.sitofp %52 : vector<128x512xi32> to vector<128x512xf32>
    %54 = vector.broadcast %51 : vector<1x512xf32> to vector<128x512xf32>
    %55 = arith.cmpf oeq, %49, %54 : vector<128x512xf32>
    %cst_20 = arith.constant 1.280000e+02 : f32
    %56 = vector.broadcast %cst_20 : f32 to vector<128x512xf32>
    %57 = arith.select %55, %53, %56 : vector<128x512xi1>, vector<128x512xf32>
    %cst_21 = arith.constant dense<0x7F800000> : vector<512xf32>
    %58 = vector.multi_reduction <minimumf>, %57, %cst_21 [0] : vector<128x512xf32> to vector<512xf32>
    %59 = vector.shape_cast %58 : vector<512xf32> to vector<1x512xf32>
    %c0_22 = arith.constant 0 : index
    %c0_23 = arith.constant 0 : index
    %60 = vector.load %arg3[%c0_22, %c0_23] : memref<1x512xf32, #tpu.memory_space<vmem>>, vector<1x512xf32>
    tpu.vector_store %arg3[%c0_22, %c0_23], %51 {strides = array<i32>} : memref<1x512xf32, #tpu.memory_space<vmem>>, vector<1x512xf32>,
    %61 = arith.fptosi %59 : vector<1x512xf32> to vector<1x512xi32>
    %c0_24 = arith.constant 0 : index
    %c0_25 = arith.constant 0 : index
    %62 = vector.load %arg4[%c0_24, %c0_25] : memref<1x512xi32, #tpu.memory_space<vmem>>, vector<1x512xi32>
    tpu.vector_store %arg4[%c0_24, %c0_25], %61 {strides = array<i32>} : memref<1x512xi32, #tpu.memory_space<vmem>>, vector<1x512xi32>,
    return
  }
  func.func @transform_0(%arg0: i32) -> (i32, i32) {
    %c0_i32 = arith.constant 0 : i32
    %c0_i32_0 = arith.constant 0 : i32
    return %c0_i32, %arg0 : i32, i32
  }
  func.func @transform_1(%arg0: i32) -> (i32, i32) {
    %c0_i32 = arith.constant 0 : i32
    %c0_i32_0 = arith.constant 0 : i32
    %c0_i32_1 = arith.constant 0 : i32
    return %c0_i32, %c0_i32_0 : i32, i32
  }
  func.func @transform_2(%arg0: i32) -> (i32, i32) {
    %c0_i32 = arith.constant 0 : i32
    %c0_i32_0 = arith.constant 0 : i32
    return %c0_i32, %arg0 : i32, i32
  }
  func.func @transform_3(%arg0: i32) -> (i32, i32) {
    %c0_i32 = arith.constant 0 : i32
    %c0_i32_0 = arith.constant 0 : i32
    return %c0_i32, %arg0 : i32, i32
  }
}

module attributes {stable_mosaic.version = 11 : i64} {
  func.func @_bbox_mask_kernel(%arg0: i32, %arg1: memref<8x4xf32, #tpu.memory_space<vmem>>, %arg2: memref<8x4xf32, #tpu.memory_space<vmem>>, %arg3: memref<8x1xf32, #tpu.memory_space<vmem>>, %arg4: memref<8x784xf32, #tpu.memory_space<vmem>>, %arg5: memref<8x128xf32, #tpu.memory_space<vmem>>, %arg6: memref<8x784xf32, #tpu.memory_space<vmem>>) attributes {dimension_semantics = [#tpu.dimension_semantics<parallel>], iteration_bounds = array<i64: 1>, scalar_prefetch = 0 : i64, scratch_operands = 0 : i64, tpu.core_type = #tpu.core_type<tc>, window_params = [{transform_indices = @transform_0, window_bounds = array<i64: 8, 4>}, {transform_indices = @transform_1, window_bounds = array<i64: 8, 4>}, {transform_indices = @transform_2, window_bounds = array<i64: 8, 1>}, {pipeline_mode = #tpu.pipeline_mode<synchronous>, transform_indices = @transform_3, window_bounds = array<i64: 8, 784>}, {transform_indices = @transform_4, window_bounds = array<i64: 8, 128>}, {transform_indices = @transform_5, window_bounds = array<i64: 8, 784>}]} {
    %c0 = arith.constant 0 : index
    %c0_0 = arith.constant 0 : index
    %0 = vector.load %arg1[%c0, %c0_0] : memref<8x4xf32, #tpu.memory_space<vmem>>, vector<8x1xf32>
    %c0_1 = arith.constant 0 : index
    %c1 = arith.constant 1 : index
    %1 = vector.load %arg1[%c0_1, %c1] : memref<8x4xf32, #tpu.memory_space<vmem>>, vector<8x1xf32>
    %c0_2 = arith.constant 0 : index
    %c2 = arith.constant 2 : index
    %2 = vector.load %arg1[%c0_2, %c2] : memref<8x4xf32, #tpu.memory_space<vmem>>, vector<8x1xf32>
    %c0_3 = arith.constant 0 : index
    %c3 = arith.constant 3 : index
    %3 = vector.load %arg1[%c0_3, %c3] : memref<8x4xf32, #tpu.memory_space<vmem>>, vector<8x1xf32>
    %c0_4 = arith.constant 0 : index
    %c0_5 = arith.constant 0 : index
    %4 = vector.load %arg2[%c0_4, %c0_5] : memref<8x4xf32, #tpu.memory_space<vmem>>, vector<8x1xf32>
    %c0_6 = arith.constant 0 : index
    %c1_7 = arith.constant 1 : index
    %5 = vector.load %arg2[%c0_6, %c1_7] : memref<8x4xf32, #tpu.memory_space<vmem>>, vector<8x1xf32>
    %c0_8 = arith.constant 0 : index
    %c2_9 = arith.constant 2 : index
    %6 = vector.load %arg2[%c0_8, %c2_9] : memref<8x4xf32, #tpu.memory_space<vmem>>, vector<8x1xf32>
    %c0_10 = arith.constant 0 : index
    %c3_11 = arith.constant 3 : index
    %7 = vector.load %arg2[%c0_10, %c3_11] : memref<8x4xf32, #tpu.memory_space<vmem>>, vector<8x1xf32>
    %8 = arith.subf %2, %0 : vector<8x1xf32>
    %cst = arith.constant 1.000000e+00 : f32
    %9 = vector.broadcast %cst : f32 to vector<8x1xf32>
    %10 = arith.addf %8, %9 : vector<8x1xf32>
    %11 = arith.subf %3, %1 : vector<8x1xf32>
    %cst_12 = arith.constant 1.000000e+00 : f32
    %12 = vector.broadcast %cst_12 : f32 to vector<8x1xf32>
    %13 = arith.addf %11, %12 : vector<8x1xf32>
    %cst_13 = arith.constant 5.000000e-01 : f32
    %14 = vector.broadcast %cst_13 : f32 to vector<8x1xf32>
    %15 = arith.mulf %14, %10 : vector<8x1xf32>
    %16 = arith.addf %0, %15 : vector<8x1xf32>
    %cst_14 = arith.constant 5.000000e-01 : f32
    %17 = vector.broadcast %cst_14 : f32 to vector<8x1xf32>
    %18 = arith.mulf %17, %13 : vector<8x1xf32>
    %19 = arith.addf %1, %18 : vector<8x1xf32>
    %20 = arith.subf %6, %4 : vector<8x1xf32>
    %cst_15 = arith.constant 1.000000e+00 : f32
    %21 = vector.broadcast %cst_15 : f32 to vector<8x1xf32>
    %22 = arith.addf %20, %21 : vector<8x1xf32>
    %23 = arith.subf %7, %5 : vector<8x1xf32>
    %cst_16 = arith.constant 1.000000e+00 : f32
    %24 = vector.broadcast %cst_16 : f32 to vector<8x1xf32>
    %25 = arith.addf %23, %24 : vector<8x1xf32>
    %cst_17 = arith.constant 5.000000e-01 : f32
    %26 = vector.broadcast %cst_17 : f32 to vector<8x1xf32>
    %27 = arith.mulf %26, %22 : vector<8x1xf32>
    %28 = arith.addf %4, %27 : vector<8x1xf32>
    %cst_18 = arith.constant 5.000000e-01 : f32
    %29 = vector.broadcast %cst_18 : f32 to vector<8x1xf32>
    %30 = arith.mulf %29, %25 : vector<8x1xf32>
    %31 = arith.addf %5, %30 : vector<8x1xf32>
    %32 = arith.subf %28, %16 : vector<8x1xf32>
    %cst_19 = arith.constant 1.000000e+01 : f32
    %33 = vector.broadcast %cst_19 : f32 to vector<8x1xf32>
    %34 = arith.mulf %33, %32 : vector<8x1xf32>
    %35 = arith.divf %34, %10 : vector<8x1xf32>
    %36 = arith.subf %31, %19 : vector<8x1xf32>
    %cst_20 = arith.constant 1.000000e+01 : f32
    %37 = vector.broadcast %cst_20 : f32 to vector<8x1xf32>
    %38 = arith.mulf %37, %36 : vector<8x1xf32>
    %39 = arith.divf %38, %13 : vector<8x1xf32>
    %40 = arith.divf %22, %10 : vector<8x1xf32>
    %41 = math.log %40 : vector<8x1xf32>
    %cst_21 = arith.constant 5.000000e+00 : f32
    %42 = vector.broadcast %cst_21 : f32 to vector<8x1xf32>
    %43 = arith.mulf %42, %41 : vector<8x1xf32>
    %44 = arith.divf %25, %13 : vector<8x1xf32>
    %45 = math.log %44 : vector<8x1xf32>
    %cst_22 = arith.constant 5.000000e+00 : f32
    %46 = vector.broadcast %cst_22 : f32 to vector<8x1xf32>
    %47 = arith.mulf %46, %45 : vector<8x1xf32>
    %48 = tpu.iota {dimensions = array<i32: 1>} : vector<8x128xi32>
    %c0_i32 = arith.constant 0 : i32
    %49 = vector.broadcast %c0_i32 : i32 to vector<8x128xi32>
    %50 = arith.cmpi eq, %48, %49 : vector<8x128xi32>
    %cst_23 = arith.constant 0.000000e+00 : f32
    %51 = vector.shape_cast %35 : vector<8x1xf32> to vector<8x1xf32>
    %52 = vector.broadcast %51 : vector<8x1xf32> to vector<8x128xf32>
    %53 = vector.broadcast %cst_23 : f32 to vector<8x128xf32>
    %54 = arith.select %50, %52, %53 : vector<8x128xi1>, vector<8x128xf32>
    %c1_i32 = arith.constant 1 : i32
    %55 = vector.broadcast %c1_i32 : i32 to vector<8x128xi32>
    %56 = arith.cmpi eq, %48, %55 : vector<8x128xi32>
    %cst_24 = arith.constant 0.000000e+00 : f32
    %57 = vector.shape_cast %39 : vector<8x1xf32> to vector<8x1xf32>
    %58 = vector.broadcast %57 : vector<8x1xf32> to vector<8x128xf32>
    %59 = vector.broadcast %cst_24 : f32 to vector<8x128xf32>
    %60 = arith.select %56, %58, %59 : vector<8x128xi1>, vector<8x128xf32>
    %61 = arith.addf %54, %60 : vector<8x128xf32>
    %c2_i32 = arith.constant 2 : i32
    %62 = vector.broadcast %c2_i32 : i32 to vector<8x128xi32>
    %63 = arith.cmpi eq, %48, %62 : vector<8x128xi32>
    %cst_25 = arith.constant 0.000000e+00 : f32
    %64 = vector.shape_cast %43 : vector<8x1xf32> to vector<8x1xf32>
    %65 = vector.broadcast %64 : vector<8x1xf32> to vector<8x128xf32>
    %66 = vector.broadcast %cst_25 : f32 to vector<8x128xf32>
    %67 = arith.select %63, %65, %66 : vector<8x128xi1>, vector<8x128xf32>
    %68 = arith.addf %61, %67 : vector<8x128xf32>
    %c3_i32 = arith.constant 3 : i32
    %69 = vector.broadcast %c3_i32 : i32 to vector<8x128xi32>
    %70 = arith.cmpi eq, %48, %69 : vector<8x128xi32>
    %cst_26 = arith.constant 0.000000e+00 : f32
    %71 = vector.shape_cast %47 : vector<8x1xf32> to vector<8x1xf32>
    %72 = vector.broadcast %71 : vector<8x1xf32> to vector<8x128xf32>
    %73 = vector.broadcast %cst_26 : f32 to vector<8x128xf32>
    %74 = arith.select %70, %72, %73 : vector<8x128xi1>, vector<8x128xf32>
    %75 = arith.addf %68, %74 : vector<8x128xf32>
    %c0_27 = arith.constant 0 : index
    %c0_28 = arith.constant 0 : index
    %76 = vector.load %arg5[%c0_27, %c0_28] : memref<8x128xf32, #tpu.memory_space<vmem>>, vector<8x128xf32>
    tpu.vector_store %arg5[%c0_27, %c0_28], %75 {strides = array<i32>} : memref<8x128xf32, #tpu.memory_space<vmem>>, vector<8x128xf32>,
    %c0_29 = arith.constant 0 : index
    %c0_30 = arith.constant 0 : index
    %77 = vector.load %arg4[%c0_29, %c0_30] : memref<8x784xf32, #tpu.memory_space<vmem>>, vector<1x784xf32>
    %c1_31 = arith.constant 1 : index
    %c0_32 = arith.constant 0 : index
    %78 = vector.load %arg4[%c1_31, %c0_32] : memref<8x784xf32, #tpu.memory_space<vmem>>, vector<1x784xf32>
    %c2_33 = arith.constant 2 : index
    %c0_34 = arith.constant 0 : index
    %79 = vector.load %arg4[%c2_33, %c0_34] : memref<8x784xf32, #tpu.memory_space<vmem>>, vector<1x784xf32>
    %c0_35 = arith.constant 0 : index
    %c0_36 = arith.constant 0 : index
    %80 = vector.load %arg3[%c0_35, %c0_36] : memref<8x1xf32, #tpu.memory_space<vmem>>, vector<8x1xf32>
    %81 = arith.subf %2, %0 : vector<8x1xf32>
    %cst_37 = arith.constant 1.000000e+00 : f32
    %82 = vector.broadcast %cst_37 : f32 to vector<8x1xf32>
    %83 = arith.maximumf %81, %82 : vector<8x1xf32>
    %84 = arith.subf %3, %1 : vector<8x1xf32>
    %cst_38 = arith.constant 1.000000e+00 : f32
    %85 = vector.broadcast %cst_38 : f32 to vector<8x1xf32>
    %86 = arith.maximumf %84, %85 : vector<8x1xf32>
    %cst_39 = arith.constant 5.000000e-01 : f32
    %87 = vector.broadcast %cst_39 : f32 to vector<1x784xf32>
    %88 = arith.addf %79, %87 : vector<1x784xf32>
    %cst_40 = arith.constant 0.0714285746 : f32
    %89 = vector.broadcast %cst_40 : f32 to vector<8x1xf32>
    %90 = arith.mulf %83, %89 : vector<8x1xf32>
    %91 = vector.broadcast %88 : vector<1x784xf32> to vector<8x784xf32>
    %92 = vector.broadcast %90 : vector<8x1xf32> to vector<8x784xf32>
    %93 = arith.mulf %91, %92 : vector<8x784xf32>
    %94 = vector.broadcast %0 : vector<8x1xf32> to vector<8x784xf32>
    %95 = arith.addf %94, %93 : vector<8x784xf32>
    %cst_41 = arith.constant 5.000000e-01 : f32
    %96 = vector.broadcast %cst_41 : f32 to vector<1x784xf32>
    %97 = arith.addf %78, %96 : vector<1x784xf32>
    %cst_42 = arith.constant 0.0714285746 : f32
    %98 = vector.broadcast %cst_42 : f32 to vector<8x1xf32>
    %99 = arith.mulf %86, %98 : vector<8x1xf32>
    %100 = vector.broadcast %97 : vector<1x784xf32> to vector<8x784xf32>
    %101 = vector.broadcast %99 : vector<8x1xf32> to vector<8x784xf32>
    %102 = arith.mulf %100, %101 : vector<8x784xf32>
    %103 = vector.broadcast %1 : vector<8x1xf32> to vector<8x784xf32>
    %104 = arith.addf %103, %102 : vector<8x784xf32>
    %105 = vector.broadcast %4 : vector<8x1xf32> to vector<8x784xf32>
    %106 = arith.cmpf oge, %95, %105 : vector<8x784xf32>
    %107 = vector.broadcast %6 : vector<8x1xf32> to vector<8x784xf32>
    %108 = arith.cmpf ole, %95, %107 : vector<8x784xf32>
    %109 = arith.andi %106, %108 : vector<8x784xi1>
    %110 = vector.broadcast %5 : vector<8x1xf32> to vector<8x784xf32>
    %111 = arith.cmpf oge, %104, %110 : vector<8x784xf32>
    %112 = arith.andi %109, %111 : vector<8x784xi1>
    %113 = vector.broadcast %7 : vector<8x1xf32> to vector<8x784xf32>
    %114 = arith.cmpf ole, %104, %113 : vector<8x784xf32>
    %115 = arith.andi %112, %114 : vector<8x784xi1>
    %116 = arith.extui %115 : vector<8x784xi1> to vector<8x784xi32>
    %117 = arith.sitofp %116 : vector<8x784xi32> to vector<8x784xf32>
    %118 = vector.broadcast %77 : vector<1x784xf32> to vector<8x784xf32>
    %119 = vector.broadcast %80 : vector<8x1xf32> to vector<8x784xf32>
    %120 = arith.cmpf oeq, %118, %119 : vector<8x784xf32>
    %cst_43 = arith.constant -1.000000e+00 : f32
    %121 = vector.broadcast %cst_43 : f32 to vector<8x784xf32>
    %122 = arith.select %120, %117, %121 : vector<8x784xi1>, vector<8x784xf32>
    %c0_44 = arith.constant 0 : index
    %c0_45 = arith.constant 0 : index
    %123 = vector.load %arg6[%c0_44, %c0_45] : memref<8x784xf32, #tpu.memory_space<vmem>>, vector<8x784xf32>
    tpu.vector_store %arg6[%c0_44, %c0_45], %122 {strides = array<i32>} : memref<8x784xf32, #tpu.memory_space<vmem>>, vector<8x784xf32>,
    return
  }
  func.func @transform_0(%arg0: i32) -> (i32, i32) {
    %c0_i32 = arith.constant 0 : i32
    %c0_i32_0 = arith.constant 0 : i32
    return %arg0, %c0_i32 : i32, i32
  }
  func.func @transform_1(%arg0: i32) -> (i32, i32) {
    %c0_i32 = arith.constant 0 : i32
    %c0_i32_0 = arith.constant 0 : i32
    return %arg0, %c0_i32 : i32, i32
  }
  func.func @transform_2(%arg0: i32) -> (i32, i32) {
    %c0_i32 = arith.constant 0 : i32
    %c0_i32_0 = arith.constant 0 : i32
    return %arg0, %c0_i32 : i32, i32
  }
  func.func @transform_3(%arg0: i32) -> (i32, i32) {
    %c0_i32 = arith.constant 0 : i32
    %c0_i32_0 = arith.constant 0 : i32
    %c0_i32_1 = arith.constant 0 : i32
    return %c0_i32, %c0_i32_0 : i32, i32
  }
  func.func @transform_4(%arg0: i32) -> (i32, i32) {
    %c0_i32 = arith.constant 0 : i32
    %c0_i32_0 = arith.constant 0 : i32
    return %arg0, %c0_i32 : i32, i32
  }
  func.func @transform_5(%arg0: i32) -> (i32, i32) {
    %c0_i32 = arith.constant 0 : i32
    %c0_i32_0 = arith.constant 0 : i32
    return %arg0, %c0_i32 : i32, i32
  }
}

</mosaic_0001>

<bundles_post_ra>
// kernel: mul.0
= control target key start
LH: loop header
LB: loop body
LE: loop exit
PB: predicated region body
PF: predicated region fallthrough
CT: control target
= control target key end

     0   :  { %s34_s0 = inlined_call_operand.vmem [shape: f32[4,16], index: 0, kind: input, shape index: {}]   ;;  %s35_s1 = inlined_call_operand.vmem [shape: f32[4,16], index: 1, kind: input, shape index: {}]   ;;  %s36_s2 = inlined_call_operand.vmem [shape: f32[4,16], index: 2, kind: output, shape index: {}]  }
   0x1   :  { %v3_v0 = vld [vmem:[%s34_s0] sm:$0xf] }
   0x2   :  { %v4_v1 = vld [vmem:[%s35_s1] sm:$0xf] }
   0x3   :  { %v7_v2 = vmul.f32 %v4_v1, %v3_v0 }
   0x5   :  { %9 = vst [vmem:[%s36_s2] sm:$0xf] %v7_v2 }

// kernel: _proposal_mask_target_device.2
= control target key start
LH: loop header
LB: loop body
LE: loop exit
PB: predicated region body
PF: predicated region fallthrough
CT: control target
= control target key end

     0   :  { %v4993_v2 = vmov 2   ;;  %v2191_v3 = vmov 0   ;;  %s2192_s16 = smov 2   ;;  %s4988_s1 = inlined_call_operand.vmem [shape: f32[128,8], index: 1, kind: input, shape index: {}]   ;;  %s4989_s0 = inlined_call_operand.vmem [shape: f32[8,512], index: 0, kind: input, shape index: {}]   ;;  %s4990_s2 = inlined_call_operand.vmem [shape: f32[1,512], index: 2, kind: output, shape index: {0}]   ;;  %s4991_s3 = inlined_call_operand.vmem [shape: s32[1,512], index: 3, kind: output, shape index: {1}]  }
   0x1   :  { %v2220_v0 = vld [vmem:[%s4988_s1 + $0x10] sm:$0xff]  ;;  %v2225_v1 = vld [vmem:[%s4988_s1] sm:$0xff]  ;;  %2036 = vset.pattern.permute.xlu1 %v4993_v2  ;;  %2038 = vset.pattern.permute.xlu0 %v2191_v3  ;;  %v2233_v4 = vld [vmem:[%s4988_s1 + $0x18] sm:$0xff] }
   0x2   :  { %61 = vrot.lane.b32.xlu1 %v2220_v0, %s2192_s16  ;;  %57 = vrot.lane.b32.xlu0 %v2225_v1, %s2192_s16  ;;  %v2238_v5 = vld [vmem:[%s4988_s1 + $0x8] sm:$0xff]  ;;  %v2250_v7 = vld [vmem:[%s4988_s1 + $0x20] sm:$0xff] }
   0x3   :  { %v2245_v6 = vld [vmem:[%s4988_s1 + $0x28] sm:$0xff]  ;;  %v2257_v8 = vld [vmem:[%s4988_s1 + $0x38] sm:$0xff]  ;;  %v2262_v9 = vld [vmem:[%s4988_s1 + $0x30] sm:$0xff] }
   0x4   :  { %v2269_v10 = vld [vmem:[%s4988_s1 + $0x48] sm:$0xff]  ;;  %v2274_v11 = vld [vmem:[%s4988_s1 + $0x40] sm:$0xff]  ;;  %v2281_v12 = vld [vmem:[%s4988_s1 + $0x58] sm:$0xff] }
   0x5   :  { %v2286_v13 = vld [vmem:[%s4988_s1 + $0x50] sm:$0xff]  ;;  %v2293_v14 = vld [vmem:[%s4988_s1 + $0x68] sm:$0xff]  ;;  %v2298_v15 = vld [vmem:[%s4988_s1 + $0x60] sm:$0xff] }
   0x6   :  { %63 = vrot.lane.b32.xlu1 %v2233_v4, %s2192_s16  ;;  %59 = vrot.lane.b32.xlu0 %v2238_v5, %s2192_s16  ;;  %v2305_v16 = vld [vmem:[%s4988_s1 + $0x78] sm:$0xff]  ;;  %v2310_v17 = vld [vmem:[%s4988_s1 + $0x70] sm:$0xff]  ;;  %s2193_s1 = smov 127  }
   0xa   :  { %67 = vrot.lane.b32.xlu1 %v2245_v6, %s2192_s16  ;;  %65 = vrot.lane.b32.xlu0 %v2250_v7, %s2192_s16 }
   0xe   :  { %71 = vrot.lane.b32.xlu1 %v2257_v8, %s2192_s16  ;;  %69 = vrot.lane.b32.xlu0 %v2262_v9, %s2192_s16 }
  0x12   :  { %75 = vrot.lane.b32.xlu1 %v2269_v10, %s2192_s16  ;;  %73 = vrot.lane.b32.xlu0 %v2274_v11, %s2192_s16 }
  0x16   :  { %79 = vrot.lane.b32.xlu1 %v2281_v12, %s2192_s16  ;;  %77 = vrot.lane.b32.xlu0 %v2286_v13, %s2192_s16 }
  0x1a   :  { %83 = vrot.lane.b32.xlu1 %v2293_v14, %s2192_s16  ;;  %81 = vrot.lane.b32.xlu0 %v2298_v15, %s2192_s16 }
  0x1e   :  { %87 = vrot.lane.b32.xlu1 %v2305_v16, %s2192_s16  ;;  %85 = vrot.lane.b32.xlu0 %v2310_v17, %s2192_s16 }
  0x22   :  { %243 = vperm.xlu1 %2036, %v2238_v5   ;;  %392 = vperm.xlu0 %2038, %v2238_v5  }
  0x26   :  { %247 = vperm.xlu1 %2036, %v2220_v0   ;;  %404 = vperm.xlu0 %2038, %v2250_v7  }
  0x2a   :  { %255 = vperm.xlu1 %2036, %v2250_v7   ;;  %412 = vperm.xlu0 %2038, %v2262_v9  }
  0x2e   :  { %263 = vperm.xlu1 %2036, %v2262_v9   ;;  %420 = vperm.xlu0 %2038, %v2274_v11  }
  0x32   :  { %271 = vperm.xlu1 %2036, %v2274_v11   ;;  %428 = vperm.xlu0 %2038, %v2286_v13  }
  0x36   :  { %279 = vperm.xlu1 %2036, %v2286_v13   ;;  %436 = vperm.xlu0 %2038, %v2298_v15  }
  0x3a   :  { %287 = vperm.xlu1 %2036, %v2298_v15  }
  0x3e   :  { %295 = vperm.xlu1 %2036, %v2310_v17  }
  0x42   :  { %2037 = vset.pattern.permute.xlu1 %v2191_v3 }
  0x43   :  { %388 = vperm.xlu1 %2037, %v2225_v1  }
  0x47   :  { %396 = vperm.xlu1 %2037, %v2220_v0  }
  0x4b   :  { %400 = vperm.xlu1 %2037, %v2233_v4  }
  0x4f   :  { %408 = vperm.xlu1 %2037, %v2245_v6  }
  0x53   :  { %416 = vperm.xlu1 %2037, %v2257_v8  }
  0x57   :  { %424 = vperm.xlu1 %2037, %v2269_v10  }
  0x5b   :  { %432 = vperm.xlu1 %2037, %v2281_v12  }
  0x74   :  { %v58_v18 = vpop.permute.xlu0 %57  ;;  %v62_v19 = vpop.permute.xlu1 %61 }
  0x75   :  { %v105_v20 = vsub.f32 %v2225_v1, %v58_v18  ;;  %v107_v21 = vsub.f32 %v2220_v0, %v62_v19  ;;  %v4995_v19 = vmov 1  }
  0x77   :  { %v2337_v22 = vadd.f32 1.0, %v105_v20  ;;  %v2339_v25 = vadd.f32 1.0, %v107_v21 }
  0x78   :  { %v60_v23 = vpop.permute.xlu0 %59  ;;  %v64_v24 = vpop.permute.xlu1 %63 }
  0x79   :  { %v106_v26 = vsub.f32 %v2238_v5, %v60_v23  ;;  %153 = vrot.lane.b32.xlu0 %v2337_v22, %s2193_s1  ;;  %v108_v27 = vsub.f32 %v2233_v4, %v64_v24  ;;  %v5002_v24 = vmov 3  }
  0x7b   :  { %v2345_v28 = vadd.f32 1.0, %v106_v26  ;;  %v2347_v31 = vadd.f32 1.0, %v108_v27  ;;  %v4992_v27 = vlaneseq }
  0x7c   :  { %v66_v29 = vpop.permute.xlu0 %65  ;;  %v68_v30 = vpop.permute.xlu1 %67 }
  0x7d   :  { %v109_v32 = vsub.f32 %v2250_v7, %v66_v29  ;;  %157 = vrot.lane.b32.xlu0 %v2339_v25, %s2193_s1  ;;  %155 = vrot.lane.b32.xlu1 %v2345_v28, %s2193_s1  ;;  %v110_v33 = vsub.f32 %v2245_v6, %v68_v30 }
  0x7f   :  { %v2355_v34 = vadd.f32 1.0, %v109_v32  ;;  %v2357_v37 = vadd.f32 1.0, %v110_v33  ;;  %v2438_v32 = vshrl.u32 %v4992_v27, 7 }
  0x80   :  { %v70_v35 = vpop.permute.xlu0 %69  ;;  %v72_v36 = vpop.permute.xlu1 %71 }
  0x81   :  { %v111_v38 = vsub.f32 %v2262_v9, %v70_v35  ;;  %159 = vrot.lane.b32.xlu1 %v2347_v31, %s2193_s1  ;;  %161 = vrot.lane.b32.xlu0 %v2355_v34, %s2193_s1  ;;  %v112_v39 = vsub.f32 %v2257_v8, %v72_v36  ;;  %5224 = vst [vmem:[#allocation7_spill] sm:$0xff] %v2438_v32  ;;  %v2448_v35 = vsub.s32 1, %v2438_v32  ;;  %v2451_v36 = vsub.s32 2, %v2438_v32 }
  0x83   :  { %v2365_v40 = vadd.f32 1.0, %v111_v38  ;;  %v2367_v43 = vadd.f32 1.0, %v112_v39  ;;  %5225 = vst [vmem:[#allocation8_spill] sm:$0xff] %v2451_v36  ;;  %v2454_v38 = vsub.s32 3, %v2438_v32 }
  0x84   :  { %v74_v41 = vpop.permute.xlu0 %73  ;;  %v76_v42 = vpop.permute.xlu1 %75 }
  0x85   :  { %v113_v44 = vsub.f32 %v2274_v11, %v74_v41  ;;  %163 = vrot.lane.b32.xlu1 %v2357_v37, %s2193_s1  ;;  %165 = vrot.lane.b32.xlu0 %v2365_v40, %s2193_s1  ;;  %v114_v45 = vsub.f32 %v2269_v10, %v76_v42  ;;  %v2462_v41 = vld [vmem:[%s4989_s0 + $0x2] ss:$8 sm:$0xf] }
  0x86   :  { %5226 = vst [vmem:[#allocation9_spill] sm:$0xff] %v2462_v41 }
  0x87   :  { %v2375_v46 = vadd.f32 1.0, %v113_v44  ;;  %v2377_v49 = vadd.f32 1.0, %v114_v45  ;;  %v2471_v44 = vld [vmem:[%s4989_s0] ss:$8 sm:$0xf] }
  0x88   :  { %v78_v47 = vpop.permute.xlu0 %77  ;;  %v80_v48 = vpop.permute.xlu1 %79  ;;  %5227 = vst [vmem:[#allocation10_spill] sm:$0xff] %v2471_v44 }
  0x89   :  { %5219 = vst [vmem:[#allocation2_spill] sm:$0xff] %v2375_v46  ;;  %5220 = vst [vmem:[#allocation3_spill] sm:$0xff] %v2377_v49  ;;  %v115_v50 = vsub.f32 %v2286_v13, %v78_v47  ;;  %167 = vrot.lane.b32.xlu1 %v2367_v43, %s2193_s1  ;;  %169 = vrot.lane.b32.xlu0 %v2375_v46, %s2193_s1  ;;  %v116_v51 = vsub.f32 %v2281_v12, %v80_v48 }
  0x8a   :  { %v2479_v47 = vrot.slane %v2462_v41, %v2448_v35  ;;  %v2483_v48 = vrot.slane %v2462_v41, %v2451_v36 }
  0x8b   :  { %v2385_v52 = vadd.f32 1.0, %v115_v50  ;;  %v2387_v55 = vadd.f32 1.0, %v116_v51  ;;  %v2487_v50 = vrot.slane %v2462_v41, %v2454_v38 }
  0x8c   :  { %v82_v53 = vpop.permute.xlu0 %81  ;;  %v84_v54 = vpop.permute.xlu1 %83 }
  0x8d   :  { %v117_v56 = vsub.f32 %v2298_v15, %v82_v53  ;;  %171 = vrot.lane.b32.xlu1 %v2377_v49, %s2193_s1  ;;  %173 = vrot.lane.b32.xlu0 %v2385_v52, %s2193_s1  ;;  %v118_v57 = vsub.f32 %v2293_v14, %v84_v54  ;;  %v2496_v53 = vrot.slane %v2471_v44, %v2448_v35 }
  0x8e   :  { %v2500_v54 = vrot.slane %v2471_v44, %v2451_v36 }
  0x8f   :  { %v2395_v58 = vadd.f32 1.0, %v117_v56  ;;  %v2397_v61 = vadd.f32 1.0, %v118_v57  ;;  %v2504_v56 = vrot.slane %v2471_v44, %v2454_v38 }
  0x90   :  { %v86_v59 = vpop.permute.xlu0 %85  ;;  %v88_v60 = vpop.permute.xlu1 %87 }
  0x91   :  { %5221 = vst [vmem:[#allocation4_spill] sm:$0xff] %v2395_v58  ;;  %v119_v62 = vsub.f32 %v2310_v17, %v86_v59  ;;  %175 = vrot.lane.b32.xlu1 %v2387_v55, %s2193_s1  ;;  %177 = vrot.lane.b32.xlu0 %v2395_v58, %s2193_s1  ;;  %v120_v63 = vsub.f32 %v2305_v16, %v88_v60 }
  0x93   :  { %v2405_v3 = vadd.f32 1.0, %v119_v62  ;;  %v2407_v18 = vadd.f32 1.0, %v120_v63 }
  0x95   :  { %5222 = vst [vmem:[#allocation5_spill] sm:$0xff] %v2405_v3  ;;  %5223 = vst [vmem:[#allocation6_spill] sm:$0xff] %v2407_v18  ;;  %179 = vrot.lane.b32.xlu1 %v2397_v61, %s2193_s1  ;;  %181 = vrot.lane.b32.xlu0 %v2405_v3, %s2193_s1 }
  0x99   :  { %183 = vrot.lane.b32.xlu1 %v2407_v18, %s2193_s1  ;;  %444 = vperm.xlu0 %2038, %v2310_v17  }
  0x9d   :  { %440 = vperm.xlu1 %2037, %v2293_v14   ;;  %2041 = vset.pattern.permute.xlu0 %v4995_v19 }
  0x9e   :  { %882 = vperm.xlu0 %2041, %v2238_v5  }
  0xa1   :  { %v2419_v20 = vpop.permute.xlu1 %243  ;;  %448 = vperm.xlu1 %2037, %v2305_v16   ;;  %v2422_v21 = vpop.permute.xlu0 %392 }
  0xa2   :  { %894 = vperm.xlu0 %2041, %v2250_v7  }
  0xa5   :  { %v2425_v23 = vpop.permute.xlu1 %247  ;;  %2039 = vset.pattern.permute.xlu1 %v5002_v24  ;;  %v2428_v26 = vpop.permute.xlu0 %404 }
  0xa6   :  { %733 = vperm.xlu1 %2039, %v2238_v5   ;;  %902 = vperm.xlu0 %2041, %v2262_v9   ;;  %v2445_v5 = vsub.s32 0, %v2438_v32 }
  0xa8   :  { %v2475_v45 = vrot.slane %v2462_v41, %v2445_v5  ;;  %v2492_v51 = vrot.slane %v2471_v44, %v2445_v5 }
  0xa9   :  { %v2432_v29 = vpop.permute.xlu1 %255  ;;  %v2434_v30 = vpop.permute.xlu0 %412 }
  0xaa   :  { %2040 = vset.pattern.permute.xlu1 %v4995_v19  ;;  %906 = vperm.xlu0 %2041, %v2257_v8  }
  0xab   :  { %878 = vperm.xlu1 %2040, %v2225_v1  }
  0xad   :  { %v2442_v33 = vpop.permute.xlu1 %263  ;;  %v2457_v39 = vpop.permute.xlu0 %420 }
  0xae   :  { %922 = vperm.xlu0 %2041, %v2281_v12  }
  0xaf   :  { %2042 = vset.pattern.permute.xlu1 %v5002_v24 }
  0xb0   :  { %737 = vperm.xlu1 %2042, %v2220_v0  }
  0xb1   :  { %v2466_v42 = vpop.permute.xlu1 %271  ;;  %v429_v59 = vpop.permute.xlu0 %428 }
  0xb2   :  { %926 = vperm.xlu0 %2041, %v2298_v15   ;;  %v491_v2 = vmax.f32 %v2492_v51, %v429_v59  ;;  %v493_v32 = vmax.f32 %v2500_v54, %v429_v59 }
  0xb4   :  { %2043 = vset.pattern.permute.xlu1 %v4995_v19  ;;  %v492_v19 = vmax.f32 %v2496_v53, %v429_v59 }
  0xb5   :  { %v280_v57 = vpop.permute.xlu1 %279  ;;  %886 = vperm.xlu1 %2043, %v2220_v0   ;;  %v494_v0 = vmax.f32 %v2504_v56, %v429_v59  ;;  %v437_v58 = vpop.permute.xlu0 %436 }
  0xb6   :  { %v342_v60 = vmin.f32 %v2475_v45, %v280_v57  ;;  %v343_v62 = vmin.f32 %v2479_v47, %v280_v57  ;;  %v344_v63 = vmin.f32 %v2483_v48, %v280_v57  ;;  %v345_v27 = vmin.f32 %v2487_v50, %v280_v57  ;;  %2051 = vset.pattern.permute.xlu0 %v5002_v24 }
  0xb7   :  { %729 = vperm.xlu0 %2051, %v2225_v1  }
  0xb8   :  { %v2519_v44 = vsub.f32 %v342_v60, %v491_v2  ;;  %v2521_v3 = vsub.f32 %v343_v62, %v492_v19  ;;  %v2523_v57 = vsub.f32 %v344_v63, %v493_v32  ;;  %v2525_v24 = vsub.f32 %v345_v27, %v494_v0 }
  0xb9   :  { %v288_v41 = vpop.permute.xlu1 %287  ;;  %890 = vperm.xlu1 %2043, %v2233_v4   ;;  %v499_v2 = vmax.f32 %v2492_v51, %v437_v58  ;;  %v500_v19 = vmax.f32 %v2496_v53, %v437_v58  ;;  %v501_v32 = vmax.f32 %v2500_v54, %v437_v58  ;;  %v502_v27 = vmax.f32 %v2504_v56, %v437_v58 }
  0xba   :  { %5228 = vst [vmem:[#allocation11_spill] sm:$0xff] %v2523_v57  ;;  %5229 = vst [vmem:[#allocation12_spill] sm:$0xff] %v2525_v24  ;;  %v350_v49 = vmin.f32 %v2475_v45, %v288_v41  ;;  %v351_v46 = vmin.f32 %v2479_v47, %v288_v41  ;;  %v352_v18 = vmin.f32 %v2483_v48, %v288_v41  ;;  %v5230_v60 = vmov 3  }
  0xbb   :  { %v353_v59 = vmin.f32 %v2487_v50, %v288_v41  ;;  %741 = vperm.xlu0 %2051, %v2233_v4   ;;  %v5231_v57 = vmov 1  }
  0xbc   :  { %v2538_v62 = vsub.f32 %v350_v49, %v499_v2  ;;  %v2540_v63 = vsub.f32 %v351_v46, %v500_v19  ;;  %v2542_v0 = vsub.f32 %v352_v18, %v501_v32  ;;  %v5232_v46 = vmov 2  }
  0xbd   :  { %2044 = vset.pattern.permute.xlu1 %v5230_v60  ;;  %v2544_v41 = vsub.f32 %v353_v59, %v502_v27  ;;  %v2547_v24 = vpop.permute.xlu1 %295 }
  0xbe   :  { %745 = vperm.xlu1 %2044, %v2250_v7  }
  0xbf   :  { %761 = vperm.xlu0 %2051, %v2274_v11  }
  0xc2   :  { %749 = vperm.xlu1 %2044, %v2245_v6   ;;  %v2551_v58 = vpop.permute.xlu1 %388 }
  0xc3   :  { %765 = vperm.xlu0 %2051, %v2269_v10  }
  0xc6   :  { %2045 = vset.pattern.permute.xlu1 %v5231_v57  ;;  %v2557_v7 = vpop.permute.xlu1 %396 }
  0xc7   :  { %898 = vperm.xlu1 %2045, %v2245_v6   ;;  %781 = vperm.xlu0 %2051, %v2293_v14  }
  0xca   :  { %v2564_v49 = vpop.permute.xlu1 %400 }
  0xcb   :  { %2046 = vset.pattern.permute.xlu1 %v5230_v60  ;;  %2052 = vset.pattern.permute.xlu0 %v5232_v46  ;;  %5233 = vst [vmem:[#allocation13_spill] sm:$0xff] %v2564_v49 }
  0xcc   :  { %753 = vperm.xlu1 %2046, %v2262_v9   ;;  %239 = vperm.xlu0 %2052, %v2225_v1  }
  0xce   :  { %v2569_v18 = vpop.permute.xlu1 %408 }
  0xcf   :  { %5234 = vst [vmem:[#allocation14_spill] sm:$0xff] %v2569_v18  ;;  %v478_v18 = vmax.f32 %v2504_v56, %v2434_v30 }
  0xd0   :  { %757 = vperm.xlu1 %2046, %v2257_v8   ;;  %251 = vperm.xlu0 %2052, %v2233_v4  }
  0xd2   :  { %v2575_v1 = vpop.permute.xlu1 %416 }
  0xd3   :  { %5235 = vst [vmem:[#allocation15_spill] sm:$0xff] %v2575_v1  ;;  %v326_v1 = vmin.f32 %v2475_v45, %v2442_v33 }
  0xd4   :  { %2047 = vset.pattern.permute.xlu1 %v5231_v57  ;;  %259 = vperm.xlu0 %2052, %v2245_v6  }
  0xd5   :  { %910 = vperm.xlu1 %2047, %v2274_v11  }
  0xd6   :  { %v2581_v4 = vpop.permute.xlu1 %424 }
  0xd7   :  { %5236 = vst [vmem:[#allocation16_spill] sm:$0xff] %v2581_v4  ;;  %v321_v4 = vmin.f32 %v2487_v50, %v2432_v29 }
  0xd8   :  { %267 = vperm.xlu0 %2052, %v2257_v8  }
  0xd9   :  { %914 = vperm.xlu1 %2047, %v2269_v10  }
  0xda   :  { %v2587_v6 = vpop.permute.xlu1 %432 }
  0xdb   :  { %5237 = vst [vmem:[#allocation17_spill] sm:$0xff] %v2587_v6 }
  0xdc   :  { %275 = vperm.xlu0 %2052, %v2269_v10  }
  0xdd   :  { %2048 = vset.pattern.permute.xlu1 %v5230_v60 }
  0xde   :  { %769 = vperm.xlu1 %2048, %v2286_v13  }
  0xe0   :  { %283 = vperm.xlu0 %2052, %v2281_v12  }
  0xe2   :  { %2049 = vset.pattern.permute.xlu1 %v5231_v57 }
  0xe3   :  { %918 = vperm.xlu1 %2049, %v2286_v13  }
  0xe4   :  { %291 = vperm.xlu0 %2052, %v2293_v14  }
  0xe7   :  { %2050 = vset.pattern.permute.xlu1 %v5230_v60 }
  0xe8   :  { %773 = vperm.xlu1 %2050, %v2281_v12   ;;  %299 = vperm.xlu0 %2052, %v2305_v16  }
  0xeb   :  { %v154_v8 = vpop.permute.xlu0 %153 }
  0xec   :  { %v201_v9 = vmul.f32 %v154_v8, %v2337_v22  ;;  %777 = vperm.xlu1 %2050, %v2298_v15  }
  0xee   :  { %1284 = vperm.xlu0 %2052, %v201_v9   ;;  %v307_v9 = vmin.f32 %v2479_v47, %v2419_v20 }
  0xef   :  { %v156_v10 = vpop.permute.xlu1 %155  ;;  %v158_v11 = vpop.permute.xlu0 %157 }
  0xf0   :  { %2053 = vset.pattern.permute.xlu1 %v5231_v57  ;;  %v202_v12 = vmul.f32 %v156_v10, %v2345_v28  ;;  %v203_v15 = vmul.f32 %v158_v11, %v2339_v25  ;;  %v306_v28 = vmin.f32 %v2475_v45, %v2419_v20  ;;  %v455_v25 = vmax.f32 %v2492_v51, %v2422_v21 }
  0xf1   :  { %930 = vperm.xlu1 %2053, %v2293_v14   ;;  %v309_v11 = vmin.f32 %v2487_v50, %v2419_v20 }
  0xf3   :  { %v160_v13 = vpop.permute.xlu1 %159  ;;  %v162_v59 = vpop.permute.xlu0 %161 }
  0xf4   :  { %v204_v14 = vmul.f32 %v160_v13, %v2347_v31  ;;  %v308_v31 = vmin.f32 %v2483_v48, %v2419_v20  ;;  %v458_v13 = vmax.f32 %v2504_v56, %v2422_v21 }
  0xf5   :  { %2054 = vset.pattern.permute.xlu1 %v5232_v46 }
  0xf6   :  { %1289 = vperm.xlu1 %2054, %v202_v12   ;;  %v205_v12 = vmul.f32 %v162_v59, %v2355_v34 }
  0xf7   :  { %v164_v2 = vpop.permute.xlu1 %163  ;;  %v166_v19 = vpop.permute.xlu0 %165 }
  0xf8   :  { %v206_v22 = vmul.f32 %v164_v2, %v2357_v37  ;;  %v207_v27 = vmul.f32 %v166_v19, %v2365_v40  ;;  %v456_v37 = vmax.f32 %v2496_v53, %v2422_v21  ;;  %v457_v40 = vmax.f32 %v2500_v54, %v2422_v21 }
  0xf9   :  { %v519_v2 = vsub.f32 %v306_v28, %v455_v25 }
  0xfa   :  { %1309 = vperm.xlu0 %2052, %v206_v22   ;;  %1294 = vperm.xlu1 %2054, %v203_v15   ;;  %v520_v19 = vsub.f32 %v307_v9, %v456_v37  ;;  %v521_v20 = vsub.f32 %v308_v31, %v457_v40  ;;  %v318_v40 = vmin.f32 %v2475_v45, %v2432_v29 }
  0xfb   :  { %v2597_v32 = vpop.permute.xlu1 %167  ;;  %v2601_v8 = vpop.permute.xlu0 %169  ;;  %v2638_v28 = vadd.f32 1.0, %v519_v2  ;;  %v467_v2 = vmax.f32 %v2492_v51, %v2428_v26  ;;  %v320_v31 = vmin.f32 %v2483_v48, %v2432_v29  ;;  %v470_v37 = vmax.f32 %v2504_v56, %v2428_v26 }
  0xfc   :  { %v2640_v9 = vadd.f32 1.0, %v520_v19  ;;  %v468_v19 = vmax.f32 %v2496_v53, %v2428_v26 }
  0xfd   :  { %5239 = vst [vmem:[#allocation19_spill] sm:$0xff] %v2638_v28  ;;  %v531_v6 = vsub.f32 %v318_v40, %v467_v2  ;;  %v483_v40 = vmax.f32 %v2492_v51, %v2457_v39  ;;  %v336_v28 = vmin.f32 %v2483_v48, %v2466_v42 }
  0xfe   :  { %1314 = vperm.xlu0 %2052, %v207_v27   ;;  %1299 = vperm.xlu1 %2054, %v204_v14   ;;  %v2627_v27 = vld [vmem:[%s4989_s0 + $0x1] ss:$8 sm:$0xf]  ;;  %v522_v14 = vsub.f32 %v309_v11, %v458_v13  ;;  %5240 = vst [vmem:[#allocation20_spill] sm:$0xff] %v2640_v9  ;;  %v2658_v11 = vadd.f32 1.0, %v521_v20  ;;  %v319_v20 = vmin.f32 %v2479_v47, %v2432_v29 }
  0xff   :  { %v2611_v10 = vpop.permute.xlu1 %171  ;;  %v174_v22 = vpop.permute.xlu0 %173  ;;  %5238 = vst [vmem:[#allocation18_spill] sm:$0xff] %v2627_v27  ;;  %v2632_v34 = vrot.slane %v2627_v27, %v2445_v5  ;;  %v2636_v59 = vrot.slane %v2627_v27, %v2448_v35  ;;  %v2646_v25 = vrot.slane %v2627_v27, %v2451_v36  ;;  %v327_v13 = vmin.f32 %v2479_v47, %v2442_v33 }
 0x100   :  { %v211_v21 = vmul.f32 %v174_v22, %v2385_v52  ;;  %v2650_v52 = vrot.slane %v2627_v27, %v2454_v38  ;;  %5241 = vst [vmem:[#allocation21_spill] sm:$0xff] %v2658_v11  ;;  %v477_v29 = vmax.f32 %v2500_v54, %v2434_v30  ;;  %v334_v11 = vmin.f32 %v2475_v45, %v2466_v42 }
 0x101   :  { %v208_v9 = vmul.f32 %v2597_v32, %v2367_v43  ;;  %v484_v43 = vmax.f32 %v2496_v53, %v2457_v39  ;;  %v486_v32 = vmax.f32 %v2504_v56, %v2457_v39 }
 0x102   :  { %2055 = vset.pattern.permute.xlu0 %v5230_v60  ;;  %1304 = vperm.xlu1 %2054, %v205_v12   ;;  %v2663_v12 = vadd.f32 1.0, %v522_v14  ;;  %v532_v14 = vsub.f32 %v319_v20, %v468_v19  ;;  %v534_v20 = vsub.f32 %v321_v4, %v470_v37  ;;  %v337_v4 = vmin.f32 %v2487_v50, %v2466_v42  ;;  %v5243_v37 = vld [vmem:[#allocation6_spill] sm:$0xff] }
 0x103   :  { %v176_v15 = vpop.permute.xlu1 %175  ;;  %785 = vperm.xlu0 %2055, %v2310_v17  }
 0x104   :  { %5242 = vst [vmem:[#allocation22_spill] sm:$0xff] %v2663_v12  ;;  %v329_v12 = vmin.f32 %v2487_v50, %v2442_v33 }
 0x106   :  { %2056 = vset.pattern.permute.xlu1 %v5231_v57 }
 0x107   :  { %2060 = vset.pattern.permute.xlu0 %v5232_v46  ;;  %934 = vperm.xlu1 %2056, %v2310_v17   ;;  %v180_v22 = vpop.permute.xlu1 %179  ;;  %v469_v17 = vmax.f32 %v2500_v54, %v2428_v26  ;;  %v476_v26 = vmax.f32 %v2496_v53, %v2434_v30 }
 0x108   :  { %1334 = vperm.xlu0 %2060, %v211_v21   ;;  %v212_v21 = vmul.f32 %v176_v15, %v2387_v55  ;;  %v475_v55 = vmax.f32 %v2492_v51, %v2434_v30  ;;  %v328_v15 = vmin.f32 %v2483_v48, %v2442_v33 }
 0x109   :  { %v533_v19 = vsub.f32 %v320_v31, %v469_v17  ;;  %v540_v33 = vsub.f32 %v327_v13, %v476_v26  ;;  %v542_v17 = vsub.f32 %v329_v12, %v478_v18  ;;  %v2736_v26 = vadd.f32 1.0, %v531_v6 }
 0x10a   :  { %v539_v30 = vsub.f32 %v326_v1, %v475_v55  ;;  %v485_v1 = vmax.f32 %v2500_v54, %v2457_v39  ;;  %v541_v13 = vsub.f32 %v328_v15, %v477_v29  ;;  %v547_v55 = vsub.f32 %v334_v11, %v483_v40 }
 0x10b   :  { %2057 = vset.pattern.permute.xlu1 %v5230_v60  ;;  %v2700_v60 = vpop.permute.xlu0 %177  ;;  %v184_v2 = vpop.permute.xlu1 %183  ;;  %5244 = vst [vmem:[#allocation6_spill] sm:$0xff] %v2736_v26  ;;  %v2752_v11 = vadd.f32 1.0, %v533_v19  ;;  %v2754_v6 = vadd.f32 1.0, %v534_v20  ;;  %v550_v40 = vsub.f32 %v337_v4, %v486_v32  ;;  %v359_v19 = vmin.f32 %v2479_v47, %v2547_v24 }
 0x10c   :  { %1339 = vperm.xlu0 %2060, %v212_v21   ;;  %789 = vperm.xlu1 %2057, %v2305_v16   ;;  %v214_v21 = vmul.f32 %v180_v22, %v2397_v61  ;;  %v2716_v61 = vld [vmem:[%s4989_s0 + $0x3] ss:$8 sm:$0xf]  ;;  %v335_v22 = vmin.f32 %v2479_v47, %v2466_v42  ;;  %v216_v31 = vmul.f32 %v184_v2, %v5243_v37  ;;  %v2756_v12 = vadd.f32 1.0, %v539_v30 }
 0x10d   :  { %v2734_v42 = vrot.slane %v2716_v61, %v2445_v5  ;;  %v2744_v39 = vrot.slane %v2716_v61, %v2448_v35  ;;  %v2748_v18 = vrot.slane %v2716_v61, %v2451_v36  ;;  %5247 = vst [vmem:[#allocation23_spill] sm:$0xff] %v2752_v11  ;;  %5248 = vst [vmem:[#allocation24_spill] sm:$0xff] %v2754_v6  ;;  %v2760_v2 = vadd.f32 1.0, %v541_v13  ;;  %v5254_v30 = vld [vmem:[#allocation3_spill] sm:$0xff]  ;;  %v5264_v36 = vld [vmem:[#allocation12_spill] sm:$0xff] }
 0x10e   :  { %5249 = vst [vmem:[#allocation25_spill] sm:$0xff] %v2756_v12  ;;  %v548_v15 = vsub.f32 %v335_v22, %v484_v43  ;;  %v549_v29 = vsub.f32 %v336_v28, %v485_v1  ;;  %v2762_v37 = vadd.f32 1.0, %v542_v17  ;;  %v360_v20 = vmin.f32 %v2483_v48, %v2547_v24 }
 0x10f   :  { %v2740_v27 = vpop.permute.xlu0 %181  ;;  %5251 = vst [vmem:[#allocation27_spill] sm:$0xff] %v2760_v2  ;;  %v361_v28 = vmin.f32 %v2487_v50, %v2547_v24  ;;  %v2784_v17 = vadd.f32 1.0, %v550_v40 }
 0x110   :  { %1349 = vperm.xlu0 %2060, %v214_v21   ;;  %2058 = vset.pattern.permute.xlu1 %v5232_v46  ;;  %v5245_v21 = vld [vmem:[#allocation2_spill] sm:$0xff]  ;;  %5252 = vst [vmem:[#allocation28_spill] sm:$0xff] %v2762_v37  ;;  %v2780_v32 = vadd.f32 1.0, %v548_v15  ;;  %v2782_v13 = vadd.f32 1.0, %v549_v29  ;;  %v2799_v15 = vadd.f32 1.0, %v2521_v3  ;;  %v5262_v29 = vld [vmem:[#allocation11_spill] sm:$0xff]  ;;  %v462_v3 = vmax.f32 %v2504_v56, %v2557_v7 }
 0x111   :  { %1319 = vperm.xlu1 %2058, %v208_v9   ;;  %v209_v49 = vmul.f32 %v2601_v8, %v5245_v21  ;;  %v2750_v9 = vadd.f32 1.0, %v532_v14  ;;  %v2758_v8 = vadd.f32 1.0, %v540_v33  ;;  %v358_v14 = vmin.f32 %v2475_v45, %v2547_v24  ;;  %5257 = vst [vmem:[#allocation31_spill] sm:$0xff] %v2784_v17 }
 0x112   :  { %5255 = vst [vmem:[#allocation3_spill] sm:$0xff] %v2780_v32  ;;  %5256 = vst [vmem:[#allocation30_spill] sm:$0xff] %v2782_v13  ;;  %v2787_v24 = vadd.f32 1.0, %v2519_v44  ;;  %v2802_v40 = vadd.f32 1.0, %v5262_v29  ;;  %v2805_v44 = vadd.f32 1.0, %v5264_v36  ;;  %v2827_v36 = vadd.f32 1.0, %v2538_v62 }
 0x113   :  { %5246 = vst [vmem:[#allocation2_spill] sm:$0xff] %v2750_v9  ;;  %5250 = vst [vmem:[#allocation26_spill] sm:$0xff] %v2758_v8  ;;  %v460_v29 = vmax.f32 %v2496_v53, %v2557_v7 }
 0x114   :  { %1359 = vperm.xlu0 %2060, %v216_v31   ;;  %v2764_v31 = vadd.f32 1.0, %v547_v55  ;;  %5258 = vst [vmem:[#allocation32_spill] sm:$0xff] %v2787_v24  ;;  %5261 = vst [vmem:[#allocation35_spill] sm:$0xff] %v2799_v15 }
 0x115   :  { %1324 = vperm.xlu1 %2058, %v209_v49   ;;  %v210_v49 = vmul.f32 %v2611_v10, %v5254_v30  ;;  %5263 = vst [vmem:[#allocation11_spill] sm:$0xff] %v2802_v40  ;;  %5265 = vst [vmem:[#allocation12_spill] sm:$0xff] %v2805_v44  ;;  %v5281_v40 = vld [vmem:[#allocation18_spill] sm:$0xff] }
 0x116   :  { %5253 = vst [vmem:[#allocation29_spill] sm:$0xff] %v2764_v31  ;;  %5267 = vst [vmem:[#allocation37_spill] sm:$0xff] %v2827_v36  ;;  %v38_v15 = vsub.f32 %v2716_v61, %v5281_v40 }
 0x118   :  { %v445_v33 = vpop.permute.xlu0 %444 }
 0x119   :  { %v507_v22 = vmax.f32 %v2492_v51, %v445_v33  ;;  %v508_v4 = vmax.f32 %v2496_v53, %v445_v33  ;;  %v509_v43 = vmax.f32 %v2500_v54, %v445_v33  ;;  %v510_v1 = vmax.f32 %v2504_v56, %v445_v33  ;;  %1329 = vperm.xlu1 %2058, %v210_v49  }
 0x11b   :  { %v2789_v10 = vsub.f32 %v358_v14, %v507_v22  ;;  %v2791_v55 = vsub.f32 %v359_v19, %v508_v4  ;;  %v2793_v21 = vsub.f32 %v360_v20, %v509_v43  ;;  %v2795_v30 = vsub.f32 %v361_v28, %v510_v1  ;;  %v5272_v14 = vld [vmem:[#allocation4_spill] sm:$0xff] }
 0x11c   :  { %v2807_v49 = vpop.permute.xlu1 %440  ;;  %v2832_v1 = vadd.f32 1.0, %v2540_v63  ;;  %v2835_v19 = vadd.f32 1.0, %v2542_v0  ;;  %v2844_v43 = vadd.f32 1.0, %v2544_v41  ;;  %v213_v63 = vmul.f32 %v2700_v60, %v5272_v14 }
 0x11d   :  { %5259 = vst [vmem:[#allocation33_spill] sm:$0xff] %v2793_v21  ;;  %5260 = vst [vmem:[#allocation34_spill] sm:$0xff] %v2795_v30  ;;  %v883_v22 = vpop.permute.xlu0 %882  ;;  %2059 = vset.pattern.permute.xlu1 %v5231_v57  ;;  %v2852_v0 = vrot.slane %v2716_v61, %v2454_v38  ;;  %v461_v41 = vmax.f32 %v2500_v54, %v2557_v7  ;;  %v5274_v20 = vmin.f32 %v2475_v45, %v2425_v23  ;;  %v5276_v21 = vld [vmem:[#allocation5_spill] sm:$0xff] }
 0x11e   :  { %5266 = vst [vmem:[#allocation36_spill] sm:$0xff] %v2807_v49  ;;  %938 = vperm.xlu1 %2059, %v2305_v16   ;;  %5269 = vst [vmem:[#allocation39_spill] sm:$0xff] %v2832_v1  ;;  %v459_v16 = vmax.f32 %v2492_v51, %v2557_v7  ;;  %v945_v60 = vmax.f32 %v2632_v34, %v883_v22  ;;  %v946_v14 = vmax.f32 %v2636_v59, %v883_v22 }
 0x11f   :  { %5270 = vst [vmem:[#allocation40_spill] sm:$0xff] %v2835_v19  ;;  %5271 = vst [vmem:[#allocation41_spill] sm:$0xff] %v2844_v43  ;;  %v947_v28 = vmax.f32 %v2646_v25, %v883_v22  ;;  %v948_v62 = vmax.f32 %v2650_v52, %v883_v22  ;;  %v5275_v7 = vmin.f32 %v2479_v47, %v2425_v23  ;;  %v5306_v19 = vld [vmem:[#allocation8_spill] sm:$0xff]  ;;  %v2997_v12 = vadd.f32 1.0, %v2791_v55 }
 0x120   :  { %v2829_v57 = vpop.permute.xlu1 %448  ;;  %5273 = vst [vmem:[#allocation4_spill] sm:$0xff] %v2852_v0  ;;  %v523_v30 = vsub.f32 %v5274_v20, %v459_v16  ;;  %v215_v17 = vmul.f32 %v2740_v27, %v5276_v21  ;;  %v5277_v20 = vmin.f32 %v2483_v48, %v2425_v23  ;;  %v5279_v27 = vld [vmem:[#allocation10_spill] sm:$0xff]  ;;  %v5280_v21 = vld [vmem:[#allocation9_spill] sm:$0xff] }
 0x121   :  { %5268 = vst [vmem:[#allocation38_spill] sm:$0xff] %v2829_v57  ;;  %v2841_v33 = vpop.permute.xlu0 %894  ;;  %v36_v44 = vsub.f32 %v5280_v21, %v5279_v27  ;;  %5309 = vst [vmem:[#allocation8_spill] sm:$0xff] %v2997_v12 }
 0x122   :  { %2061 = vset.pattern.permute.xlu1 %v5232_v46  ;;  %v524_v46 = vsub.f32 %v5275_v7, %v460_v29  ;;  %v525_v16 = vsub.f32 %v5277_v20, %v461_v41  ;;  %v5278_v29 = vmin.f32 %v2487_v50, %v2425_v23  ;;  %v2895_v41 = vadd.f32 1.0, %v523_v30 }
 0x123   :  { %1344 = vperm.xlu1 %2061, %v213_v63  }
 0x124   :  { %v526_v7 = vsub.f32 %v5278_v29, %v462_v3  ;;  %5282 = vst [vmem:[#allocation5_spill] sm:$0xff] %v2895_v41  ;;  %v2897_v20 = vadd.f32 1.0, %v524_v46 }
 0x125   :  { %v734_v13 = vpop.permute.xlu1 %733  ;;  %v2881_v31 = vpop.permute.xlu0 %902 }
 0x126   :  { %v796_v32 = vmin.f32 %v2734_v42, %v734_v13  ;;  %v797_v22 = vmin.f32 %v2744_v39, %v734_v13  ;;  %v798_v63 = vmin.f32 %v2748_v18, %v734_v13  ;;  %v799_v4 = vmin.f32 %v2852_v0, %v734_v13  ;;  %5283 = vst [vmem:[#allocation10_spill] sm:$0xff] %v2897_v20 }
 0x127   :  { %1354 = vperm.xlu1 %2061, %v215_v17   ;;  %v2905_v40 = vadd.f32 1.0, %v526_v7  ;;  %v37_v17 = vadd.f32 1.0, %v36_v44 }
 0x128   :  { %v1009_v24 = vsub.f32 %v796_v32, %v945_v60  ;;  %v1010_v6 = vsub.f32 %v797_v22, %v946_v14  ;;  %v1011_v11 = vsub.f32 %v798_v63, %v947_v28  ;;  %v1012_v13 = vsub.f32 %v799_v4, %v948_v62  ;;  %v5287_v63 = vld [vmem:[#allocation19_spill] sm:$0xff] }
 0x129   :  { %v2901_v61 = vpop.permute.xlu0 %906  ;;  %v2903_v32 = vadd.f32 1.0, %v525_v16  ;;  %5285 = vst [vmem:[#allocation18_spill] sm:$0xff] %v2905_v40  ;;  %v39_v28 = vadd.f32 1.0, %v38_v15  ;;  %v5288_v16 = vmax.f32 %v5287_v63, 0.0  ;;  %v5290_v15 = vld [vmem:[#allocation20_spill] sm:$0xff] }
 0x12a   :  { %v1073_v23 = vadd.f32 1.0, %v1009_v24  ;;  %v1074_v3 = vadd.f32 1.0, %v1010_v6  ;;  %v1075_v29 = vadd.f32 1.0, %v1011_v11  ;;  %v1076_v27 = vadd.f32 1.0, %v1012_v13  ;;  %v2899_v21 = vpop.permute.xlu1 %878  ;;  %v5286_v11 = vld [vmem:[#allocation13_spill] sm:$0xff] }
 0x12b   :  { %5284 = vst [vmem:[#allocation9_spill] sm:$0xff] %v2903_v32  ;;  %v5291_v7 = vmax.f32 %v5290_v15, 0.0 }
 0x12c   :  { %v1137_v4 = vmax.f32 %v1073_v23, 0.0  ;;  %v1138_v62 = vmax.f32 %v1074_v3, 0.0  ;;  %v1139_v30 = vmax.f32 %v1075_v29, 0.0  ;;  %v1140_v60 = vmax.f32 %v1076_v27, 0.0  ;;  %v5293_v23 = vld [vmem:[#allocation21_spill] sm:$0xff]  ;;  %v5296_v27 = vld [vmem:[#allocation22_spill] sm:$0xff] }
 0x12d   :  { %v2913_v22 = vpop.permute.xlu0 %922  ;;  %v5294_v3 = vmax.f32 %v5293_v23, 0.0  ;;  %v5297_v6 = vmax.f32 %v5296_v27, 0.0  ;;  %v5300_v27 = vld [vmem:[#allocation15_spill] sm:$0xff]  ;;  %v5302_v23 = vld [vmem:[#allocation17_spill] sm:$0xff] }
 0x12e   :  { %v2917_v44 = vmul.f32 %v1137_v4, %v5288_v16  ;;  %v2921_v13 = vmul.f32 %v1138_v62, %v5291_v7 }
 0x12f   :  { %v2925_v29 = vmul.f32 %v1139_v30, %v5294_v3  ;;  %v2929_v14 = vmul.f32 %v1140_v60, %v5297_v6  ;;  %v5299_v30 = vld [vmem:[#allocation14_spill] sm:$0xff]  ;;  %v738_v7 = vpop.permute.xlu1 %737  ;;  %v40_v60 = vmul.f32 %v39_v28, %v37_v17  ;;  %v5301_v28 = vld [vmem:[#allocation16_spill] sm:$0xff] }
 0x130   :  { %5289 = vst [vmem:[#allocation13_spill] sm:$0xff] %v2917_v44  ;;  %5292 = vst [vmem:[#allocation19_spill] sm:$0xff] %v2921_v13  ;;  %v800_v9 = vmin.f32 %v2734_v42, %v738_v7  ;;  %v801_v63 = vmin.f32 %v2744_v39, %v738_v7  ;;  %v802_v16 = vmin.f32 %v2748_v18, %v738_v7 }
 0x131   :  { %5295 = vst [vmem:[#allocation20_spill] sm:$0xff] %v2925_v29  ;;  %5298 = vst [vmem:[#allocation21_spill] sm:$0xff] %v2929_v14  ;;  %v2957_v6 = vpop.permute.xlu0 %926  ;;  %v2974_v3 = vrot.slane %v40_v60, %v2445_v5  ;;  %v803_v62 = vmin.f32 %v2852_v0, %v738_v7  ;;  %v2985_v5 = vadd.f32 1.0, %v2789_v10  ;;  %v2988_v43 = vrot.slane %v40_v60, %v2448_v35 }
 0x132   :  { %v2991_v1 = vrot.slane %v40_v60, %v5306_v19  ;;  %v2994_v7 = vrot.slane %v40_v60, %v2454_v38  ;;  %v960_v60 = vmax.f32 %v2650_v52, %v2841_v33  ;;  %v942_v38 = vmax.f32 %v2636_v59, %v2899_v21 }
 0x133   :  { %5303 = vst [vmem:[#allocation22_spill] sm:$0xff] %v2974_v3  ;;  %5304 = vst [vmem:[#allocation14_spill] sm:$0xff] %v2985_v5  ;;  %v944_v19 = vmax.f32 %v2650_v52, %v2899_v21 }
 0x134   :  { %v887_v4 = vpop.permute.xlu1 %886  ;;  %5305 = vst [vmem:[#allocation15_spill] sm:$0xff] %v2988_v43  ;;  %5307 = vst [vmem:[#allocation16_spill] sm:$0xff] %v2991_v1 }
 0x135   :  { %v949_v17 = vmax.f32 %v2632_v34, %v887_v4  ;;  %v950_v46 = vmax.f32 %v2636_v59, %v887_v4  ;;  %v951_v26 = vmax.f32 %v2646_v25, %v887_v4  ;;  %v952_v15 = vmax.f32 %v2650_v52, %v887_v4  ;;  %5308 = vst [vmem:[#allocation17_spill] sm:$0xff] %v2994_v7 }
 0x136   :  { %v730_v24 = vpop.permute.xlu0 %729 }
 0x137   :  { %v1013_v36 = vsub.f32 %v800_v9, %v949_v17  ;;  %v1014_v37 = vsub.f32 %v801_v63, %v950_v46  ;;  %v1015_v2 = vsub.f32 %v802_v16, %v951_v26  ;;  %v1016_v8 = vsub.f32 %v803_v62, %v952_v15 }
 0x138   :  { %v3005_v4 = vpop.permute.xlu1 %890  ;;  %v957_v63 = vmax.f32 %v2632_v34, %v2841_v33  ;;  %v958_v62 = vmax.f32 %v2636_v59, %v2841_v33  ;;  %v959_v16 = vmax.f32 %v2646_v25, %v2841_v33  ;;  %v941_v26 = vmax.f32 %v2632_v34, %v2899_v21 }
 0x139   :  { %v943_v33 = vmax.f32 %v2646_v25, %v2899_v21  ;;  %v792_v10 = vmin.f32 %v2734_v42, %v730_v24  ;;  %v793_v46 = vmin.f32 %v2744_v39, %v730_v24  ;;  %v794_v32 = vmin.f32 %v2748_v18, %v730_v24 }
 0x13a   :  { %v742_v15 = vpop.permute.xlu0 %741  ;;  %v795_v55 = vmin.f32 %v2852_v0, %v730_v24  ;;  %v3074_v49 = vadd.f32 1.0, %v1014_v37 }
 0x13b   :  { %v1005_v14 = vsub.f32 %v792_v10, %v941_v26  ;;  %v1006_v35 = vsub.f32 %v793_v46, %v942_v38  ;;  %v804_v29 = vmin.f32 %v2734_v42, %v742_v15  ;;  %v1007_v1 = vsub.f32 %v794_v32, %v943_v33 }
 0x13c   :  { %v1008_v57 = vsub.f32 %v795_v55, %v944_v19  ;;  %v805_v43 = vmin.f32 %v2744_v39, %v742_v15  ;;  %v806_v3 = vmin.f32 %v2748_v18, %v742_v15  ;;  %v953_v10 = vmax.f32 %v2632_v34, %v3005_v4 }
 0x13d   :  { %v746_v9 = vpop.permute.xlu1 %745  ;;  %v807_v38 = vmin.f32 %v2852_v0, %v742_v15  ;;  %v954_v32 = vmax.f32 %v2636_v59, %v3005_v4  ;;  %v3089_v19 = vadd.f32 1.0, %v1005_v14  ;;  %v3091_v37 = vadd.f32 1.0, %v1006_v35 }
 0x13e   :  { %v3053_v5 = vpop.permute.xlu0 %761  ;;  %v808_v17 = vmin.f32 %v2734_v42, %v746_v9  ;;  %v809_v20 = vmin.f32 %v2744_v39, %v746_v9  ;;  %v810_v12 = vmin.f32 %v2748_v18, %v746_v9  ;;  %v811_v21 = vmin.f32 %v2852_v0, %v746_v9 }
 0x13f   :  { %v3072_v9 = vadd.f32 1.0, %v1013_v36  ;;  %v955_v36 = vmax.f32 %v2646_v25, %v3005_v4  ;;  %v956_v55 = vmax.f32 %v2650_v52, %v3005_v4  ;;  %v1017_v46 = vsub.f32 %v804_v29, %v953_v10 }
 0x140   :  { %v1021_v13 = vsub.f32 %v808_v17, %v957_v63  ;;  %v1022_v44 = vsub.f32 %v809_v20, %v958_v62  ;;  %v1023_v24 = vsub.f32 %v810_v12, %v959_v16  ;;  %v1024_v7 = vsub.f32 %v811_v21, %v960_v60 }
 0x141   :  { %v3068_v40 = vpop.permute.xlu1 %749  ;;  %v3081_v20 = vadd.f32 1.0, %v1015_v2  ;;  %v3083_v12 = vadd.f32 1.0, %v1016_v8  ;;  %v3095_v62 = vadd.f32 1.0, %v1007_v1  ;;  %v3097_v2 = vadd.f32 1.0, %v1008_v57 }
 0x142   :  { %v3079_v26 = vpop.permute.xlu0 %765  ;;  %v1018_v8 = vsub.f32 %v805_v43, %v954_v32  ;;  %v1019_v16 = vsub.f32 %v806_v3, %v955_v36  ;;  %v1020_v60 = vsub.f32 %v807_v38, %v956_v55  ;;  %v3113_v33 = vadd.f32 1.0, %v1017_v46 }
 0x143   :  { %5310 = vst [vmem:[#allocation42_spill] sm:$0xff] %v3081_v20  ;;  %5311 = vst [vmem:[#allocation43_spill] sm:$0xff] %v3083_v12  ;;  %v3125_v43 = vadd.f32 1.0, %v1021_v13  ;;  %v3129_v1 = vadd.f32 1.0, %v1022_v44  ;;  %v3131_v29 = vadd.f32 1.0, %v1023_v24  ;;  %v3136_v14 = vadd.f32 1.0, %v1024_v7 }
 0x144   :  { %5312 = vst [vmem:[#allocation44_spill] sm:$0xff] %v3113_v33  ;;  %v3119_v32 = vadd.f32 1.0, %v1018_v8  ;;  %v3121_v36 = vadd.f32 1.0, %v1019_v16  ;;  %v3123_v55 = vadd.f32 1.0, %v1020_v60  ;;  %v812_v13 = vmin.f32 %v2734_v42, %v3068_v40 }
 0x145   :  { %5317 = vst [vmem:[#allocation49_spill] sm:$0xff] %v3125_v43  ;;  %5318 = vst [vmem:[#allocation50_spill] sm:$0xff] %v3129_v1  ;;  %v813_v60 = vmin.f32 %v2744_v39, %v3068_v40  ;;  %v814_v44 = vmin.f32 %v2748_v18, %v3068_v40  ;;  %v815_v24 = vmin.f32 %v2852_v0, %v3068_v40 }
 0x146   :  { %v899_v63 = vpop.permute.xlu1 %898  ;;  %v3115_v21 = vpop.permute.xlu0 %781  ;;  %5314 = vst [vmem:[#allocation46_spill] sm:$0xff] %v3119_v32  ;;  %5315 = vst [vmem:[#allocation47_spill] sm:$0xff] %v3121_v36  ;;  %v5325_v40 = vmax.f32 %v2636_v59, %v2881_v31  ;;  %v5332_v1 = vmax.f32 %v2492_v51, %v2551_v58 }
 0x147   :  { %5313 = vst [vmem:[#allocation45_spill] sm:$0xff] %v3115_v21  ;;  %5316 = vst [vmem:[#allocation48_spill] sm:$0xff] %v3123_v55  ;;  %v961_v3 = vmax.f32 %v2632_v34, %v899_v63  ;;  %v962_v57 = vmax.f32 %v2636_v59, %v899_v63  ;;  %v963_v35 = vmax.f32 %v2646_v25, %v899_v63 }
 0x148   :  { %5319 = vst [vmem:[#allocation51_spill] sm:$0xff] %v3131_v29  ;;  %v964_v8 = vmax.f32 %v2650_v52, %v899_v63  ;;  %5320 = vst [vmem:[#allocation52_spill] sm:$0xff] %v3136_v14  ;;  %v5335_v14 = vmax.f32 %v2504_v56, %v2551_v58 }
 0x149   :  { %v1025_v38 = vsub.f32 %v812_v13, %v961_v3  ;;  %v1026_v10 = vsub.f32 %v813_v60, %v962_v57  ;;  %v1027_v4 = vsub.f32 %v814_v44, %v963_v35  ;;  %v5321_v3 = vmax.f32 %v2632_v34, %v2881_v31 }
 0x14a   :  { %v1028_v41 = vsub.f32 %v815_v24, %v964_v8 }
 0x14b   :  { %v754_v46 = vpop.permute.xlu1 %753  ;;  %v240_v17 = vpop.permute.xlu0 %239  ;;  %v3168_v44 = vadd.f32 1.0, %v1025_v38  ;;  %v3172_v24 = vadd.f32 1.0, %v1027_v4 }
 0x14c   :  { %v816_v63 = vmin.f32 %v2734_v42, %v754_v46  ;;  %v817_v33 = vmin.f32 %v2744_v39, %v754_v46  ;;  %v818_v15 = vmin.f32 %v2748_v18, %v754_v46  ;;  %v819_v20 = vmin.f32 %v2852_v0, %v754_v46 }
 0x14d   :  { %5322 = vst [vmem:[#allocation53_spill] sm:$0xff] %v3168_v44  ;;  %v3170_v46 = vadd.f32 1.0, %v1026_v10  ;;  %v3174_v16 = vadd.f32 1.0, %v1028_v41  ;;  %v5327_v41 = vmax.f32 %v2650_v52, %v2881_v31  ;;  %v302_v38 = vmin.f32 %v2475_v45, %v240_v17 }
 0x14e   :  { %v1029_v8 = vsub.f32 %v816_v63, %v5321_v3  ;;  %v1030_v12 = vsub.f32 %v817_v33, %v5325_v40  ;;  %v5326_v63 = vmax.f32 %v2646_v25, %v2881_v31  ;;  %v303_v4 = vmin.f32 %v2479_v47, %v240_v17 }
 0x14f   :  { %5323 = vst [vmem:[#allocation54_spill] sm:$0xff] %v3170_v46  ;;  %5324 = vst [vmem:[#allocation55_spill] sm:$0xff] %v3174_v16  ;;  %v1032_v10 = vsub.f32 %v819_v20, %v5327_v41  ;;  %v252_v7 = vpop.permute.xlu0 %251  ;;  %v758_v41 = vpop.permute.xlu1 %757  ;;  %v304_v31 = vmin.f32 %v2483_v48, %v240_v17  ;;  %v305_v20 = vmin.f32 %v2487_v50, %v240_v17 }
 0x150   :  { %v1031_v3 = vsub.f32 %v818_v15, %v5326_v63  ;;  %v3197_v63 = vadd.f32 1.0, %v1029_v8  ;;  %v3207_v32 = vadd.f32 1.0, %v1030_v12  ;;  %v820_v33 = vmin.f32 %v2734_v42, %v758_v41 }
 0x151   :  { %v3211_v8 = vadd.f32 1.0, %v1032_v10  ;;  %v821_v15 = vmin.f32 %v2744_v39, %v758_v41  ;;  %v822_v12 = vmin.f32 %v2748_v18, %v758_v41  ;;  %v314_v10 = vmin.f32 %v2475_v45, %v252_v7 }
 0x152   :  { %5328 = vst [vmem:[#allocation56_spill] sm:$0xff] %v3197_v63  ;;  %5329 = vst [vmem:[#allocation57_spill] sm:$0xff] %v3207_v32  ;;  %v3209_v40 = vadd.f32 1.0, %v1031_v3  ;;  %v823_v3 = vmin.f32 %v2852_v0, %v758_v41  ;;  %v315_v13 = vmin.f32 %v2479_v47, %v252_v7  ;;  %v316_v60 = vmin.f32 %v2483_v48, %v252_v7 }
 0x153   :  { %5331 = vst [vmem:[#allocation59_spill] sm:$0xff] %v3211_v8  ;;  %v260_v35 = vpop.permute.xlu0 %259  ;;  %v317_v17 = vmin.f32 %v2487_v50, %v252_v7  ;;  %v515_v43 = vsub.f32 %v302_v38, %v5332_v1  ;;  %v5333_v41 = vmax.f32 %v2496_v53, %v2551_v58  ;;  %v5334_v63 = vmax.f32 %v2500_v54, %v2551_v58 }
 0x154   :  { %5330 = vst [vmem:[#allocation58_spill] sm:$0xff] %v3209_v40  ;;  %v518_v40 = vsub.f32 %v305_v20, %v5335_v14  ;;  %v5336_v7 = vmax.f32 %v2632_v34, %v2901_v61  ;;  %v5337_v8 = vmax.f32 %v2636_v59, %v2901_v61  ;;  %v322_v38 = vmin.f32 %v2475_v45, %v260_v35 }
 0x155   :  { %v516_v21 = vsub.f32 %v303_v4, %v5333_v41  ;;  %v517_v57 = vsub.f32 %v304_v31, %v5334_v63  ;;  %v5338_v4 = vmax.f32 %v2646_v25, %v2901_v61  ;;  %v5339_v63 = vmax.f32 %v2650_v52, %v2901_v61 }
 0x156   :  { %v1033_v29 = vsub.f32 %v820_v33, %v5336_v7  ;;  %v1034_v1 = vsub.f32 %v821_v15, %v5337_v8  ;;  %v5340_v58 = vmax.f32 %v2492_v51, %v5286_v11  ;;  %v5341_v33 = vmax.f32 %v2496_v53, %v5286_v11 }
 0x157   :  { %v1035_v41 = vsub.f32 %v822_v12, %v5338_v4  ;;  %v1036_v31 = vsub.f32 %v823_v3, %v5339_v63  ;;  %v5342_v15 = vmax.f32 %v2500_v54, %v5286_v11  ;;  %v5343_v7 = vmax.f32 %v2504_v56, %v5286_v11 }
 0x158   :  { %v527_v14 = vsub.f32 %v314_v10, %v5340_v58  ;;  %v528_v20 = vsub.f32 %v315_v13, %v5341_v33  ;;  %v323_v4 = vmin.f32 %v2479_v47, %v260_v35  ;;  %v324_v61 = vmin.f32 %v2483_v48, %v260_v35 }
 0x159   :  { %v529_v8 = vsub.f32 %v316_v60, %v5342_v15  ;;  %v530_v12 = vsub.f32 %v317_v17, %v5343_v7  ;;  %v3268_v3 = vadd.f32 1.0, %v515_v43  ;;  %v3270_v63 = vadd.f32 1.0, %v516_v21  ;;  %v911_v15 = vpop.permute.xlu1 %910 }
 0x15a   :  { %v3272_v10 = vadd.f32 1.0, %v517_v57  ;;  %v325_v13 = vmin.f32 %v2487_v50, %v260_v35  ;;  %v3275_v58 = vadd.f32 1.0, %v518_v40  ;;  %v3277_v33 = vadd.f32 1.0, %v1033_v29 }
 0x15b   :  { %v3279_v60 = vadd.f32 1.0, %v1034_v1  ;;  %v5346_v11 = vmax.f32 %v2492_v51, %v5299_v30  ;;  %v3284_v7 = vadd.f32 1.0, %v1035_v41  ;;  %v3286_v43 = vadd.f32 1.0, %v1036_v31 }
 0x15c   :  { %5344 = vst [vmem:[#allocation60_spill] sm:$0xff] %v3277_v33  ;;  %v3288_v21 = vadd.f32 1.0, %v527_v14  ;;  %v3290_v57 = vadd.f32 1.0, %v528_v20  ;;  %v3292_v35 = vadd.f32 1.0, %v529_v8  ;;  %v3294_v40 = vadd.f32 1.0, %v530_v12  ;;  %v268_v12 = vpop.permute.xlu0 %267 }
 0x15d   :  { %5345 = vst [vmem:[#allocation61_spill] sm:$0xff] %v3279_v60  ;;  %v535_v17 = vsub.f32 %v322_v38, %v5346_v11  ;;  %5347 = vst [vmem:[#allocation62_spill] sm:$0xff] %v3284_v7  ;;  %v5353_v29 = vmax.f32 %v2496_v53, %v5299_v30  ;;  %v5354_v38 = vmax.f32 %v2500_v54, %v5299_v30  ;;  %v915_v55 = vpop.permute.xlu1 %914 }
 0x15e   :  { %5348 = vst [vmem:[#allocation63_spill] sm:$0xff] %v3286_v43  ;;  %5349 = vst [vmem:[#allocation64_spill] sm:$0xff] %v3288_v21  ;;  %v5355_v20 = vmax.f32 %v2504_v56, %v5299_v30  ;;  %v976_v14 = vmax.f32 %v2650_v52, %v911_v15  ;;  %v330_v30 = vmin.f32 %v2475_v45, %v268_v12 }
 0x15f   :  { %5350 = vst [vmem:[#allocation65_spill] sm:$0xff] %v3290_v57  ;;  %5351 = vst [vmem:[#allocation66_spill] sm:$0xff] %v3292_v35  ;;  %v536_v1 = vsub.f32 %v323_v4, %v5353_v29  ;;  %v537_v11 = vsub.f32 %v324_v61, %v5354_v38  ;;  %v3311_v29 = vadd.f32 1.0, %v535_v17  ;;  %v973_v17 = vmax.f32 %v2632_v34, %v911_v15 }
 0x160   :  { %5352 = vst [vmem:[#allocation67_spill] sm:$0xff] %v3294_v40  ;;  %v538_v8 = vsub.f32 %v325_v13, %v5355_v20  ;;  %v974_v61 = vmax.f32 %v2636_v59, %v911_v15  ;;  %v975_v38 = vmax.f32 %v2646_v25, %v911_v15  ;;  %v333_v13 = vmin.f32 %v2487_v50, %v268_v12  ;;  %v276_v43 = vpop.permute.xlu0 %275 }
 0x161   :  { %5356 = vst [vmem:[#allocation68_spill] sm:$0xff] %v3311_v29  ;;  %v3319_v20 = vadd.f32 1.0, %v536_v1  ;;  %v3321_v32 = vadd.f32 1.0, %v537_v11  ;;  %v331_v1 = vmin.f32 %v2479_v47, %v268_v12  ;;  %v332_v11 = vmin.f32 %v2483_v48, %v268_v12 }
 0x162   :  { %v3323_v4 = vadd.f32 1.0, %v538_v8  ;;  %v977_v8 = vmax.f32 %v2632_v34, %v915_v55  ;;  %v978_v41 = vmax.f32 %v2636_v59, %v915_v55  ;;  %v979_v31 = vmax.f32 %v2646_v25, %v915_v55 }
 0x163   :  { %5357 = vst [vmem:[#allocation69_spill] sm:$0xff] %v3319_v20  ;;  %v980_v15 = vmax.f32 %v2650_v52, %v915_v55  ;;  %v5358_v40 = vmin.f32 %v2734_v42, %v3053_v5  ;;  %v5359_v12 = vmin.f32 %v2744_v39, %v3053_v5  ;;  %v5360_v57 = vmin.f32 %v2748_v18, %v3053_v5 }
 0x164   :  { %v5361_v60 = vmin.f32 %v2852_v0, %v3053_v5  ;;  %v5362_v55 = vmax.f32 %v2492_v51, %v5300_v27  ;;  %v5363_v20 = vmax.f32 %v2496_v53, %v5300_v27  ;;  %v5366_v5 = vmin.f32 %v2734_v42, %v3079_v26 }
 0x165   :  { %v1037_v36 = vsub.f32 %v5358_v40, %v973_v17  ;;  %v1038_v35 = vsub.f32 %v5359_v12, %v974_v61  ;;  %v1039_v7 = vsub.f32 %v5360_v57, %v975_v38  ;;  %v338_v17 = vmin.f32 %v2475_v45, %v276_v43 }
 0x166   :  { %v1040_v46 = vsub.f32 %v5361_v60, %v976_v14  ;;  %v543_v33 = vsub.f32 %v330_v30, %v5362_v55  ;;  %v544_v40 = vsub.f32 %v331_v1, %v5363_v20  ;;  %v5364_v61 = vmax.f32 %v2500_v54, %v5300_v27  ;;  %v3372_v55 = vpop.permute.xlu1 %769 }
 0x167   :  { %v5365_v57 = vmax.f32 %v2504_v56, %v5300_v27  ;;  %v1041_v60 = vsub.f32 %v5366_v5, %v977_v8  ;;  %v5367_v14 = vmin.f32 %v2744_v39, %v3079_v26  ;;  %v5368_v20 = vmin.f32 %v2748_v18, %v3079_v26 }
 0x168   :  { %v545_v12 = vsub.f32 %v332_v11, %v5364_v61  ;;  %v5369_v11 = vmin.f32 %v2852_v0, %v3079_v26  ;;  %v339_v27 = vmin.f32 %v2479_v47, %v276_v43  ;;  %v3384_v8 = vadd.f32 1.0, %v1038_v35 }
 0x169   :  { %v546_v38 = vsub.f32 %v333_v13, %v5365_v57  ;;  %v1042_v30 = vsub.f32 %v5367_v14, %v978_v41  ;;  %v1043_v1 = vsub.f32 %v5368_v20, %v979_v31  ;;  %v340_v13 = vmin.f32 %v2483_v48, %v276_v43 }
 0x16a   :  { %v1044_v61 = vsub.f32 %v5369_v11, %v980_v15  ;;  %v3382_v57 = vadd.f32 1.0, %v1037_v36  ;;  %5371 = vst [vmem:[#allocation71_spill] sm:$0xff] %v3384_v8  ;;  %v3386_v5 = vadd.f32 1.0, %v1039_v7  ;;  %v341_v41 = vmin.f32 %v2487_v50, %v276_v43 }
 0x16b   :  { %v3389_v14 = vadd.f32 1.0, %v1040_v46  ;;  %v3391_v44 = vadd.f32 1.0, %v543_v33  ;;  %v3393_v31 = vadd.f32 1.0, %v544_v40  ;;  %v5376_v26 = vmax.f32 %v2492_v51, %v5301_v28 }
 0x16c   :  { %5370 = vst [vmem:[#allocation70_spill] sm:$0xff] %v3382_v57  ;;  %5372 = vst [vmem:[#allocation72_spill] sm:$0xff] %v3386_v5  ;;  %v3398_v20 = vadd.f32 1.0, %v545_v12  ;;  %v3400_v36 = vadd.f32 1.0, %v546_v38  ;;  %v3402_v35 = vadd.f32 1.0, %v1041_v60  ;;  %v3404_v7 = vadd.f32 1.0, %v1042_v30  ;;  %v284_v12 = vpop.permute.xlu0 %283 }
 0x16d   :  { %5373 = vst [vmem:[#allocation73_spill] sm:$0xff] %v3389_v14  ;;  %5374 = vst [vmem:[#allocation74_spill] sm:$0xff] %v3391_v44  ;;  %v551_v15 = vsub.f32 %v338_v17, %v5376_v26  ;;  %v3406_v11 = vadd.f32 1.0, %v1043_v1  ;;  %v3408_v46 = vadd.f32 1.0, %v1044_v61  ;;  %v5383_v33 = vmax.f32 %v2496_v53, %v5301_v28  ;;  %v919_v26 = vpop.permute.xlu1 %918 }
 0x16e   :  { %5375 = vst [vmem:[#allocation75_spill] sm:$0xff] %v3393_v31  ;;  %5377 = vst [vmem:[#allocation76_spill] sm:$0xff] %v3398_v20  ;;  %v5384_v40 = vmax.f32 %v2500_v54, %v5301_v28  ;;  %v5385_v1 = vmax.f32 %v2504_v56, %v5301_v28  ;;  %v834_v60 = vmin.f32 %v2748_v18, %v3372_v55 }
 0x16f   :  { %5378 = vst [vmem:[#allocation77_spill] sm:$0xff] %v3400_v36  ;;  %5379 = vst [vmem:[#allocation78_spill] sm:$0xff] %v3402_v35  ;;  %v552_v43 = vsub.f32 %v339_v27, %v5383_v33  ;;  %v3425_v21 = vadd.f32 1.0, %v551_v15  ;;  %v832_v15 = vmin.f32 %v2734_v42, %v3372_v55  ;;  %v348_v28 = vmin.f32 %v2483_v48, %v284_v12 }
 0x170   :  { %5380 = vst [vmem:[#allocation79_spill] sm:$0xff] %v3404_v7  ;;  %5381 = vst [vmem:[#allocation80_spill] sm:$0xff] %v3406_v11  ;;  %v553_v17 = vsub.f32 %v340_v13, %v5384_v40  ;;  %v554_v61 = vsub.f32 %v341_v41, %v5385_v1  ;;  %v833_v40 = vmin.f32 %v2744_v39, %v3372_v55 }
 0x171   :  { %5382 = vst [vmem:[#allocation81_spill] sm:$0xff] %v3408_v46  ;;  %5386 = vst [vmem:[#allocation82_spill] sm:$0xff] %v3425_v21  ;;  %v3433_v1 = vadd.f32 1.0, %v552_v43  ;;  %v835_v41 = vmin.f32 %v2852_v0, %v3372_v55  ;;  %v346_v43 = vmin.f32 %v2475_v45, %v284_v12  ;;  %v349_v13 = vmin.f32 %v2487_v50, %v284_v12  ;;  %v774_v46 = vpop.permute.xlu1 %773 }
 0x172   :  { %v3435_v29 = vadd.f32 1.0, %v553_v17  ;;  %v3437_v38 = vadd.f32 1.0, %v554_v61  ;;  %v347_v17 = vmin.f32 %v2479_v47, %v284_v12  ;;  %v292_v61 = vpop.permute.xlu0 %291  ;;  %v981_v33 = vmax.f32 %v2632_v34, %v919_v26 }
 0x173   :  { %5387 = vst [vmem:[#allocation83_spill] sm:$0xff] %v3433_v1  ;;  %v982_v27 = vmax.f32 %v2636_v59, %v919_v26  ;;  %v983_v55 = vmax.f32 %v2646_v25, %v919_v26  ;;  %v984_v7 = vmax.f32 %v2650_v52, %v919_v26  ;;  %v354_v21 = vmin.f32 %v2475_v45, %v292_v61 }
 0x174   :  { %5388 = vst [vmem:[#allocation84_spill] sm:$0xff] %v3435_v29  ;;  %5389 = vst [vmem:[#allocation85_spill] sm:$0xff] %v3437_v38  ;;  %v355_v14 = vmin.f32 %v2479_v47, %v292_v61  ;;  %v356_v12 = vmin.f32 %v2483_v48, %v292_v61  ;;  %v5390_v5 = vmax.f32 %v2492_v51, %v5302_v23 }
 0x175   :  { %v5391_v11 = vmax.f32 %v2496_v53, %v5302_v23  ;;  %v357_v29 = vmin.f32 %v2487_v50, %v292_v61  ;;  %v836_v26 = vmin.f32 %v2734_v42, %v774_v46  ;;  %v5392_v35 = vmax.f32 %v2500_v54, %v5302_v23 }
 0x176   :  { %v559_v8 = vsub.f32 %v346_v43, %v5390_v5  ;;  %v5393_v1 = vmax.f32 %v2504_v56, %v5302_v23  ;;  %v1045_v36 = vsub.f32 %v832_v15, %v981_v33  ;;  %v1046_v20 = vsub.f32 %v833_v40, %v982_v27 }
 0x177   :  { %v560_v30 = vsub.f32 %v347_v17, %v5391_v11  ;;  %v561_v38 = vsub.f32 %v348_v28, %v5392_v35  ;;  %v1047_v31 = vsub.f32 %v834_v60, %v983_v55  ;;  %v1048_v5 = vsub.f32 %v835_v41, %v984_v7  ;;  %v5394_v17 = vld [vmem:[#allocation36_spill] sm:$0xff]  ;;  %v3488_v60 = vpop.permute.xlu1 %777 }
 0x178   :  { %v562_v57 = vsub.f32 %v349_v13, %v5393_v1  ;;  %v837_v43 = vmin.f32 %v2744_v39, %v774_v46  ;;  %v838_v11 = vmin.f32 %v2748_v18, %v774_v46  ;;  %v5395_v61 = vmax.f32 %v2492_v51, %v5394_v17 }
 0x179   :  { %v5396_v16 = vmax.f32 %v2496_v53, %v5394_v17  ;;  %v5397_v23 = vmax.f32 %v2500_v54, %v5394_v17  ;;  %v839_v27 = vmin.f32 %v2852_v0, %v774_v46  ;;  %v3490_v7 = vadd.f32 1.0, %v559_v8 }
 0x17a   :  { %v567_v44 = vsub.f32 %v354_v21, %v5395_v61  ;;  %v3492_v33 = vadd.f32 1.0, %v560_v30  ;;  %v5400_v40 = vmax.f32 %v2504_v56, %v5394_v17  ;;  %v5401_v28 = vmax.f32 %v2632_v34, %v2913_v22 }
 0x17b   :  { %v568_v35 = vsub.f32 %v355_v14, %v5396_v16  ;;  %v569_v13 = vsub.f32 %v356_v12, %v5397_v23  ;;  %5398 = vst [vmem:[#allocation36_spill] sm:$0xff] %v3490_v7  ;;  %v3500_v14 = vadd.f32 1.0, %v561_v38  ;;  %v3502_v41 = vadd.f32 1.0, %v562_v57 }
 0x17c   :  { %5399 = vst [vmem:[#allocation86_spill] sm:$0xff] %v3492_v33  ;;  %v570_v21 = vsub.f32 %v357_v29, %v5400_v40  ;;  %v1049_v16 = vsub.f32 %v836_v26, %v5401_v28  ;;  %v3504_v1 = vadd.f32 1.0, %v1045_v36  ;;  %v3506_v46 = vadd.f32 1.0, %v1046_v20  ;;  %v300_v26 = vpop.permute.xlu0 %299  ;;  %v5488_v33 = vld [vmem:[#allocation67_spill] sm:$0xff] }
 0x17d   :  { %5402 = vst [vmem:[#allocation87_spill] sm:$0xff] %v3500_v14  ;;  %5403 = vst [vmem:[#allocation88_spill] sm:$0xff] %v3502_v41  ;;  %v3508_v8 = vadd.f32 1.0, %v1047_v31  ;;  %v3510_v30 = vadd.f32 1.0, %v1048_v5  ;;  %v5408_v15 = vmax.f32 %v2636_v59, %v2913_v22  ;;  %v5409_v55 = vmax.f32 %v2646_v25, %v2913_v22  ;;  %v5486_v14 = vld [vmem:[#allocation47_spill] sm:$0xff] }
 0x17e   :  { %5404 = vst [vmem:[#allocation89_spill] sm:$0xff] %v3504_v1  ;;  %5405 = vst [vmem:[#allocation90_spill] sm:$0xff] %v3506_v46  ;;  %v3518_v38 = vadd.f32 1.0, %v567_v44  ;;  %v3520_v57 = vadd.f32 1.0, %v568_v35  ;;  %v3522_v36 = vadd.f32 1.0, %v569_v13  ;;  %v5413_v31 = vmax.f32 %v2650_v52, %v2913_v22  ;;  %v3537_v13 = vpop.permute.xlu1 %930 }
 0x17f   :  { %5406 = vst [vmem:[#allocation91_spill] sm:$0xff] %v3508_v8  ;;  %5407 = vst [vmem:[#allocation92_spill] sm:$0xff] %v3510_v30  ;;  %v1050_v29 = vsub.f32 %v837_v43, %v5408_v15  ;;  %v1051_v12 = vsub.f32 %v838_v11, %v5409_v55  ;;  %v3529_v43 = vadd.f32 1.0, %v570_v21  ;;  %v3531_v61 = vadd.f32 1.0, %v1049_v16  ;;  %v5432_v11 = vld [vmem:[#allocation16_spill] sm:$0xff] }
 0x180   :  { %5410 = vst [vmem:[#allocation93_spill] sm:$0xff] %v3518_v38  ;;  %5411 = vst [vmem:[#allocation94_spill] sm:$0xff] %v3520_v57  ;;  %v1052_v20 = vsub.f32 %v839_v27, %v5413_v31  ;;  %v1285_v31 = vpop.permute.xlu0 %1284  ;;  %v362_v22 = vmin.f32 %v2475_v45, %v300_v26  ;;  %v5420_v27 = vmax.f32 %v3089_v19, 0.0  ;;  %v5421_v16 = vmax.f32 %v3270_v63, 0.0  ;;  %v5444_v57 = vld [vmem:[#allocation20_spill] sm:$0xff] }
 0x181   :  { %5412 = vst [vmem:[#allocation95_spill] sm:$0xff] %v3522_v36  ;;  %5414 = vst [vmem:[#allocation96_spill] sm:$0xff] %v3529_v43  ;;  %v3541_v40 = vadd.f32 1.0, %v1050_v29  ;;  %v3543_v21 = vadd.f32 1.0, %v1051_v12  ;;  %v363_v29 = vmin.f32 %v2479_v47, %v300_v26  ;;  %v5419_v12 = vmax.f32 %v3268_v3, 0.0 }
 0x182   :  { %5415 = vst [vmem:[#allocation97_spill] sm:$0xff] %v3531_v61  ;;  %v3548_v55 = vadd.f32 1.0, %v1052_v20  ;;  %v5422_v20 = vmax.f32 %v3091_v37, 0.0  ;;  %v5423_v23 = vmax.f32 %v3272_v10, 0.0  ;;  %v5424_v44 = vmax.f32 %v3095_v62, 0.0 }
 0x183   :  { %5416 = vst [vmem:[#allocation98_spill] sm:$0xff] %v3541_v40  ;;  %5417 = vst [vmem:[#allocation99_spill] sm:$0xff] %v3543_v21  ;;  %v3558_v28 = vmul.f32 %v5420_v27, %v5419_v12  ;;  %v5425_v45 = vmax.f32 %v3275_v58, 0.0  ;;  %v5426_v47 = vmax.f32 %v3097_v2, 0.0  ;;  %v5427_v27 = vld [vmem:[#allocation22_spill] sm:$0xff]  ;;  %v364_v10 = vmin.f32 %v2483_v48, %v300_v26  ;;  %v1290_v58 = vpop.permute.xlu1 %1289 }
 0x184   :  { %5418 = vst [vmem:[#allocation100_spill] sm:$0xff] %v3548_v55  ;;  %v3564_v15 = vmul.f32 %v5422_v20, %v5421_v16  ;;  %v3570_v17 = vmul.f32 %v5424_v44, %v5423_v23  ;;  %v1362_v37 = vadd.f32 %v1285_v31, %v5427_v27  ;;  %v5428_v16 = vld [vmem:[#allocation15_spill] sm:$0xff]  ;;  %v365_v62 = vmin.f32 %v2487_v50, %v300_v26  ;;  %v5429_v48 = vld [vmem:[#allocation38_spill] sm:$0xff] }
 0x185   :  { %v3576_v3 = vmul.f32 %v5426_v47, %v5425_v45  ;;  %v1363_v12 = vadd.f32 %v1285_v31, %v5428_v16  ;;  %v840_v44 = vmin.f32 %v2734_v42, %v3488_v60  ;;  %v841_v2 = vmin.f32 %v2744_v39, %v3488_v60 }
 0x186   :  { %v842_v20 = vmin.f32 %v2748_v18, %v3488_v60  ;;  %v843_v45 = vmin.f32 %v2852_v0, %v3488_v60  ;;  %v1426_v47 = vsub.f32 %v1362_v37, %v3558_v28  ;;  %v5430_v50 = vmax.f32 %v2492_v51, %v5429_v48 }
 0x187   :  { %v5431_v63 = vmax.f32 %v2496_v53, %v5429_v48  ;;  %v1364_v5 = vadd.f32 %v1285_v31, %v5432_v11  ;;  %v1427_v23 = vsub.f32 %v1363_v12, %v3564_v15  ;;  %v1366_v35 = vadd.f32 %v1290_v58, %v5427_v27 }
 0x188   :  { %v575_v26 = vsub.f32 %v362_v22, %v5430_v50  ;;  %2062 = vrcp.f32 %v1426_v47  ;;  %v1367_v43 = vadd.f32 %v1290_v58, %v5428_v16  ;;  %v1368_v60 = vadd.f32 %v1290_v58, %v5432_v11 }
 0x189   :  { %v576_v19 = vsub.f32 %v363_v29, %v5431_v63  ;;  %v5433_v37 = vmax.f32 %v2500_v54, %v5429_v48  ;;  %v5434_v53 = vmax.f32 %v2504_v56, %v5429_v48  ;;  %v5435_v29 = vmax.f32 %v2632_v34, %v2957_v6  ;;  %v5439_v56 = vld [vmem:[#allocation17_spill] sm:$0xff] }
 0x18a   :  { %v5436_v12 = vmax.f32 %v2636_v59, %v2957_v6  ;;  %v5437_v50 = vmax.f32 %v2646_v25, %v2957_v6  ;;  %v5438_v54 = vmax.f32 %v2650_v52, %v2957_v6  ;;  %v5440_v48 = vld [vmem:[#allocation13_spill] sm:$0xff]  ;;  %2064 = vrcp.f32 %v1427_v23 }
 0x18b   :  { %v3608_v51 = vsub.f32 %v364_v10, %v5433_v37  ;;  %v3613_v22 = vsub.f32 %v365_v62, %v5434_v53  ;;  %v1053_v63 = vsub.f32 %v840_v44, %v5435_v29  ;;  %v1369_v62 = vadd.f32 %v1290_v58, %v5439_v56  ;;  %v5446_v58 = vld [vmem:[#allocation5_spill] sm:$0xff] }
 0x18c   :  { %v1054_v47 = vsub.f32 %v841_v2, %v5436_v12  ;;  %v3624_v36 = vsub.f32 %v842_v20, %v5437_v50  ;;  %v3629_v10 = vsub.f32 %v843_v45, %v5438_v54  ;;  %v1430_v37 = vsub.f32 %v1366_v35, %v5440_v48  ;;  %v1295_v12 = vpop.permute.xlu1 %1294  ;;  %v5443_v20 = vld [vmem:[#allocation19_spill] sm:$0xff]  ;;  %v5445_v45 = vld [vmem:[#allocation21_spill] sm:$0xff] }
 0x18d   :  { %v3633_v53 = vadd.f32 1.0, %v575_v26  ;;  %v3635_v44 = vadd.f32 1.0, %v576_v19  ;;  %v1365_v2 = vadd.f32 %v1285_v31, %v5439_v56  ;;  %v1428_v29 = vsub.f32 %v1364_v5, %v3570_v17  ;;  %v5449_v19 = vld [vmem:[#allocation10_spill] sm:$0xff]  ;;  %v5452_v23 = vld [vmem:[#allocation9_spill] sm:$0xff] }
 0x18e   :  { %v1431_v50 = vsub.f32 %v1367_v43, %v5443_v20  ;;  %v1432_v6 = vsub.f32 %v1368_v60, %v5444_v57  ;;  %v1433_v54 = vsub.f32 %v1369_v62, %v5445_v45  ;;  %2066 = vrcp.f32 %v1430_v37  ;;  %v5454_v43 = vld [vmem:[#allocation42_spill] sm:$0xff] }
 0x18f   :  { %5441 = vst [vmem:[#allocation15_spill] sm:$0xff] %v3633_v53  ;;  %5442 = vst [vmem:[#allocation38_spill] sm:$0xff] %v3635_v44  ;;  %v5447_v38 = vmax.f32 %v5446_v58, 0.0  ;;  %v5448_v35 = vmax.f32 %v3072_v9, 0.0  ;;  %v5450_v30 = vmax.f32 %v5449_v19, 0.0  ;;  %v5451_v31 = vmax.f32 %v3074_v49, 0.0 }
 0x190   :  { %v5453_v8 = vmax.f32 %v5452_v23, 0.0  ;;  %v5455_v46 = vmax.f32 %v5454_v43, 0.0  ;;  %2068 = vrcp.f32 %v1431_v50  ;;  %v5456_v62 = vld [vmem:[#allocation18_spill] sm:$0xff]  ;;  %v5458_v58 = vld [vmem:[#allocation43_spill] sm:$0xff]  ;;  %v3668_v49 = vadd.f32 1.0, %v1053_v63 }
 0x191   :  { %v3646_v26 = vmul.f32 %v5448_v35, %v5447_v38  ;;  %v3652_v5 = vmul.f32 %v5451_v31, %v5450_v30  ;;  %v5457_v37 = vmax.f32 %v5456_v62, 0.0  ;;  %v5459_v55 = vmax.f32 %v5458_v58, 0.0 }
 0x192   :  { %v3658_v60 = vmul.f32 %v5455_v46, %v5453_v8  ;;  %v1370_v38 = vadd.f32 %v1295_v12, %v5427_v27  ;;  %v1371_v35 = vadd.f32 %v1295_v12, %v5428_v16  ;;  %v1429_v30 = vsub.f32 %v1365_v2, %v3576_v3  ;;  %v1310_v46 = vpop.permute.xlu0 %1309 }
 0x193   :  { %v3664_v9 = vmul.f32 %v5459_v55, %v5457_v37  ;;  %2070 = vrcp.f32 %v1428_v29  ;;  %v1372_v19 = vadd.f32 %v1295_v12, %v5432_v11  ;;  %v1373_v8 = vadd.f32 %v1295_v12, %v5439_v56  ;;  %v5463_v29 = vld [vmem:[#allocation55_spill] sm:$0xff]  ;;  %v2063_v12 = vpop.eup %2062 }
 0x194   :  { %2072 = vrcp.f32 %v1432_v6  ;;  %v1434_v50 = vsub.f32 %v1370_v38, %v3646_v26  ;;  %v1435_v55 = vsub.f32 %v1371_v35, %v3652_v5  ;;  %v3675_v31 = vadd.f32 1.0, %v1054_v47  ;;  %v5467_v38 = vld [vmem:[#allocation44_spill] sm:$0xff]  ;;  %v2065_v41 = vpop.eup %2064 }
 0x195   :  { %2074 = vrcp.f32 %v1433_v54  ;;  %v5460_v23 = vmax.f32 %v3321_v32, 0.0  ;;  %v5461_v63 = vmax.f32 %v3172_v24, 0.0  ;;  %v5462_v2 = vmax.f32 %v3323_v4, 0.0  ;;  %v5465_v4 = vld [vmem:[#allocation64_spill] sm:$0xff]  ;;  %v1300_v24 = vpop.permute.xlu1 %1299 }
 0x196   :  { %v5464_v62 = vmax.f32 %v5463_v29, 0.0  ;;  %v993_v37 = vmax.f32 %v2632_v34, %v3537_v13  ;;  %v1436_v47 = vsub.f32 %v1372_v19, %v3658_v60  ;;  %2076 = vrcp.f32 %v1434_v50  ;;  %v5471_v29 = vld [vmem:[#allocation53_spill] sm:$0xff] }
 0x197   :  { %v3681_v43 = vmul.f32 %v5461_v63, %v5460_v23  ;;  %v1382_v54 = vadd.f32 %v1310_v46, %v5427_v27  ;;  %2078 = vrcp.f32 %v1435_v55  ;;  %v5466_v58 = vmax.f32 %v5465_v4, 0.0  ;;  %v5469_v63 = vld [vmem:[#allocation68_spill] sm:$0xff]  ;;  %v5475_v4 = vld [vmem:[#allocation69_spill] sm:$0xff] }
 0x198   :  { %v3687_v6 = vmul.f32 %v5464_v62, %v5462_v2  ;;  %v5468_v35 = vmax.f32 %v5467_v38, 0.0  ;;  %2080 = vrcp.f32 %v1429_v30  ;;  %v1437_v50 = vsub.f32 %v1373_v8, %v3664_v9 }
 0x199   :  { %v5470_v2 = vmax.f32 %v5469_v63, 0.0  ;;  %v5472_v62 = vmax.f32 %v5471_v29, 0.0  ;;  %v3713_v55 = vmul.f32 %v2063_v12, %v3558_v28  ;;  %v5476_v38 = vmax.f32 %v5475_v4, 0.0  ;;  %v5484_v12 = vld [vmem:[#allocation66_spill] sm:$0xff] }
 0x19a   :  { %v3701_v23 = vmul.f32 %v5468_v35, %v5466_v58  ;;  %v5477_v58 = vld [vmem:[#allocation54_spill] sm:$0xff]  ;;  %v1383_v19 = vadd.f32 %v1310_v46, %v5428_v16  ;;  %v1384_v8 = vadd.f32 %v1310_v46, %v5432_v11  ;;  %2082 = vrcp.f32 %v1436_v47  ;;  %v5490_v47 = vld [vmem:[#allocation48_spill] sm:$0xff] }
 0x19b   :  { %v3710_v32 = vmul.f32 %v5472_v62, %v5470_v2  ;;  %5474 = vst [vmem:[#allocation19_spill] sm:$0xff] %v3713_v55  ;;  %v5478_v35 = vmax.f32 %v5477_v58, 0.0  ;;  %v5480_v2 = vld [vmem:[#allocation65_spill] sm:$0xff]  ;;  %v5482_v62 = vld [vmem:[#allocation46_spill] sm:$0xff]  ;;  %v5485_v4 = vmax.f32 %v5484_v12, 0.0  ;;  %v5487_v58 = vmax.f32 %v5486_v14, 0.0 }
 0x19c   :  { %v5481_v29 = vmax.f32 %v5480_v2, 0.0  ;;  %v5483_v21 = vmax.f32 %v5482_v62, 0.0  ;;  %v1385_v40 = vadd.f32 %v1310_v46, %v5439_v56  ;;  %v5489_v61 = vmax.f32 %v5488_v33, 0.0 }
 0x19d   :  { %5473 = vst [vmem:[#allocation13_spill] sm:$0xff] %v3710_v32  ;;  %v3719_v30 = vmul.f32 %v5478_v35, %v5476_v38  ;;  %v1446_v63 = vsub.f32 %v1382_v54, %v3710_v32  ;;  %v3734_v38 = vmul.f32 %v5487_v58, %v5485_v4  ;;  %v2067_v35 = vpop.eup %2066  ;;  %v5491_v7 = vmax.f32 %v5490_v47, 0.0 }
 0x19e   :  { %v3728_v28 = vmul.f32 %v5483_v21, %v5481_v29  ;;  %v1374_v2 = vadd.f32 %v1300_v24, %v5427_v27  ;;  %v1375_v21 = vadd.f32 %v1300_v24, %v5428_v16  ;;  %v2069_v29 = vpop.eup %2068  ;;  %v3746_v62 = vmul.f32 %v2067_v35, %v5440_v48 }
 0x19f   :  { %5479 = vst [vmem:[#allocation20_spill] sm:$0xff] %v3719_v30  ;;  %v3741_v54 = vmul.f32 %v5491_v7, %v5489_v61  ;;  %2084 = vrcp.f32 %v1437_v50  ;;  %v1376_v14 = vadd.f32 %v1300_v24, %v5432_v11  ;;  %v1377_v12 = vadd.f32 %v1300_v24, %v5439_v56  ;;  %v2071_v46 = vpop.eup %2070 }
 0x1a0   :  { %5492 = vst [vmem:[#allocation21_spill] sm:$0xff] %v3746_v62  ;;  %v3751_v33 = vmul.f32 %v2065_v41, %v3564_v15  ;;  %v3754_v7 = vmul.f32 %v2069_v29, %v5443_v20  ;;  %v1438_v61 = vsub.f32 %v1374_v2, %v3701_v23  ;;  %v1439_v4 = vsub.f32 %v1375_v21, %v3728_v28  ;;  %v2073_v58 = vpop.eup %2072  ;;  %v5495_v20 = vld [vmem:[#allocation25_spill] sm:$0xff]  ;;  %v5497_v2 = vld [vmem:[#allocation56_spill] sm:$0xff] }
 0x1a1   :  { %v1618_v48 = vmax.f32 %v3713_v55, %v3746_v62  ;;  %2086 = vrcp.f32 %v1446_v63  ;;  %v1440_v50 = vsub.f32 %v1376_v14, %v3734_v38  ;;  %v1441_v24 = vsub.f32 %v1377_v12, %v3741_v54  ;;  %v2075_v35 = vpop.eup %2074  ;;  %v5499_v14 = vld [vmem:[#allocation26_spill] sm:$0xff]  ;;  %v5501_v12 = vld [vmem:[#allocation57_spill] sm:$0xff] }
 0x1a2   :  { %5493 = vst [vmem:[#allocation5_spill] sm:$0xff] %v3751_v33  ;;  %5494 = vst [vmem:[#allocation10_spill] sm:$0xff] %v3754_v7  ;;  %v1639_v41 = vmax.f32 %v3751_v33, %v3754_v7  ;;  %v1447_v15 = vsub.f32 %v1383_v19, %v3719_v30  ;;  %2088 = vrcp.f32 %v1438_v61  ;;  %v5496_v47 = vmax.f32 %v5495_v20, 0.0  ;;  %v2077_v1 = vpop.eup %2076  ;;  %v5503_v7 = vld [vmem:[#allocation27_spill] sm:$0xff]  ;;  %v5505_v19 = vld [vmem:[#allocation58_spill] sm:$0xff] }
 0x1a3   :  { %v5498_v21 = vmax.f32 %v5497_v2, 0.0  ;;  %v1448_v63 = vsub.f32 %v1384_v8, %v3681_v43  ;;  %2090 = vrcp.f32 %v1439_v4  ;;  %v5500_v62 = vmax.f32 %v5499_v14, 0.0  ;;  %v2079_v20 = vpop.eup %2078  ;;  %v5508_v8 = vld [vmem:[#allocation28_spill] sm:$0xff] }
 0x1a4   :  { %v5502_v55 = vmax.f32 %v5501_v12, 0.0  ;;  %v5504_v33 = vmax.f32 %v5503_v7, 0.0  ;;  %v5506_v61 = vmax.f32 %v5505_v19, 0.0  ;;  %v1449_v2 = vsub.f32 %v1385_v40, %v3687_v6 }
 0x1a5   :  { %v3769_v29 = vmul.f32 %v5498_v21, %v5496_v47  ;;  %v3785_v47 = vmul.f32 %v2077_v1, %v3646_v26  ;;  %2092 = vrcp.f32 %v1440_v50  ;;  %v5509_v4 = vmax.f32 %v5508_v8, 0.0  ;;  %v5510_v21 = vld [vmem:[#allocation59_spill] sm:$0xff]  ;;  %v5514_v1 = vld [vmem:[#allocation45_spill] sm:$0xff] }
 0x1a6   :  { %v3776_v32 = vmul.f32 %v5502_v55, %v5500_v62  ;;  %v3782_v30 = vmul.f32 %v5506_v61, %v5504_v33  ;;  %v5511_v14 = vmax.f32 %v5510_v21, 0.0  ;;  %v2081_v55 = vpop.eup %2080  ;;  %v3795_v62 = vadd.f32 1.0, %v3624_v36  ;;  %v1315_v36 = vpop.permute.xlu0 %1314  ;;  %v5525_v21 = vld [vmem:[#allocation6_spill] sm:$0xff] }
 0x1a7   :  { %5507 = vst [vmem:[#allocation9_spill] sm:$0xff] %v3785_v47  ;;  %v3798_v33 = vmul.f32 %v2073_v58, %v5444_v57  ;;  %v3801_v7 = vmul.f32 %v2079_v20, %v3652_v5  ;;  %2094 = vrcp.f32 %v1441_v24  ;;  %v5515_v40 = vmin.f32 %v2734_v42, %v5514_v1  ;;  %v2083_v61 = vpop.eup %2082 }
 0x1a8   :  { %v3792_v12 = vmul.f32 %v5511_v14, %v5509_v4  ;;  %v3807_v50 = vmul.f32 %v2075_v35, %v5445_v45  ;;  %v3810_v19 = vmax.f32 %v1618_v48, %v3785_v47  ;;  %2096 = vrcp.f32 %v1447_v15 }
 0x1a9   :  { %5512 = vst [vmem:[#allocation42_spill] sm:$0xff] %v3798_v33  ;;  %5513 = vst [vmem:[#allocation18_spill] sm:$0xff] %v3801_v7  ;;  %v1057_v26 = vsub.f32 %v5515_v40, %v993_v37  ;;  %v3813_v57 = vmul.f32 %v2071_v46, %v3570_v17  ;;  %v5518_v5 = vmax.f32 %v2636_v59, %v3537_v13  ;;  %2098 = vrcp.f32 %v1448_v63  ;;  %v2085_v63 = vpop.eup %2084 }
 0x1aa   :  { %5516 = vst [vmem:[#allocation43_spill] sm:$0xff] %v3807_v50  ;;  %v5519_v58 = vmin.f32 %v2744_v39, %v5514_v1  ;;  %v3822_v37 = vmax.f32 %v1639_v41, %v3801_v7  ;;  %v3825_v45 = vmul.f32 %v2081_v55, %v3576_v3  ;;  %v5521_v48 = vmax.f32 %v2646_v25, %v3537_v13  ;;  %v1305_v41 = vpop.permute.xlu1 %1304  ;;  %v5527_v55 = vld [vmem:[#allocation49_spill] sm:$0xff] }
 0x1ab   :  { %5517 = vst [vmem:[#allocation55_spill] sm:$0xff] %v3813_v57  ;;  %v5522_v17 = vmin.f32 %v2748_v18, %v5514_v1  ;;  %v5523_v35 = vmax.f32 %v2650_v52, %v3537_v13  ;;  %v5524_v15 = vmin.f32 %v2852_v0, %v5514_v1  ;;  %2100 = vrcp.f32 %v1449_v2  ;;  %v5530_v1 = vld [vmem:[#allocation2_spill] sm:$0xff]  ;;  %v5659_v0 = vld [vmem:[#allocation79_spill] sm:$0xff] }
 0x1ac   :  { %v1058_v24 = vsub.f32 %v5519_v58, %v5518_v5  ;;  %5520 = vst [vmem:[#allocation64_spill] sm:$0xff] %v3825_v45  ;;  %v1660_v3 = vmax.f32 %v3813_v57, %v3798_v33  ;;  %v1386_v8 = vadd.f32 %v1315_v36, %v5427_v27  ;;  %v1387_v4 = vadd.f32 %v1315_v36, %v5428_v16  ;;  %v5536_v57 = vld [vmem:[#allocation51_spill] sm:$0xff] }
 0x1ad   :  { %v1059_v46 = vsub.f32 %v5522_v17, %v5521_v48  ;;  %v1060_v20 = vsub.f32 %v5524_v15, %v5523_v35  ;;  %v5526_v14 = vmax.f32 %v5525_v21, 0.0  ;;  %v5528_v40 = vmax.f32 %v5527_v55, 0.0  ;;  %v5532_v48 = vld [vmem:[#allocation50_spill] sm:$0xff]  ;;  %v5534_v15 = vld [vmem:[#allocation23_spill] sm:$0xff] }
 0x1ae   :  { %v1681_v13 = vmax.f32 %v3825_v45, %v3807_v50  ;;  %v3852_v2 = vmul.f32 %v2083_v61, %v3658_v60  ;;  %v5531_v58 = vmax.f32 %v5530_v1, 0.0  ;;  %v5533_v17 = vmax.f32 %v5532_v48, 0.0  ;;  %v5538_v60 = vld [vmem:[#allocation24_spill] sm:$0xff] }
 0x1af   :  { %v3847_v5 = vmul.f32 %v5528_v40, %v5526_v14  ;;  %v5535_v33 = vmax.f32 %v5534_v15, 0.0  ;;  %v5537_v21 = vmax.f32 %v5536_v57, 0.0  ;;  %v3866_v14 = vpop.eup %2086  ;;  %v1388_v55 = vadd.f32 %v1315_v36, %v5432_v11  ;;  %v5540_v50 = vld [vmem:[#allocation52_spill] sm:$0xff] }
 0x1b0   :  { %5529 = vst [vmem:[#allocation44_spill] sm:$0xff] %v3852_v2  ;;  %v3858_v35 = vmul.f32 %v5533_v17, %v5531_v58  ;;  %v1389_v40 = vadd.f32 %v1315_v36, %v5439_v56  ;;  %v5539_v61 = vmax.f32 %v5538_v60, 0.0  ;;  %v5541_v1 = vmax.f32 %v5540_v50, 0.0  ;;  %v2089_v48 = vpop.eup %2088 }
 0x1b1   :  { %v3864_v7 = vmul.f32 %v5537_v21, %v5535_v33  ;;  %v1378_v58 = vadd.f32 %v1305_v41, %v5427_v27  ;;  %v3878_v17 = vmul.f32 %v2085_v63, %v3664_v9  ;;  %v1379_v33 = vadd.f32 %v1305_v41, %v5428_v16  ;;  %v2091_v21 = vpop.eup %2090 }
 0x1b2   :  { %v3874_v45 = vmul.f32 %v5541_v1, %v5539_v61  ;;  %v1380_v57 = vadd.f32 %v1305_v41, %v5432_v11  ;;  %v1381_v15 = vadd.f32 %v1305_v41, %v5439_v56  ;;  %v3884_v36 = vmul.f32 %v2089_v48, %v3701_v23  ;;  %v2093_v1 = vpop.eup %2092 }
 0x1b3   :  { %5542 = vst [vmem:[#allocation68_spill] sm:$0xff] %v3878_v17  ;;  %v1450_v50 = vsub.f32 %v1386_v8, %v3769_v29  ;;  %v1451_v60 = vsub.f32 %v1387_v4, %v3776_v32  ;;  %v1442_v61 = vsub.f32 %v1378_v58, %v3847_v5  ;;  %v3890_v9 = vmul.f32 %v2091_v21, %v3728_v28  ;;  %v2095_v56 = vpop.eup %2094 }
 0x1b4   :  { %5543 = vst [vmem:[#allocation53_spill] sm:$0xff] %v3884_v36  ;;  %v1443_v63 = vsub.f32 %v1379_v33, %v3858_v35  ;;  %v1444_v47 = vsub.f32 %v1380_v57, %v3864_v7  ;;  %v1445_v41 = vsub.f32 %v1381_v15, %v3874_v45  ;;  %v3896_v23 = vmax.f32 %v1660_v3, %v3852_v2  ;;  %v2097_v58 = vpop.eup %2096  ;;  %v3917_v15 = vpop.permute.xlu0 %785 }
 0x1b5   :  { %5544 = vst [vmem:[#allocation69_spill] sm:$0xff] %v3890_v9  ;;  %v3899_v8 = vmul.f32 %v2093_v1, %v3734_v38  ;;  %v1620_v4 = vmax.f32 %v3810_v19, %v3884_v36  ;;  %2102 = vrcp.f32 %v1442_v61  ;;  %v3904_v28 = vmax.f32 %v1681_v13, %v3878_v17  ;;  %v2099_v3 = vpop.eup %2098  ;;  %5547 = vst [vmem:[#allocation46_spill] sm:$0xff] %v3917_v15  ;;  %v3937_v1 = vpop.permute.xlu1 %934  ;;  %v5564_v38 = vld [vmem:[#allocation36_spill] sm:$0xff]  ;;  %v5566_v17 = vld [vmem:[#allocation97_spill] sm:$0xff] }
 0x1b6   :  { %v3907_v48 = vmul.f32 %v2095_v56, %v3741_v54  ;;  %v1641_v33 = vmax.f32 %v3822_v37, %v3890_v9  ;;  %2104 = vrcp.f32 %v1443_v63  ;;  %v3912_v57 = vadd.f32 1.0, %v3629_v10  ;;  %v2101_v13 = vpop.eup %2100  ;;  %5550 = vst [vmem:[#allocation67_spill] sm:$0xff] %v3937_v1  ;;  %v5562_v56 = vld [vmem:[#allocation89_spill] sm:$0xff] }
 0x1b7   :  { %5545 = vst [vmem:[#allocation54_spill] sm:$0xff] %v3899_v8  ;;  %v1452_v19 = vsub.f32 %v1388_v55, %v3782_v30  ;;  %2106 = vrcp.f32 %v1444_v47  ;;  %v3919_v21 = vadd.f32 1.0, %v1057_v26  ;;  %v1453_v54 = vsub.f32 %v1389_v40, %v3792_v12  ;;  %v5551_v26 = vld [vmem:[#allocation13_spill] sm:$0xff] }
 0x1b8   :  { %5546 = vst [vmem:[#allocation65_spill] sm:$0xff] %v3907_v48  ;;  %2108 = vrcp.f32 %v1445_v41  ;;  %v3925_v10 = vadd.f32 1.0, %v3608_v51  ;;  %v3927_v37 = vadd.f32 1.0, %v1058_v24  ;;  %v3929_v61 = vadd.f32 1.0, %v1059_v46  ;;  %v1335_v40 = vpop.permute.xlu0 %1334 }
 0x1b9   :  { %2110 = vrcp.f32 %v1450_v50  ;;  %v3932_v47 = vadd.f32 1.0, %v3613_v22  ;;  %v3935_v55 = vadd.f32 1.0, %v1060_v20  ;;  %v848_v63 = vmin.f32 %v2734_v42, %v3917_v15  ;;  %v5553_v50 = vld [vmem:[#allocation20_spill] sm:$0xff] }
 0x1ba   :  { %5548 = vst [vmem:[#allocation66_spill] sm:$0xff] %v3925_v10  ;;  %2112 = vrcp.f32 %v1451_v60  ;;  %v997_v41 = vmax.f32 %v2632_v34, %v3937_v1  ;;  %v3954_v46 = vmul.f32 %v3866_v14, %v5551_v26  ;;  %v3957_v24 = vmul.f32 %v2097_v58, %v5553_v50  ;;  %v5560_v14 = vld [vmem:[#allocation32_spill] sm:$0xff] }
 0x1bb   :  { %5549 = vst [vmem:[#allocation47_spill] sm:$0xff] %v3932_v47  ;;  %2114 = vrcp.f32 %v1452_v19  ;;  %v3963_v60 = vmul.f32 %v2101_v13, %v3687_v6  ;;  %v849_v20 = vmin.f32 %v2744_v39, %v3917_v15  ;;  %v5561_v22 = vmax.f32 %v5560_v14, 0.0  ;;  %v5593_v15 = vld [vmem:[#allocation91_spill] sm:$0xff] }
 0x1bc   :  { %2116 = vrcp.f32 %v1453_v54  ;;  %5552 = vst [vmem:[#allocation48_spill] sm:$0xff] %v3954_v46  ;;  %5554 = vst [vmem:[#allocation25_spill] sm:$0xff] %v3957_v24  ;;  %v3960_v54 = vmul.f32 %v2099_v3, %v3681_v43  ;;  %v998_v43 = vmax.f32 %v2636_v59, %v3937_v1  ;;  %v3983_v19 = vsub.f32 %v848_v63, %v997_v41  ;;  %v5569_v41 = vld [vmem:[#allocation86_spill] sm:$0xff] }
 0x1bd   :  { %5556 = vst [vmem:[#allocation26_spill] sm:$0xff] %v3963_v60  ;;  %v5565_v9 = vmax.f32 %v5564_v38, 0.0  ;;  %v5567_v36 = vmax.f32 %v5566_v17, 0.0  ;;  %v1402_v63 = vadd.f32 %v1335_v40, %v5427_v27  ;;  %v5570_v14 = vmax.f32 %v5569_v41, 0.0 }
 0x1be   :  { %5555 = vst [vmem:[#allocation56_spill] sm:$0xff] %v3960_v54  ;;  %5559 = vst [vmem:[#allocation58_spill] sm:$0xff] %v3983_v19 }
 0x1bf   :  { %v2103_v51 = vpop.eup %2102  ;;  %v3995_v6 = vmul.f32 %v5567_v36, %v5565_v9  ;;  %v1340_v9 = vpop.permute.xlu0 %1339 }
 0x1c0   :  { %v2105_v26 = vpop.eup %2104  ;;  %v3972_v58 = vmul.f32 %v2103_v51, %v3847_v5  ;;  %v5563_v5 = vmax.f32 %v5562_v56, 0.0  ;;  %v5571_v56 = vld [vmem:[#allocation98_spill] sm:$0xff] }
 0x1c1   :  { %v2107_v13 = vpop.eup %2106  ;;  %v3981_v50 = vmul.f32 %v2105_v26, %v3858_v35 }
 0x1c2   :  { %5557 = vst [vmem:[#allocation57_spill] sm:$0xff] %v3972_v58  ;;  %v3989_v51 = vmul.f32 %v5563_v5, %v5561_v22  ;;  %v2109_v2 = vpop.eup %2108  ;;  %v3998_v3 = vmul.f32 %v2107_v13, %v3864_v7  ;;  %v4001_v35 = vmax.f32 %v1620_v4, %v3972_v58  ;;  %v5572_v22 = vmax.f32 %v5571_v56, 0.0  ;;  %v5574_v4 = vld [vmem:[#allocation87_spill] sm:$0xff]  ;;  %v4030_v56 = vpop.permute.xlu1 %789 }
 0x1c3   :  { %5558 = vst [vmem:[#allocation27_spill] sm:$0xff] %v3981_v50  ;;  %v2111_v38 = vpop.eup %2110  ;;  %v4011_v17 = vmul.f32 %v2109_v2, %v3874_v45  ;;  %v4014_v36 = vmax.f32 %v1641_v33, %v3981_v50  ;;  %v1403_v7 = vadd.f32 %v1335_v40, %v5428_v16  ;;  %v5575_v13 = vmax.f32 %v5574_v4, 0.0  ;;  %v5576_v5 = vld [vmem:[#allocation99_spill] sm:$0xff]  ;;  %v5582_v4 = vld [vmem:[#allocation100_spill] sm:$0xff] }
 0x1c4   :  { %5568 = vst [vmem:[#allocation28_spill] sm:$0xff] %v3998_v3  ;;  %v4008_v26 = vmul.f32 %v5572_v22, %v5570_v14  ;;  %v5577_v58 = vmax.f32 %v5576_v5, 0.0  ;;  %v2113_v41 = vpop.eup %2112  ;;  %v1622_v14 = vmax.f32 %v4001_v35, %v3954_v46  ;;  %v5579_v45 = vmax.f32 %v3896_v23, %v3899_v8  ;;  %v5580_v22 = vld [vmem:[#allocation88_spill] sm:$0xff] }
 0x1c5   :  { %5573 = vst [vmem:[#allocation59_spill] sm:$0xff] %v4011_v17  ;;  %v1404_v33 = vadd.f32 %v1335_v40, %v5432_v11  ;;  %v5581_v50 = vmax.f32 %v5580_v22, 0.0  ;;  %v5583_v19 = vmax.f32 %v5582_v4, 0.0  ;;  %v5585_v35 = vmax.f32 %v3904_v28, %v3907_v48  ;;  %v5590_v22 = vld [vmem:[#allocation17_spill] sm:$0xff] }
 0x1c6   :  { %v4021_v47 = vmul.f32 %v5577_v58, %v5575_v13  ;;  %v1663_v2 = vmax.f32 %v5579_v45, %v3998_v3  ;;  %v2115_v58 = vpop.eup %2114  ;;  %v1643_v13 = vmax.f32 %v4014_v36, %v3957_v24  ;;  %v5586_v45 = vld [vmem:[#allocation35_spill] sm:$0xff]  ;;  %v5588_v3 = vld [vmem:[#allocation90_spill] sm:$0xff]  ;;  %v1405_v53 = vadd.f32 %v1335_v40, %v5590_v22 }
 0x1c7   :  { %v4036_v5 = vmul.f32 %v5583_v19, %v5581_v50  ;;  %v1684_v23 = vmax.f32 %v5585_v35, %v4011_v17  ;;  %v5587_v46 = vmax.f32 %v5586_v45, 0.0  ;;  %v5589_v8 = vmax.f32 %v5588_v3, 0.0  ;;  %v2117_v4 = vpop.eup %2116  ;;  %v5591_v50 = vld [vmem:[#allocation11_spill] sm:$0xff]  ;;  %v5595_v3 = vld [vmem:[#allocation12_spill] sm:$0xff] }
 0x1c8   :  { %5578 = vst [vmem:[#allocation45_spill] sm:$0xff] %v4021_v47  ;;  %v1664_v19 = vmax.f32 %v1663_v2, %v3960_v54  ;;  %v5592_v10 = vmax.f32 %v5591_v50, 0.0  ;;  %v5594_v36 = vmax.f32 %v5593_v15, 0.0  ;;  %v1466_v28 = vsub.f32 %v1402_v63, %v3989_v51  ;;  %v5645_v54 = vld [vmem:[#allocation72_spill] sm:$0xff] }
 0x1c9   :  { %5584 = vst [vmem:[#allocation6_spill] sm:$0xff] %v4036_v5  ;;  %v4048_v44 = vmul.f32 %v5589_v8, %v5587_v46  ;;  %v1406_v35 = vadd.f32 %v1340_v9, %v5427_v27  ;;  %v1685_v45 = vmax.f32 %v1684_v23, %v3963_v60  ;;  %v5596_v8 = vmax.f32 %v5595_v3, 0.0  ;;  %v5597_v46 = vld [vmem:[#allocation92_spill] sm:$0xff]  ;;  %v5610_v60 = vld [vmem:[#allocation61_spill] sm:$0xff] }
 0x1ca   :  { %v4056_v24 = vmul.f32 %v5594_v36, %v5592_v10  ;;  %v5598_v17 = vmax.f32 %v5597_v46, 0.0  ;;  %v1407_v50 = vadd.f32 %v1340_v9, %v5428_v16  ;;  %v4070_v15 = vmul.f32 %v2111_v38, %v3769_v29 }
 0x1cb   :  { %v1467_v2 = vsub.f32 %v1403_v7, %v4048_v44  ;;  %v4072_v10 = vsub.f32 %v849_v20, %v998_v43  ;;  %v1408_v36 = vadd.f32 %v1340_v9, %v5432_v11  ;;  %v4077_v23 = vmul.f32 %v2113_v41, %v3776_v32  ;;  %v1320_v20 = vpop.permute.xlu1 %1319  ;;  %v5604_v43 = vld [vmem:[#allocation74_spill] sm:$0xff]  ;;  %v5608_v32 = vld [vmem:[#allocation75_spill] sm:$0xff] }
 0x1cc   :  { %v4065_v40 = vmul.f32 %v5598_v17, %v5596_v8  ;;  %5599 = vst [vmem:[#allocation49_spill] sm:$0xff] %v4070_v15  ;;  %v1468_v63 = vsub.f32 %v1404_v33, %v4056_v24  ;;  %v4080_v3 = vmul.f32 %v2115_v58, %v3782_v30  ;;  %v4083_v17 = vmul.f32 %v2117_v4, %v3792_v12  ;;  %v5606_v33 = vld [vmem:[#allocation60_spill] sm:$0xff]  ;;  %v5637_v12 = vld [vmem:[#allocation70_spill] sm:$0xff] }
 0x1cd   :  { %5600 = vst [vmem:[#allocation2_spill] sm:$0xff] %v4072_v10  ;;  %5601 = vst [vmem:[#allocation50_spill] sm:$0xff] %v4077_v23  ;;  %2118 = vrcp.f32 %v1466_v28  ;;  %v1470_v29 = vsub.f32 %v1406_v35, %v3995_v6  ;;  %v5605_v38 = vmax.f32 %v5604_v43, 0.0  ;;  %v5607_v8 = vmax.f32 %v5606_v33, 0.0  ;;  %v5612_v43 = vld [vmem:[#allocation76_spill] sm:$0xff] }
 0x1ce   :  { %5602 = vst [vmem:[#allocation23_spill] sm:$0xff] %v4080_v3  ;;  %5603 = vst [vmem:[#allocation51_spill] sm:$0xff] %v4083_v17  ;;  %v1469_v7 = vsub.f32 %v1405_v53, %v4065_v40  ;;  %v5609_v41 = vmax.f32 %v5608_v32, 0.0  ;;  %v5611_v30 = vmax.f32 %v5610_v60, 0.0  ;;  %2120 = vrcp.f32 %v1467_v2  ;;  %v5614_v60 = vld [vmem:[#allocation62_spill] sm:$0xff]  ;;  %v5616_v32 = vld [vmem:[#allocation77_spill] sm:$0xff] }
 0x1cf   :  { %v4091_v46 = vmul.f32 %v5607_v8, %v5605_v38  ;;  %v1471_v4 = vsub.f32 %v1407_v50, %v4008_v26  ;;  %2122 = vrcp.f32 %v1468_v63  ;;  %v1472_v35 = vsub.f32 %v1408_v36, %v4021_v47 }
 0x1d0   :  { %v4097_v58 = vmul.f32 %v5611_v30, %v5609_v41  ;;  %v5613_v38 = vmax.f32 %v5612_v43, 0.0  ;;  %v5615_v33 = vmax.f32 %v5614_v60, 0.0  ;;  %2124 = vrcp.f32 %v1469_v7  ;;  %v5618_v30 = vld [vmem:[#allocation63_spill] sm:$0xff]  ;;  %v5620_v7 = vld [vmem:[#allocation93_spill] sm:$0xff] }
 0x1d1   :  { %v5617_v41 = vmax.f32 %v5616_v32, 0.0  ;;  %v5619_v50 = vmax.f32 %v5618_v30, 0.0  ;;  %v1390_v28 = vadd.f32 %v1320_v20, %v5427_v27  ;;  %v1409_v36 = vadd.f32 %v1340_v9, %v5590_v22  ;;  %v1350_v30 = vpop.permute.xlu0 %1349 }
 0x1d2   :  { %v4111_v8 = vmul.f32 %v5615_v33, %v5613_v38  ;;  %2126 = vrcp.f32 %v1470_v29  ;;  %v1391_v43 = vadd.f32 %v1320_v20, %v5428_v16  ;;  %v1392_v38 = vadd.f32 %v1320_v20, %v5432_v11 }
 0x1d3   :  { %v4119_v63 = vmul.f32 %v5619_v50, %v5617_v41  ;;  %2128 = vrcp.f32 %v1471_v4  ;;  %v5621_v60 = vmax.f32 %v5620_v7, 0.0  ;;  %v5622_v33 = vmax.f32 %v3919_v21, 0.0  ;;  %v1325_v4 = vpop.permute.xlu1 %1324 }
 0x1d4   :  { %v1393_v32 = vadd.f32 %v1320_v20, %v5590_v22  ;;  %v1454_v41 = vsub.f32 %v1390_v28, %v4091_v46  ;;  %2130 = vrcp.f32 %v1472_v35  ;;  %v1455_v9 = vsub.f32 %v1391_v43, %v4097_v58  ;;  %v5624_v35 = vld [vmem:[#allocation94_spill] sm:$0xff] }
 0x1d5   :  { %v4129_v2 = vmul.f32 %v5622_v33, %v5621_v60  ;;  %v1456_v29 = vsub.f32 %v1392_v38, %v4111_v8  ;;  %v4136_v50 = vmax.f32 %v1622_v14, %v4070_v15  ;;  %v4140_v21 = vmax.f32 %v1643_v13, %v4077_v23  ;;  %v5628_v33 = vld [vmem:[#allocation95_spill] sm:$0xff] }
 0x1d6   :  { %v1457_v7 = vsub.f32 %v1393_v32, %v4119_v63  ;;  %2132 = vrcp.f32 %v1454_v41  ;;  %v4143_v20 = vmax.f32 %v1664_v19, %v4080_v3  ;;  %v1473_v28 = vsub.f32 %v1409_v36, %v4036_v5  ;;  %v5641_v3 = vld [vmem:[#allocation71_spill] sm:$0xff]  ;;  %v5655_v5 = vld [vmem:[#allocation78_spill] sm:$0xff] }
 0x1d7   :  { %5623 = vst [vmem:[#allocation24_spill] sm:$0xff] %v4129_v2  ;;  %v5625_v60 = vmax.f32 %v5624_v35, 0.0  ;;  %v5626_v43 = vmax.f32 %v3927_v37, 0.0  ;;  %2134 = vrcp.f32 %v1455_v9  ;;  %v4153_v14 = vmax.f32 %v1685_v45, %v4083_v17  ;;  %v2119_v37 = vpop.eup %2118  ;;  %v5632_v35 = vld [vmem:[#allocation96_spill] sm:$0xff]  ;;  %v5639_v17 = vld [vmem:[#allocation3_spill] sm:$0xff] }
 0x1d8   :  { %v5629_v32 = vmax.f32 %v5628_v33, 0.0  ;;  %v5630_v13 = vmax.f32 %v3929_v61, 0.0  ;;  %v4162_v19 = vadd.f32 %v1350_v30, %v5427_v27  ;;  %v4165_v36 = vadd.f32 %v1350_v30, %v5428_v16  ;;  %v2121_v33 = vpop.eup %2120 }
 0x1d9   :  { %v4150_v38 = vmul.f32 %v5626_v43, %v5625_v60  ;;  %2136 = vrcp.f32 %v1456_v29  ;;  %v5633_v60 = vmax.f32 %v5632_v35, 0.0  ;;  %v5634_v9 = vmax.f32 %v3935_v55, 0.0 }
 0x1da   :  { %v4159_v41 = vmul.f32 %v5630_v13, %v5629_v32  ;;  %v4174_v43 = vadd.f32 %v1350_v30, %v5432_v11  ;;  %v4177_v61 = vadd.f32 %v1350_v30, %v5590_v22  ;;  %2138 = vrcp.f32 %v1457_v7  ;;  %v5635_v32 = vld [vmem:[#allocation29_spill] sm:$0xff]  ;;  %v4193_v30 = vpop.eup %2122  ;;  %v5643_v7 = vld [vmem:[#allocation30_spill] sm:$0xff] }
 0x1db   :  { %5627 = vst [vmem:[#allocation52_spill] sm:$0xff] %v4150_v38  ;;  %v4171_v45 = vmul.f32 %v5634_v9, %v5633_v60  ;;  %v5636_v13 = vmax.f32 %v5635_v32, 0.0  ;;  %v5638_v53 = vmax.f32 %v5637_v12, 0.0  ;;  %v5640_v35 = vmax.f32 %v5639_v17, 0.0  ;;  %v4209_v1 = vpop.eup %2124 }
 0x1dc   :  { %5631 = vst [vmem:[#allocation13_spill] sm:$0xff] %v4159_v41  ;;  %v5642_v55 = vmax.f32 %v5641_v3, 0.0  ;;  %v1394_v9 = vadd.f32 %v1325_v4, %v5427_v27  ;;  %v1395_v23 = vadd.f32 %v1325_v4, %v5428_v16  ;;  %v5644_v15 = vmax.f32 %v5643_v7, 0.0 }
 0x1dd   :  { %v4183_v29 = vmul.f32 %v5638_v53, %v5636_v13  ;;  %v5646_v32 = vmax.f32 %v5645_v54, 0.0  ;;  %v5648_v53 = vld [vmem:[#allocation31_spill] sm:$0xff]  ;;  %v5650_v13 = vld [vmem:[#allocation73_spill] sm:$0xff]  ;;  %v1396_v3 = vadd.f32 %v1325_v4, %v5432_v11  ;;  %v1478_v7 = vsub.f32 %v4162_v19, %v4129_v2  ;;  %v5653_v19 = vld [vmem:[#allocation82_spill] sm:$0xff] }
 0x1de   :  { %v4189_v60 = vmul.f32 %v5642_v55, %v5640_v35  ;;  %v5649_v12 = vmax.f32 %v5648_v53, 0.0  ;;  %v5651_v17 = vmax.f32 %v5650_v13, 0.0  ;;  %v1397_v35 = vadd.f32 %v1325_v4, %v5590_v22  ;;  %v1330_v55 = vpop.permute.xlu1 %1329  ;;  %v4217_v53 = vpop.eup %2126 }
 0x1df   :  { %v4199_v48 = vmul.f32 %v5646_v32, %v5644_v15  ;;  %v1479_v54 = vsub.f32 %v4165_v36, %v4150_v38  ;;  %v1458_v15 = vsub.f32 %v1394_v9, %v4183_v29  ;;  %2140 = vrcp.f32 %v1473_v28  ;;  %v5657_v9 = vld [vmem:[#allocation83_spill] sm:$0xff] }
 0x1e0   :  { %v4205_v10 = vmul.f32 %v5651_v17, %v5649_v12  ;;  %v1459_v32 = vsub.f32 %v1395_v23, %v4189_v60  ;;  %v1480_v12 = vsub.f32 %v4174_v43, %v4159_v41  ;;  %v2129_v17 = vpop.eup %2128  ;;  %v5654_v2 = vmax.f32 %v5653_v19, 0.0 }
 0x1e1   :  { %5647 = vst [vmem:[#allocation20_spill] sm:$0xff] %v4199_v48  ;;  %v1460_v4 = vsub.f32 %v1396_v3, %v4199_v48  ;;  %2142 = vrcp.f32 %v1458_v15  ;;  %v5656_v36 = vmax.f32 %v5655_v5, 0.0  ;;  %v5658_v23 = vmax.f32 %v5657_v9, 0.0  ;;  %v2131_v41 = vpop.eup %2130  ;;  %v5661_v3 = vld [vmem:[#allocation84_spill] sm:$0xff] }
 0x1e2   :  { %5652 = vst [vmem:[#allocation32_spill] sm:$0xff] %v4205_v10  ;;  %v1461_v13 = vsub.f32 %v1397_v35, %v4205_v10  ;;  %v5660_v47 = vmax.f32 %v5659_v0, 0.0  ;;  %v1398_v43 = vadd.f32 %v1330_v55, %v5427_v27  ;;  %2144 = vrcp.f32 %v1459_v32  ;;  %v5663_v10 = vld [vmem:[#allocation80_spill] sm:$0xff]  ;;  %v2133_v19 = vpop.eup %2132 }
 0x1e3   :  { %v4227_v38 = vmul.f32 %v5656_v36, %v5654_v2  ;;  %v5662_v35 = vmax.f32 %v5661_v3, 0.0  ;;  %v5664_v15 = vmax.f32 %v5663_v10, 0.0  ;;  %v1399_v5 = vadd.f32 %v1330_v55, %v5428_v16  ;;  %v5665_v36 = vld [vmem:[#allocation85_spill] sm:$0xff]  ;;  %v2135_v27 = vpop.eup %2134 }
 0x1e4   :  { %v4233_v28 = vmul.f32 %v5660_v47, %v5658_v23  ;;  %v1400_v2 = vadd.f32 %v1330_v55, %v5432_v11  ;;  %2146 = vrcp.f32 %v1460_v4  ;;  %v5666_v0 = vmax.f32 %v5665_v36, 0.0  ;;  %v5667_v47 = vld [vmem:[#allocation81_spill] sm:$0xff]  ;;  %v939_v4 = vpop.permute.xlu1 %938  ;;  %v2137_v11 = vpop.eup %2136 }
 0x1e5   :  { %v4240_v48 = vmul.f32 %v5664_v15, %v5662_v35  ;;  %v5668_v9 = vmax.f32 %v5667_v47, 0.0  ;;  %v1401_v32 = vadd.f32 %v1330_v55, %v5590_v22  ;;  %v1462_v3 = vsub.f32 %v1398_v43, %v4227_v38  ;;  %v2139_v43 = vpop.eup %2138  ;;  %v5679_v47 = vld [vmem:[#allocation40_spill] sm:$0xff] }
 0x1e6   :  { %v4253_v10 = vmul.f32 %v2133_v19, %v4091_v46  ;;  %2148 = vrcp.f32 %v1461_v13  ;;  %v1463_v35 = vsub.f32 %v1399_v5, %v4233_v28  ;;  %v4258_v36 = vmul.f32 %v2119_v37, %v3989_v51 }
 0x1e7   :  { %v4248_v23 = vmul.f32 %v5668_v9, %v5666_v0  ;;  %v1464_v15 = vsub.f32 %v1400_v2, %v4240_v48  ;;  %v4261_v0 = vmul.f32 %v2135_v27, %v4097_v58  ;;  %2150 = vrcp.f32 %v1462_v3 }
 0x1e8   :  { %5669 = vst [vmem:[#allocation89_spill] sm:$0xff] %v4253_v10  ;;  %5670 = vst [vmem:[#allocation36_spill] sm:$0xff] %v4258_v36  ;;  %v1481_v46 = vsub.f32 %v4177_v61, %v4171_v45  ;;  %v4267_v13 = vmul.f32 %v2137_v11, %v4111_v8  ;;  %v1624_v5 = vmax.f32 %v4136_v50, %v4253_v10  ;;  %2152 = vrcp.f32 %v1463_v35  ;;  %v5673_v61 = vld [vmem:[#allocation37_spill] sm:$0xff] }
 0x1e9   :  { %5671 = vst [vmem:[#allocation97_spill] sm:$0xff] %v4261_v0  ;;  %v1465_v55 = vsub.f32 %v1401_v32, %v4248_v23  ;;  %v4272_v51 = vmul.f32 %v2139_v43, %v4119_v63  ;;  %v1645_v27 = vmax.f32 %v4140_v21, %v4261_v0  ;;  %2154 = vrcp.f32 %v1464_v15  ;;  %v5683_v15 = vld [vmem:[#allocation41_spill] sm:$0xff] }
 0x1ea   :  { %v1001_v58 = vmax.f32 %v2632_v34, %v939_v4  ;;  %v4278_v37 = vmul.f32 %v2121_v33, %v4048_v44  ;;  %v1666_v11 = vmax.f32 %v4143_v20, %v4267_v13  ;;  %v1002_v8 = vmax.f32 %v2636_v59, %v939_v4  ;;  %v2141_v44 = vpop.eup %2140  ;;  %v5676_v20 = vld [vmem:[#allocation39_spill] sm:$0xff] }
 0x1eb   :  { %2156 = vrcp.f32 %v1465_v55  ;;  %v1687_v63 = vmax.f32 %v4153_v14, %v4272_v51  ;;  %v1003_v50 = vmax.f32 %v2646_v25, %v939_v4  ;;  %v5674_v21 = vmax.f32 %v5673_v61, 0.0  ;;  %v2143_v3 = vpop.eup %2142 }
 0x1ec   :  { %5672 = vst [vmem:[#allocation86_spill] sm:$0xff] %v4278_v37  ;;  %2158 = vrcp.f32 %v1478_v7  ;;  %v5675_v2 = vmax.f32 %v3668_v49, 0.0  ;;  %v1004_v33 = vmax.f32 %v2650_v52, %v939_v4  ;;  %v5677_v19 = vmax.f32 %v5676_v20, 0.0  ;;  %v2145_v43 = vpop.eup %2144  ;;  %v5698_v20 = vld [vmem:[#allocation6_spill] sm:$0xff] }
 0x1ed   :  { %2160 = vrcp.f32 %v1479_v54  ;;  %v5678_v59 = vmax.f32 %v3675_v31, 0.0  ;;  %v5680_v14 = vmax.f32 %v5679_v47, 0.0  ;;  %v5681_v9 = vmax.f32 %v3795_v62, 0.0 }
 0x1ee   :  { %v4290_v34 = vmul.f32 %v5675_v2, %v5674_v21  ;;  %v4307_v49 = vmul.f32 %v4193_v30, %v4056_v24  ;;  %2162 = vrcp.f32 %v1480_v12  ;;  %v5682_v54 = vmin.f32 %v2734_v42, %v4030_v56  ;;  %v2147_v12 = vpop.eup %2146  ;;  %v5693_v21 = vld [vmem:[#allocation45_spill] sm:$0xff] }
 0x1ef   :  { %v4297_v7 = vmul.f32 %v5678_v59, %v5677_v19  ;;  %v4303_v32 = vmul.f32 %v5681_v9, %v5680_v14  ;;  %v5684_v31 = vmax.f32 %v5683_v15, 0.0  ;;  %v5685_v4 = vmax.f32 %v3912_v57, 0.0  ;;  %v5700_v59 = vld [vmem:[#allocation32_spill] sm:$0xff] }
 0x1f0   :  { %v1065_v35 = vsub.f32 %v5682_v54, %v1001_v58  ;;  %v4320_v62 = vmul.f32 %v4209_v1, %v4065_v40  ;;  %2164 = vrcp.f32 %v1481_v46  ;;  %v4323_v24 = vmul.f32 %v2143_v3, %v4183_v29  ;;  %v1345_v29 = vpop.permute.xlu1 %1344  ;;  %v2149_v46 = vpop.eup %2148  ;;  %v5702_v54 = vld [vmem:[#allocation22_spill] sm:$0xff] }
 0x1f1   :  { %v4316_v55 = vmul.f32 %v5685_v4, %v5684_v31  ;;  %v5688_v30 = vmin.f32 %v2744_v39, %v4030_v56  ;;  %v4330_v58 = vmul.f32 %v4217_v53, %v3995_v6  ;;  %v4333_v57 = vmul.f32 %v2129_v17, %v4008_v26  ;;  %v5696_v53 = vld [vmem:[#allocation4_spill] sm:$0xff] }
 0x1f2   :  { %5686 = vst [vmem:[#allocation98_spill] sm:$0xff] %v4320_v62  ;;  %5687 = vst [vmem:[#allocation87_spill] sm:$0xff] %v4323_v24  ;;  %v4336_v61 = vmul.f32 %v2145_v43, %v4189_v60  ;;  %v5692_v1 = vmin.f32 %v2748_v18, %v4030_v56  ;;  %v4342_v39 = vmul.f32 %v2131_v41, %v5693_v21  ;;  %v2151_v60 = vpop.eup %2150  ;;  %v1129_v41 = vadd.f32 1.0, %v1065_v35  ;;  %v5704_v43 = vld [vmem:[#allocation16_spill] sm:$0xff] }
 0x1f3   :  { %v1066_v42 = vsub.f32 %v5688_v30, %v1002_v8  ;;  %5689 = vst [vmem:[#allocation99_spill] sm:$0xff] %v4330_v58  ;;  %5690 = vst [vmem:[#allocation88_spill] sm:$0xff] %v4333_v57  ;;  %v5695_v8 = vld [vmem:[#allocation20_spill] sm:$0xff]  ;;  %v1625_v6 = vmax.f32 %v1624_v5, %v4323_v24  ;;  %v5697_v26 = vmin.f32 %v5696_v53, %v4030_v56  ;;  %v2153_v14 = vpop.eup %2152 }
 0x1f4   :  { %5691 = vst [vmem:[#allocation100_spill] sm:$0xff] %v4336_v61  ;;  %v1067_v40 = vsub.f32 %v5692_v1, %v1003_v50  ;;  %5694 = vst [vmem:[#allocation35_spill] sm:$0xff] %v4342_v39  ;;  %v4345_v2 = vmul.f32 %v2147_v12, %v5695_v8  ;;  %v4352_v19 = vmul.f32 %v2141_v44, %v5698_v20 }
 0x1f5   :  { %v1068_v17 = vsub.f32 %v5697_v26, %v1004_v33  ;;  %v4355_v50 = vmul.f32 %v2149_v46, %v5700_v59  ;;  %v1646_v47 = vmax.f32 %v1645_v27, %v4336_v61  ;;  %v4360_v3 = vmul.f32 %v2151_v60, %v4227_v38  ;;  %v2155_v33 = vpop.eup %2154 }
 0x1f6   :  { %5699 = vst [vmem:[#allocation90_spill] sm:$0xff] %v4352_v19  ;;  %v1667_v9 = vmax.f32 %v1666_v11, %v4345_v2  ;;  %v1130_v5 = vadd.f32 1.0, %v1066_v42  ;;  %v1410_v56 = vadd.f32 %v1345_v29, %v5702_v54  ;;  %v4365_v44 = vmul.f32 %v2153_v14, %v4233_v28  ;;  %v2157_v27 = vpop.eup %2156 }
 0x1f7   :  { %5701 = vst [vmem:[#allocation17_spill] sm:$0xff] %v4360_v3  ;;  %v1688_v15 = vmax.f32 %v1687_v63, %v4355_v50  ;;  %v1131_v31 = vadd.f32 1.0, %v1067_v40  ;;  %v1411_v4 = vadd.f32 %v1345_v29, %v5428_v16  ;;  %v4369_v35 = vmul.f32 %v2155_v33, %v4240_v48  ;;  %v2159_v42 = vpop.eup %2158  ;;  %v5707_v33 = vld [vmem:[#allocation46_spill] sm:$0xff] }
 0x1f8   :  { %5703 = vst [vmem:[#allocation11_spill] sm:$0xff] %v4365_v44  ;;  %v1626_v11 = vmax.f32 %v1625_v6, %v4360_v3  ;;  %v1132_v38 = vadd.f32 1.0, %v1068_v17  ;;  %v1412_v30 = vadd.f32 %v1345_v29, %v5704_v43  ;;  %v4374_v12 = vmul.f32 %v2157_v27, %v4248_v23  ;;  %v2161_v40 = vpop.eup %2160 }
 0x1f9   :  { %v1647_v63 = vmax.f32 %v1646_v47, %v4365_v44  ;;  %v1193_v28 = vmax.f32 %v1129_v41, 0.0  ;;  %v1413_v1 = vadd.f32 %v1345_v29, %v5590_v22  ;;  %v1668_v48 = vmax.f32 %v1667_v9, %v4369_v35  ;;  %v2163_v6 = vpop.eup %2162  ;;  %v5762_v3 = vld [vmem:[#allocation98_spill] sm:$0xff] }
 0x1fa   :  { %v4379_v46 = vmax.f32 %v1626_v11, %v4258_v36  ;;  %v1194_v21 = vmax.f32 %v1130_v5, 0.0  ;;  %v1474_v8 = vsub.f32 %v1410_v56, %v4290_v34  ;;  %v1689_v23 = vmax.f32 %v1688_v15, %v4374_v12  ;;  %v2165_v20 = vpop.eup %2164  ;;  %v5705_v5 = vld [vmem:[#allocation67_spill] sm:$0xff] }
 0x1fb   :  { %v4384_v26 = vmax.f32 %v1647_v63, %v4278_v37  ;;  %v1195_v17 = vmax.f32 %v1131_v31, 0.0  ;;  %v1475_v60 = vsub.f32 %v1411_v4, %v4297_v7  ;;  %v4389_v29 = vmax.f32 %v1668_v48, %v4307_v49  ;;  %v5712_v48 = vld [vmem:[#allocation15_spill] sm:$0xff] }
 0x1fc   :  { %v1476_v59 = vsub.f32 %v1412_v30, %v4303_v32  ;;  %v1477_v47 = vsub.f32 %v1413_v1, %v4316_v55  ;;  %2166 = vrcp.f32 %v1474_v8  ;;  %v4394_v41 = vmax.f32 %v1689_v23, %v4320_v62  ;;  %v1360_v30 = vpop.permute.xlu0 %1359  ;;  %v5711_v1 = vld [vmem:[#allocation66_spill] sm:$0xff]  ;;  %v5765_v24 = vld [vmem:[#allocation35_spill] sm:$0xff] }
 0x1fd   :  { %2168 = vrcp.f32 %v1475_v60  ;;  %v1628_v14 = vmax.f32 %v4379_v46, %v4330_v58  ;;  %v1649_v9 = vmax.f32 %v4384_v26, %v4333_v57  ;;  %v5706_v56 = vmax.f32 %v2646_v25, %v5705_v5  ;;  %v5715_v23 = vld [vmem:[#allocation34_spill] sm:$0xff] }
 0x1fe   :  { %v5708_v15 = vmin.f32 %v2748_v18, %v5707_v33  ;;  %v5709_v4 = vmax.f32 %v2650_v52, %v5705_v5  ;;  %v5710_v27 = vmin.f32 %v5696_v53, %v5707_v33  ;;  %2170 = vrcp.f32 %v1476_v59  ;;  %v5714_v52 = vld [vmem:[#allocation33_spill] sm:$0xff]  ;;  %v5716_v5 = vld [vmem:[#allocation38_spill] sm:$0xff] }
 0x1ff   :  { %v1670_v63 = vmax.f32 %v4389_v29, %v4342_v39  ;;  %v705_v46 = vmax.f32 %v5711_v1, 0.0  ;;  %v5713_v25 = vmax.f32 %v5712_v48, 0.0  ;;  %2172 = vrcp.f32 %v1477_v47  ;;  %v5718_v29 = vld [vmem:[#allocation58_spill] sm:$0xff]  ;;  %v5720_v47 = vld [vmem:[#allocation47_spill] sm:$0xff] }
 0x200   :  { %v1063_v31 = vsub.f32 %v5708_v15, %v5706_v56  ;;  %v1064_v11 = vsub.f32 %v5710_v27, %v5709_v4  ;;  %v1691_v18 = vmax.f32 %v4394_v41, %v4352_v19  ;;  %v637_v26 = vadd.f32 1.0, %v5714_v52  ;;  %v5719_v15 = vld [vmem:[#allocation2_spill] sm:$0xff] }
 0x201   :  { %v4417_v8 = vmul.f32 %v1193_v28, %v5713_v25  ;;  %v638_v53 = vadd.f32 1.0, %v5715_v23  ;;  %v1196_v60 = vmax.f32 %v1132_v38, 0.0  ;;  %v5717_v59 = vmax.f32 %v5716_v5, 0.0  ;;  %v5721_v52 = vld [vmem:[#allocation14_spill] sm:$0xff]  ;;  %v5722_v5 = vld [vmem:[#allocation8_spill] sm:$0xff] }
 0x202   :  { %v1125_v33 = vadd.f32 1.0, %v5718_v29  ;;  %v1126_v4 = vadd.f32 1.0, %v5719_v15  ;;  %v1422_v28 = vadd.f32 %v1360_v30, %v5702_v54  ;;  %v4430_v27 = vmul.f32 %v1195_v17, %v705_v46  ;;  %v5766_v36 = vld [vmem:[#allocation90_spill] sm:$0xff] }
 0x203   :  { %v4425_v56 = vmul.f32 %v1194_v21, %v5717_v59  ;;  %v706_v1 = vmax.f32 %v5720_v47, 0.0  ;;  %v1127_v41 = vadd.f32 1.0, %v1063_v31  ;;  %v1128_v48 = vadd.f32 1.0, %v1064_v11 }
 0x204   :  { %v1423_v25 = vadd.f32 %v1360_v30, %v5428_v16  ;;  %v699_v38 = vmax.f32 %v5721_v52, 0.0  ;;  %v1424_v23 = vadd.f32 %v1360_v30, %v5704_v43  ;;  %v1486_v21 = vsub.f32 %v1422_v28, %v4417_v8  ;;  %v5723_v52 = vld [vmem:[#allocation24_spill] sm:$0xff] }
 0x205   :  { %v700_v59 = vmax.f32 %v5722_v5, 0.0  ;;  %v701_v29 = vmax.f32 %v637_v26, 0.0  ;;  %v4438_v15 = vmul.f32 %v1196_v60, %v706_v1  ;;  %v702_v46 = vmax.f32 %v638_v53, 0.0  ;;  %v5725_v5 = vld [vmem:[#allocation52_spill] sm:$0xff]  ;;  %v5727_v60 = vld [vmem:[#allocation13_spill] sm:$0xff] }
 0x206   :  { %v1487_v17 = vsub.f32 %v1423_v25, %v4425_v56  ;;  %v1189_v19 = vmax.f32 %v1125_v33, 0.0  ;;  %v1190_v47 = vmax.f32 %v1126_v4, 0.0  ;;  %v1488_v31 = vsub.f32 %v1424_v23, %v4430_v27  ;;  %v2167_v11 = vpop.eup %2166 }
 0x207   :  { %v1191_v39 = vmax.f32 %v1127_v41, 0.0  ;;  %v1192_v57 = vmax.f32 %v1128_v48, 0.0  ;;  %v4443_v58 = vmul.f32 %v2159_v42, %v5723_v52  ;;  %v1425_v28 = vadd.f32 %v1360_v30, %v5590_v22  ;;  %v2169_v62 = vpop.eup %2168  ;;  %v1355_v41 = vpop.permute.xlu1 %1354 }
 0x208   :  { %v4447_v26 = vmul.f32 %v2161_v40, %v5725_v5  ;;  %v4450_v1 = vmul.f32 %v2163_v6, %v5727_v60  ;;  %2174 = vrcp.f32 %v1486_v21  ;;  %v4453_v53 = vmul.f32 %v2167_v11, %v4290_v34  ;;  %v2171_v33 = vpop.eup %2170 }
 0x209   :  { %5724 = vst [vmem:[#allocation91_spill] sm:$0xff] %v4443_v58  ;;  %v4456_v4 = vmul.f32 %v2165_v20, %v4171_v45  ;;  %v1489_v42 = vsub.f32 %v1425_v28, %v4438_v15  ;;  %2176 = vrcp.f32 %v1487_v17  ;;  %v4460_v30 = vmul.f32 %v2169_v62, %v4297_v7  ;;  %v2173_v40 = vpop.eup %2172 }
 0x20a   :  { %5726 = vst [vmem:[#allocation12_spill] sm:$0xff] %v4447_v26  ;;  %5728 = vst [vmem:[#allocation92_spill] sm:$0xff] %v4453_v53  ;;  %2178 = vrcp.f32 %v1488_v31  ;;  %v4463_v6 = vmul.f32 %v2171_v33, %v4303_v32  ;;  %v1629_v48 = vmax.f32 %v1628_v14, %v4453_v53  ;;  %v1253_v34 = vmul.f32 %v1189_v19, %v699_v38 }
 0x20b   :  { %5729 = vst [vmem:[#allocation74_spill] sm:$0xff] %v4460_v30  ;;  %v4467_v25 = vmul.f32 %v2173_v40, %v4316_v55  ;;  %v1650_v45 = vmax.f32 %v1649_v9, %v4460_v30  ;;  %v1254_v20 = vmul.f32 %v1190_v47, %v700_v59  ;;  %v1255_v23 = vmul.f32 %v1191_v39, %v701_v29 }
 0x20c   :  { %v1671_v21 = vmax.f32 %v1670_v63, %v4463_v6  ;;  %v1256_v7 = vmul.f32 %v1192_v57, %v702_v46  ;;  %v1418_v62 = vadd.f32 %v1355_v41, %v5702_v54  ;;  %v1419_v17 = vadd.f32 %v1355_v41, %v5428_v16 }
 0x20d   :  { %v1692_v32 = vmax.f32 %v1691_v18, %v4467_v25  ;;  %v1420_v31 = vadd.f32 %v1355_v41, %v5704_v43  ;;  %v1421_v19 = vadd.f32 %v1355_v41, %v5590_v22  ;;  %v1630_v55 = vmax.f32 %v1629_v48, %v4443_v58 }
 0x20e   :  { %2180 = vrcp.f32 %v1489_v42  ;;  %v1482_v14 = vsub.f32 %v1418_v62, %v1253_v34  ;;  %v1483_v9 = vsub.f32 %v1419_v17, %v1254_v20  ;;  %v1651_v39 = vmax.f32 %v1650_v45, %v4447_v26 }
 0x20f   :  { %v1484_v38 = vsub.f32 %v1420_v31, %v1255_v23  ;;  %v1485_v63 = vsub.f32 %v1421_v19, %v1256_v7  ;;  %v1672_v57 = vmax.f32 %v1671_v21, %v4450_v1  ;;  %v1693_v54 = vmax.f32 %v1692_v32, %v4456_v4 }
 0x210   :  { %2182 = vrcp.f32 %v1482_v14  ;;  %v2196_v30 = vmov 1966171168  }
 0x211   :  { %2184 = vrcp.f32 %v1483_v9  ;;  %v1954_v53 = vunpack.c.l.s4 %v2196_v30 }
 0x212   :  { %v2175_v16 = vpop.eup %2174  ;;  %2186 = vrcp.f32 %v1484_v38 }
 0x213   :  { %v2177_v43 = vpop.eup %2176  ;;  %2188 = vrcp.f32 %v1485_v63  ;;  %v4485_v28 = vmul.f32 %v2175_v16, %v4417_v8  ;;  %v5737_v63 = vld [vmem:[#allocation7_spill] sm:$0xff] }
 0x214   :  { %v2179_v22 = vpop.eup %2178  ;;  %v4491_v33 = vmul.f32 %v2177_v43, %v4425_v56  ;;  %v1705_v43 = vadd.s32 16, %v5737_v63  ;;  %v1713_v26 = vadd.s32 80, %v5737_v63  ;;  %v1718_v61 = vadd.s32 120, %v5737_v63 }
 0x215   :  { %5732 = vst [vmem:[#allocation61_spill] sm:$0xff] %v4485_v28  ;;  %v4497_v40 = vmul.f32 %v2179_v22, %v4430_v27  ;;  %v4513_v22 = vadd.s32 24, %v5737_v63 }
 0x216   :  { %5733 = vst [vmem:[#allocation76_spill] sm:$0xff] %v4491_v33 }
 0x217   :  { %5735 = vst [vmem:[#allocation77_spill] sm:$0xff] %v4497_v40  ;;  %v4661_v58 = vcvt.s32.f32 %v4513_v22  ;;  %v1719_v22 = vcvt.s32.f32 %v5737_v63 }
 0x218   :  { %v2181_v18 = vpop.eup %2180 }
 0x219   :  { %v4502_v8 = vmul.f32 %v2181_v18, %v4438_v15 }
 0x21a   :  { %v2183_v59 = vpop.eup %2182 }
 0x21b   :  { %v2185_v29 = vpop.eup %2184  ;;  %v4480_v46 = vmul.f32 %v2183_v59, %v1253_v34  ;;  %5736 = vst [vmem:[#allocation63_spill] sm:$0xff] %v4502_v8 }
 0x21c   :  { %v2187_v47 = vpop.eup %2186  ;;  %v4482_v11 = vmul.f32 %v2185_v29, %v1254_v20  ;;  %v4516_v29 = vadd.s32 32, %v5737_v63 }
 0x21d   :  { %5730 = vst [vmem:[#allocation60_spill] sm:$0xff] %v4480_v46  ;;  %v2189_v52 = vpop.eup %2188  ;;  %v4487_v5 = vmul.f32 %v2187_v47, %v1255_v23  ;;  %v1631_v60 = vmax.f32 %v1630_v55, %v4480_v46  ;;  %v4519_v47 = vadd.s32 40, %v5737_v63  ;;  %v1715_v46 = vadd.s32 96, %v5737_v63 }
 0x21e   :  { %5731 = vst [vmem:[#allocation75_spill] sm:$0xff] %v4482_v11  ;;  %v4493_v42 = vmul.f32 %v2189_v52, %v1256_v7  ;;  %v1652_v41 = vmax.f32 %v1651_v39, %v4482_v11  ;;  %v1714_v11 = vadd.s32 88, %v5737_v63  ;;  %v1723_v44 = vcvt.s32.f32 %v4516_v29 }
 0x21f   :  { %v1632_v48 = vmax.f32 %v1631_v60, %v4485_v28  ;;  %v1673_v34 = vmax.f32 %v1672_v57, %v4487_v5  ;;  %v4509_v57 = vadd.s32 8, %v5737_v63  ;;  %v4676_v0 = vcvt.s32.f32 %v4519_v47 }
 0x220   :  { %5734 = vst [vmem:[#allocation62_spill] sm:$0xff] %v4493_v42  ;;  %v1653_v45 = vmax.f32 %v1652_v41, %v4491_v33  ;;  %v1694_v20 = vmax.f32 %v1693_v54, %v4493_v42  ;;  %v4524_v41 = vadd.s32 48, %v5737_v63 }
 0x221   :  { %v1633_v56 = vrot.slane %v1632_v48, 4  ;;  %v1674_v23 = vmax.f32 %v1673_v34, %v4497_v40  ;;  %v1720_v37 = vcvt.s32.f32 %v4509_v57 }
 0x222   :  { %v1654_v21 = vrot.slane %v1653_v45, 4  ;;  %v1695_v7 = vmax.f32 %v1694_v20, %v4502_v8 }
 0x223   :  { %v1634_v62 = vmax.f32 %v1632_v48, %v1633_v56  ;;  %v1675_v27 = vrot.slane %v1674_v23, 4  ;;  %v4527_v48 = vadd.s32 56, %v5737_v63  ;;  %v5738_v56 = vld [vmem:[#allocation19_spill] sm:$0xff] }
 0x224   :  { %v1655_v17 = vmax.f32 %v1653_v45, %v1654_v21  ;;  %v1696_v32 = vrot.slane %v1695_v7, 4  ;;  %v5740_v21 = vld [vmem:[#allocation9_spill] sm:$0xff] }
 0x225   :  { %v1635_v31 = vrot.slane %v1634_v62, 2  ;;  %v1676_v19 = vmax.f32 %v1674_v23, %v1675_v27  ;;  %v5739_v23 = vld [vmem:[#allocation21_spill] sm:$0xff]  ;;  %v5742_v27 = vld [vmem:[#allocation10_spill] sm:$0xff]  ;;  %v4690_v29 = vcvt.s32.f32 %v4527_v48  ;;  %v4706_v48 = vcvt.s32.f32 %v1713_v26 }
 0x226   :  { %v1656_v55 = vrot.slane %v1655_v17, 2  ;;  %v1697_v14 = vmax.f32 %v1695_v7, %v1696_v32  ;;  %v4548_v32 = vadd.s32 64, %v5737_v63 }
 0x227   :  { %v1636_v15 = vmax.f32 %v1634_v62, %v1635_v31  ;;  %v1677_v9 = vrot.slane %v1676_v19, 2  ;;  %v5741_v62 = vld [vmem:[#allocation5_spill] sm:$0xff]  ;;  %v4551_v31 = vadd.s32 72, %v5737_v63 }
 0x228   :  { %v1657_v39 = vmax.f32 %v1655_v17, %v1656_v55  ;;  %v1698_v38 = vrot.slane %v1697_v14, 2  ;;  %v5743_v17 = vld [vmem:[#allocation18_spill] sm:$0xff]  ;;  %v5760_v55 = vld [vmem:[#allocation23_spill] sm:$0xff] }
 0x229   :  { %v1637_v54 = vrot.slane %v1636_v15, 1  ;;  %v1678_v16 = vmax.f32 %v1676_v19, %v1677_v9  ;;  %v5744_v19 = vld [vmem:[#allocation44_spill] sm:$0xff]  ;;  %v4704_v9 = vcvt.s32.f32 %v4551_v31 }
 0x22a   :  { %v1658_v18 = vrot.slane %v1657_v39, 1  ;;  %v1699_v59 = vmax.f32 %v1697_v14, %v1698_v38  ;;  %v4557_v14 = vcvt.s32.f32 %v1705_v43  ;;  %v5749_v38 = vld [vmem:[#allocation65_spill] sm:$0xff]  ;;  %v5752_v43 = vld [vmem:[#allocation28_spill] sm:$0xff] }
 0x22b   :  { %v4521_v52 = vmax.f32 %v1636_v15, %v1637_v54  ;;  %v1679_v60 = vrot.slane %v1678_v16, 1  ;;  %v5746_v15 = vld [vmem:[#allocation68_spill] sm:$0xff]  ;;  %v5757_v54 = vld [vmem:[#allocation26_spill] sm:$0xff] }
 0x22c   :  { %v4529_v34 = vmax.f32 %v1657_v39, %v1658_v18  ;;  %v1700_v45 = vrot.slane %v1699_v59, 1  ;;  %v5748_v39 = vld [vmem:[#allocation54_spill] sm:$0xff]  ;;  %v5753_v18 = vld [vmem:[#allocation59_spill] sm:$0xff] }
 0x22d   :  { %v4531_v20 = vmax.f32 %v1678_v16, %v1679_v60  ;;  %v5755_v60 = vld [vmem:[#allocation25_spill] sm:$0xff]  ;;  %vm1795_vm2 = vcmp.eq.f32.partialorder %v4485_v28, %v4521_v52  ;;  %v1716_v28 = vadd.s32 104, %v5737_v63 }
 0x22e   :  { %v4539_v7 = vmax.f32 %v1699_v59, %v1700_v45  ;;  %v5756_v45 = vld [vmem:[#allocation56_spill] sm:$0xff]  ;;  %v5758_v16 = vld [vmem:[#allocation49_spill] sm:$0xff]  ;;  %v5761_v59 = vld [vmem:[#allocation51_spill] sm:$0xff]  ;;  %vm1796_vm0 = vcmp.eq.f32.partialorder %v4491_v33, %v4529_v34  ;;  %v1717_v33 = vadd.s32 112, %v5737_v63 }
 0x22f   :  { %vm1745_vm6 = vcmp.eq.f32.partialorder %v5744_v19, %v4531_v20  ;;  %vm1749_vm10 = vcmp.eq.f32.partialorder %v5748_v39, %v4531_v20  ;;  %vm1753_vm14 = vcmp.eq.f32.partialorder %v5752_v43, %v4531_v20  ;;  %vm1757_vm5 = vcmp.eq.f32.partialorder %v5756_v45, %v4531_v20 }
 0x230   :  { %vm1746_vm8 = vcmp.eq.f32.partialorder %v5746_v15, %v4539_v7  ;;  %vm1750_vm11 = vcmp.eq.f32.partialorder %v5749_v38, %v4539_v7  ;;  %vm1754_vm15 = vcmp.eq.f32.partialorder %v5753_v18, %v4539_v7  ;;  %vm1758_vm12 = vcmp.eq.f32.partialorder %v5757_v54, %v4539_v7  ;;  %v5768_v18 = vld [vmem:[#allocation64_spill] sm:$0xff]  ;;  %v5771_v54 = vld [vmem:[#allocation43_spill] sm:$0xff] }
 0x231   :  { %vm1761_vm4 = vcmp.eq.f32.partialorder %v5760_v55, %v4531_v20  ;;  %vm1790_vm9 = vcmp.eq.f32.partialorder %v4456_v4, %v4539_v7  ;;  %vm1793_vm3 = vcmp.eq.f32.partialorder %v4487_v5, %v4531_v20  ;;  %vm1794_vm13 = vcmp.eq.f32.partialorder %v4493_v42, %v4539_v7 }
 0x232   :  { %vm1797_vm1 = vcmp.eq.f32.partialorder %v4497_v40, %v4531_v20  ;;  %vm1798_vm7 = vcmp.eq.f32.partialorder %v4502_v8, %v4539_v7  ;;  %v1809_v10 = vsel %vm1745_vm6, %v4557_v14, 128.0  ;;  %v1810_v30 = vsel %vm1746_vm8, %v4557_v14, 128.0 }
 0x233   :  { %v4687_v8 = vcvt.s32.f32 %v4524_v41  ;;  %v1813_v57 = vsel %vm1749_vm10, %v4661_v58, 128.0  ;;  %v1814_v47 = vsel %vm1750_vm11, %v4661_v58, 128.0  ;;  %v4701_v19 = vcvt.s32.f32 %v4548_v32 }
 0x234   :  { %v1955_v15 = vunpack.c.0.s8 %v1954_v53  ;;  %v1906_v40 = vmin.f32 %v1813_v57, %v1809_v10  ;;  %v1927_v41 = vmin.f32 %v1814_v47, %v1810_v30  ;;  %v1817_v39 = vsel %vm1753_vm14, %v1723_v44, 128.0 }
 0x235   :  { %v1818_v38 = vsel %vm1754_vm15, %v1723_v44, 128.0  ;;  %v4714_v42 = vcvt.s32.f32 %v1714_v11  ;;  %v4716_v32 = vcvt.s32.f32 %v1715_v46  ;;  %v4718_v30 = vcvt.s32.f32 %v1716_v28 }
 0x236   :  { %v1907_v53 = vmin.f32 %v1906_v40, %v1817_v39  ;;  %v1928_v10 = vmin.f32 %v1927_v41, %v1818_v38  ;;  %v4720_v31 = vcvt.s32.f32 %v1717_v33  ;;  %v1821_v26 = vsel %vm1757_vm5, %v4676_v0, 128.0  ;;  %v5767_v33 = vld [vmem:[#allocation55_spill] sm:$0xff] }
 0x237   :  { %v1822_v43 = vsel %vm1758_vm12, %v4676_v0, 128.0  ;;  %v4730_v11 = vcvt.s32.f32 %v1718_v61  ;;  %v4733_v46 = vsub.s32 %v1955_v15, %v5737_v63  ;;  %vm1737_vm6 = vcmp.eq.f32.partialorder %v5767_v33, %v4531_v20  ;;  %v5770_v63 = vld [vmem:[#allocation42_spill] sm:$0xff] }
 0x238   :  { %v1908_v40 = vmin.f32 %v1907_v53, %v1821_v26  ;;  %v1929_v28 = vmin.f32 %v1928_v10, %v1822_v43  ;;  %vm1738_vm8 = vcmp.eq.f32.partialorder %v5768_v18, %v4539_v7  ;;  %v1825_v45 = vsel %vm1761_vm4, %v4687_v8, 128.0  ;;  %v5788_v18 = vld [vmem:[#allocation57_spill] sm:$0xff] }
 0x239   :  { %vm5769_vm5 = vcmp.eq.f32.partialorder %v5761_v59, %v4539_v7  ;;  %vm1741_vm10 = vcmp.eq.f32.partialorder %v5770_v63, %v4531_v20  ;;  %vm1742_vm11 = vcmp.eq.f32.partialorder %v5771_v54, %v4539_v7  ;;  %vm5772_vm12 = vcmp.eq.f32.partialorder %v5738_v56, %v4521_v52 }
 0x23a   :  { %v1826_v61 = vsel %vm5769_vm5, %v4687_v8, 128.0  ;;  %v1909_v57 = vmin.f32 %v1908_v40, %v1825_v45  ;;  %v1799_v15 = vsel %vm5772_vm12, %v1719_v22, 128.0  ;;  %vm5773_vm4 = vcmp.eq.f32.partialorder %v5741_v62, %v4529_v34  ;;  %v5784_v40 = vld [vmem:[#allocation53_spill] sm:$0xff]  ;;  %v5790_v45 = vld [vmem:[#allocation27_spill] sm:$0xff] }
 0x23b   :  { %v1930_v47 = vmin.f32 %v1929_v28, %v1826_v61  ;;  %v1800_v55 = vsel %vm5773_vm4, %v1719_v22, 128.0  ;;  %vm5774_vm14 = vcmp.eq.f32.partialorder %v4267_v13, %v4531_v20  ;;  %vm5775_vm15 = vcmp.eq.f32.partialorder %v4272_v51, %v4539_v7  ;;  %v5786_v28 = vld [vmem:[#allocation69_spill] sm:$0xff] }
 0x23c   :  { %v1829_v59 = vsel %vm5774_vm14, %v4690_v29, 128.0  ;;  %v1830_v41 = vsel %vm5775_vm15, %v4690_v29, 128.0  ;;  %v4765_v39 = vsel %vm1737_vm6, %v1719_v22, 128.0  ;;  %v4767_v38 = vsel %vm1738_vm8, %v1719_v22, 128.0 }
 0x23d   :  { %v1910_v56 = vmin.f32 %v1909_v57, %v1829_v59  ;;  %v1931_v53 = vmin.f32 %v1930_v47, %v1830_v41  ;;  %vm5776_vm5 = vcmp.eq.f32.partialorder %v5739_v23, %v4521_v52  ;;  %vm5777_vm12 = vcmp.eq.f32.partialorder %v5742_v27, %v4529_v34  ;;  %v5797_v57 = vld [vmem:[#allocation48_spill] sm:$0xff] }
 0x23e   :  { %v1803_v62 = vsel %vm5776_vm5, %v1720_v37, 128.0  ;;  %v1804_v13 = vsel %vm5777_vm12, %v1720_v37, 128.0  ;;  %vm5778_vm4 = vcmp.eq.f32.partialorder %v4345_v2, %v4531_v20  ;;  %vm5779_vm6 = vcmp.eq.f32.partialorder %v4355_v50, %v4539_v7 }
 0x23f   :  { %v1833_v51 = vsel %vm5778_vm4, %v4701_v19, 128.0  ;;  %v1834_v22 = vsel %vm5779_vm6, %v4701_v19, 128.0  ;;  %v4786_v10 = vsel %vm1741_vm10, %v1720_v37, 128.0  ;;  %v4791_v23 = vsel %vm1742_vm11, %v1720_v37, 128.0 }
 0x240   :  { %v1911_v27 = vmin.f32 %v1910_v56, %v1833_v51  ;;  %v1932_v26 = vmin.f32 %v1931_v53, %v1834_v22  ;;  %vm5780_vm8 = vcmp.eq.f32.partialorder %v5740_v21, %v4521_v52  ;;  %vm5781_vm14 = vcmp.eq.f32.partialorder %v5743_v17, %v4529_v34 }
 0x241   :  { %v1807_v2 = vsel %vm5780_vm8, %v4557_v14, 128.0  ;;  %v1808_v50 = vsel %vm5781_vm14, %v4557_v14, 128.0  ;;  %vm5782_vm10 = vcmp.eq.f32.partialorder %v4369_v35, %v4531_v20  ;;  %vm5783_vm11 = vcmp.eq.f32.partialorder %v4374_v12, %v4539_v7 }
 0x242   :  { %v1837_v43 = vsel %vm5782_vm10, %v4704_v9, 128.0  ;;  %v1838_v37 = vsel %vm5783_vm11, %v4704_v9, 128.0  ;;  %vm5785_vm15 = vcmp.eq.f32.partialorder %v5784_v40, %v4521_v52  ;;  %vm5787_vm5 = vcmp.eq.f32.partialorder %v5786_v28, %v4529_v34 }
 0x243   :  { %v1811_v21 = vsel %vm5785_vm15, %v4661_v58, 128.0  ;;  %v1812_v17 = vsel %vm5787_vm5, %v4661_v58, 128.0  ;;  %v1912_v14 = vmin.f32 %v1911_v27, %v1837_v43  ;;  %v1933_v33 = vmin.f32 %v1932_v26, %v1838_v37 }
 0x244   :  { %vm5789_vm12 = vcmp.eq.f32.partialorder %v5788_v18, %v4521_v52  ;;  %vm5791_vm4 = vcmp.eq.f32.partialorder %v5790_v45, %v4529_v34  ;;  %vm5792_vm6 = vcmp.eq.f32.partialorder %v4307_v49, %v4531_v20  ;;  %vm5793_vm8 = vcmp.eq.f32.partialorder %v5762_v3, %v4539_v7 }
 0x245   :  { %v1815_v35 = vsel %vm5789_vm12, %v1723_v44, 128.0  ;;  %v1816_v12 = vsel %vm5791_vm4, %v1723_v44, 128.0  ;;  %v1841_v61 = vsel %vm5792_vm6, %v4706_v48, 128.0  ;;  %v1842_v58 = vsel %vm5793_vm8, %v4706_v48, 128.0 }
 0x246   :  { %v5794_v63 = vlaneseq  ;;  %vm5798_vm10 = vcmp.eq.f32.partialorder %v5797_v57, %v4521_v52  ;;  %vm5799_vm11 = vcmp.eq.f32.partialorder %v5755_v60, %v4529_v34  ;;  %v1913_v47 = vmin.f32 %v1912_v14, %v1841_v61  ;;  %v5833_v61 = vld [vmem:[#allocation74_spill] sm:$0xff] }
 0x247   :  { %v1819_v44 = vsel %vm5798_vm10, %v4676_v0, 128.0  ;;  %v1820_v49 = vsel %vm5799_vm11, %v4676_v0, 128.0  ;;  %v1934_v59 = vmin.f32 %v1933_v33, %v1842_v58  ;;  %vm5800_vm15 = vcmp.eq.f32.partialorder %v5765_v24, %v4531_v20  ;;  %v5807_v33 = vld [vmem:[#allocation50_spill] sm:$0xff] }
 0x248   :  { %vm4832_vm14 = vcmp.lt.s32.totalorder %v5794_v63, 512  ;;  %v1845_v3 = vsel %vm5800_vm15, %v4714_v42, 128.0  ;;  %vm5801_vm5 = vcmp.eq.f32.partialorder %v5766_v36, %v4539_v7  ;;  %v1863_v56 = vmin.f32 %v1799_v15, %v1803_v62 }
 0x249   :  { %v1846_v41 = vsel %vm5801_vm5, %v4714_v42, 128.0  ;;  %v1884_v53 = vmin.f32 %v1800_v55, %v1804_v13  ;;  %v1914_v51 = vmin.f32 %v1913_v47, %v1845_v3  ;;  %vm5802_vm12 = vcmp.eq.f32.partialorder %v4463_v6, %v4531_v20 }
 0x24a   :  { %v1935_v22 = vmin.f32 %v1934_v59, %v1846_v41  ;;  %v1849_v0 = vsel %vm5802_vm12, %v4716_v32, 128.0  ;;  %vm5803_vm4 = vcmp.eq.f32.partialorder %v4467_v25, %v4539_v7  ;;  %v1864_v60 = vmin.f32 %v1863_v56, %v1807_v2 }
 0x24b   :  { %v1850_v24 = vsel %vm5803_vm4, %v4716_v32, 128.0  ;;  %v1885_v27 = vmin.f32 %v1884_v53, %v1808_v50  ;;  %v1951_v36 = vcombine.low %v4521_v52, %v4529_v34  ;;  %v1952_v15 = vcombine.low %v4531_v20, %v4539_v7  ;;  %v5811_v7 = vld [vmem:[#allocation89_spill] sm:$0xff]  ;;  %v5815_v53 = vld [vmem:[#allocation87_spill] sm:$0xff] }
 0x24c   :  { %v1915_v55 = vmin.f32 %v1914_v51, %v1849_v0  ;;  %v1936_v62 = vmin.f32 %v1935_v22, %v1850_v24  ;;  %vm5804_vm6 = vcmp.eq.f32.partialorder %v4450_v1, %v4531_v20  ;;  %v1854_v25 = vsel %vm1790_vm9, %v4718_v30, 128.0  ;;  %v5817_v22 = vld [vmem:[#allocation100_spill] sm:$0xff] }
 0x24d   :  { %v1853_v6 = vsel %vm5804_vm6, %v4718_v30, 128.0  ;;  %v1865_v13 = vmin.f32 %v1864_v60, %v1811_v21  ;;  %v1886_v26 = vmin.f32 %v1885_v27, %v1812_v17  ;;  %v1959_v2 = vrot.slane %v1951_v36, %v4733_v46 }
 0x24e   :  { %v1966_v50 = vrot.slane %v1952_v15, %v4733_v46  ;;  %vm5805_vm8 = vcmp.eq.f32.partialorder %v5758_v16, %v4521_v52  ;;  %v1916_v37 = vmin.f32 %v1915_v55, %v1853_v6  ;;  %v1937_v40 = vmin.f32 %v1936_v62, %v1854_v25  ;;  %v5821_v55 = vld [vmem:[#allocation11_spill] sm:$0xff] }
 0x24f   :  { %v1823_v43 = vsel %vm5805_vm8, %v4687_v8, 128.0  ;;  %v1857_v1 = vsel %vm1793_vm3, %v4720_v31, 128.0  ;;  %v1858_v21 = vsel %vm1794_vm13, %v4720_v31, 128.0  ;;  %v1866_v28 = vmin.f32 %v1865_v13, %v1815_v35 }
 0x250   :  { %v1887_v17 = vmin.f32 %v1886_v26, %v1816_v12  ;;  %v1967_v14 = vcombine.low %v1959_v2, %v1966_v50  ;;  %vm5808_vm9 = vcmp.eq.f32.partialorder %v5807_v33, %v4529_v34  ;;  %v1917_v18 = vmin.f32 %v1916_v37, %v1857_v1  ;;  %v5825_v50 = vld [vmem:[#allocation86_spill] sm:$0xff] }
 0x251   :  { %v1824_v16 = vsel %vm5808_vm9, %v4687_v8, 128.0  ;;  %v1938_v45 = vmin.f32 %v1937_v40, %v1858_v21  ;;  %v1861_v5 = vsel %vm1797_vm1, %v4730_v11, 128.0  ;;  %v1862_v63 = vsel %vm1798_vm7, %v4730_v11, 128.0 }
 0x252   :  { %v1867_v35 = vmin.f32 %v1866_v28, %v1819_v44  ;;  %v1888_v12 = vmin.f32 %v1887_v17, %v1820_v49  ;;  %v1974_v57 = vrot.slane %v1967_v14, %v4733_v46  ;;  %v1918_v47 = vmin.f32 %v1917_v18, %v1861_v5  ;;  %v5813_v49 = vld [vmem:[#allocation97_spill] sm:$0xff]  ;;  %v5829_v28 = vld [vmem:[#allocation88_spill] sm:$0xff] }
 0x253   :  { %v1939_v59 = vmin.f32 %v1938_v45, %v1862_v63  ;;  %v1905_v8 = vmin.f32 %v4765_v39, %v4786_v10  ;;  %v1926_v3 = vmin.f32 %v4767_v38, %v4791_v23  ;;  %vm5812_vm1 = vcmp.eq.f32.partialorder %v5811_v7, %v4521_v52 }
 0x254   :  { %v1868_v41 = vmin.f32 %v1867_v35, %v1823_v43  ;;  %v1889_v20 = vmin.f32 %v1888_v12, %v1824_v16  ;;  %1980 = vst.msk [vmem:[%s4990_s2] sm:$0xf] %vm4832_vm14, %v1974_v57  ;;  %v1827_v44 = vsel %vm5812_vm1, %v4690_v29, 128.0  ;;  %vm5814_vm3 = vcmp.eq.f32.partialorder %v5813_v49, %v4529_v34 }
 0x255   :  { %v1828_v39 = vsel %vm5814_vm3, %v4690_v29, 128.0  ;;  %v1919_v10 = vmin.f32 %v1918_v47, %v1905_v8  ;;  %v1940_v38 = vmin.f32 %v1939_v59, %v1926_v3  ;;  %vm5816_vm7 = vcmp.eq.f32.partialorder %v5815_v53, %v4521_v52  ;;  %v5819_v29 = vld [vmem:[#allocation17_spill] sm:$0xff]  ;;  %v5837_v47 = vld [vmem:[#allocation12_spill] sm:$0xff] }
 0x256   :  { %v1869_v23 = vmin.f32 %v1868_v41, %v1827_v44  ;;  %v1890_v56 = vmin.f32 %v1889_v20, %v1828_v39  ;;  %v1831_v51 = vsel %vm5816_vm7, %v4701_v19, 128.0  ;;  %vm5818_vm13 = vcmp.eq.f32.partialorder %v5817_v22, %v4529_v34  ;;  %v5841_v44 = vld [vmem:[#allocation75_spill] sm:$0xff] }
 0x257   :  { %v1832_v0 = vsel %vm5818_vm13, %v4701_v19, 128.0  ;;  %v1920_v24 = vrot.slane %v1919_v10, 4  ;;  %v1941_v60 = vrot.slane %v1940_v38, 4  ;;  %vm5820_vm10 = vcmp.eq.f32.partialorder %v5819_v29, %v4521_v52  ;;  %v5823_v19 = vld [vmem:[#allocation36_spill] sm:$0xff] }
 0x258   :  { %v1870_v27 = vmin.f32 %v1869_v23, %v1831_v51  ;;  %v1891_v36 = vmin.f32 %v1890_v56, %v1832_v0  ;;  %v1835_v15 = vsel %vm5820_vm10, %v4704_v9, 128.0  ;;  %vm5822_vm11 = vcmp.eq.f32.partialorder %v5821_v55, %v4529_v34 }
 0x259   :  { %v1836_v62 = vsel %vm5822_vm11, %v4704_v9, 128.0  ;;  %v1921_v6 = vmin.f32 %v1919_v10, %v1920_v24  ;;  %v1942_v25 = vmin.f32 %v1940_v38, %v1941_v60  ;;  %vm5824_vm15 = vcmp.eq.f32.partialorder %v5823_v19, %v4521_v52  ;;  %v5827_v9 = vld [vmem:[#allocation99_spill] sm:$0xff] }
 0x25a   :  { %v1871_v13 = vmin.f32 %v1870_v27, %v1835_v15  ;;  %v1892_v26 = vmin.f32 %v1891_v36, %v1836_v62  ;;  %v1839_v2 = vsel %vm5824_vm15, %v4706_v48, 128.0  ;;  %vm5826_vm5 = vcmp.eq.f32.partialorder %v5825_v50, %v4529_v34 }
 0x25b   :  { %v1840_v43 = vsel %vm5826_vm5, %v4706_v48, 128.0  ;;  %v1922_v37 = vrot.slane %v1921_v6, 2  ;;  %v1943_v40 = vrot.slane %v1942_v25, 2  ;;  %vm5828_vm12 = vcmp.eq.f32.partialorder %v5827_v9, %v4521_v52  ;;  %v5831_v48 = vld [vmem:[#allocation92_spill] sm:$0xff] }
 0x25c   :  { %v1872_v1 = vmin.f32 %v1871_v13, %v1839_v2  ;;  %v1893_v4 = vmin.f32 %v1892_v26, %v1840_v43  ;;  %v1843_v21 = vsel %vm5828_vm12, %v4714_v42, 128.0  ;;  %vm5830_vm4 = vcmp.eq.f32.partialorder %v5829_v28, %v4529_v34 }
 0x25d   :  { %v1844_v17 = vsel %vm5830_vm4, %v4714_v42, 128.0  ;;  %v1923_v14 = vmin.f32 %v1921_v6, %v1922_v37  ;;  %v1944_v33 = vmin.f32 %v1942_v25, %v1943_v40  ;;  %vm5832_vm6 = vcmp.eq.f32.partialorder %v5831_v48, %v4521_v52  ;;  %v5835_v42 = vld [vmem:[#allocation91_spill] sm:$0xff] }
 0x25e   :  { %v1873_v16 = vmin.f32 %v1872_v1, %v1843_v21  ;;  %v1894_v18 = vmin.f32 %v1893_v4, %v1844_v17  ;;  %v1847_v45 = vsel %vm5832_vm6, %v4716_v32, 128.0  ;;  %vm5834_vm8 = vcmp.eq.f32.partialorder %v5833_v61, %v4529_v34 }
 0x25f   :  { %v1848_v5 = vsel %vm5834_vm8, %v4716_v32, 128.0  ;;  %v1924_v58 = vrot.slane %v1923_v14, 1  ;;  %v1945_v63 = vrot.slane %v1944_v33, 1  ;;  %vm5836_vm9 = vcmp.eq.f32.partialorder %v5835_v42, %v4521_v52  ;;  %v5839_v32 = vld [vmem:[#allocation60_spill] sm:$0xff] }
 0x260   :  { %v1874_v35 = vmin.f32 %v1873_v16, %v1847_v45  ;;  %v1895_v12 = vmin.f32 %v1894_v18, %v1848_v5  ;;  %v1851_v57 = vsel %vm5836_vm9, %v4718_v30, 128.0  ;;  %vm5838_vm1 = vcmp.eq.f32.partialorder %v5837_v47, %v4529_v34 }
 0x261   :  { %v1852_v59 = vsel %vm5838_vm1, %v4718_v30, 128.0  ;;  %v1925_v8 = vmin.f32 %v1923_v14, %v1924_v58  ;;  %v1946_v3 = vmin.f32 %v1944_v33, %v1945_v63  ;;  %vm5840_vm3 = vcmp.eq.f32.partialorder %v5839_v32, %v4521_v52 }
 0x262   :  { %v1875_v41 = vmin.f32 %v1874_v35, %v1851_v57  ;;  %v1896_v20 = vmin.f32 %v1895_v12, %v1852_v59  ;;  %v1855_v7 = vsel %vm5840_vm3, %v4720_v31, 128.0  ;;  %vm5842_vm7 = vcmp.eq.f32.partialorder %v5841_v44, %v4529_v34 }
 0x263   :  { %v1856_v49 = vsel %vm5842_vm7, %v4720_v31, 128.0  ;;  %v2025_v39 = vtrunc.f32 %v1925_v8  ;;  %v2027_v10 = vtrunc.f32 %v1946_v3  ;;  %v1859_v56 = vsel %vm1795_vm2, %v4730_v11, 128.0 }
 0x264   :  { %v1876_v38 = vmin.f32 %v1875_v41, %v1855_v7  ;;  %v1897_v23 = vmin.f32 %v1896_v20, %v1856_v49  ;;  %v1860_v51 = vsel %vm1796_vm0, %v4730_v11, 128.0 }
 0x265   :  { %v2026_v22 = vcvt.f32.s32 %v2025_v39  ;;  %v2028_v0 = vcvt.f32.s32 %v2027_v10 }
 0x266   :  { %v1877_v24 = vmin.f32 %v1876_v38, %v1859_v56  ;;  %v1898_v60 = vmin.f32 %v1897_v23, %v1860_v51 }
 0x267   :  { %v1986_v27 = vcombine.low %v2026_v22, %v2028_v0 }
 0x268   :  { %v1878_v31 = vrot.slane %v1877_v24, 4  ;;  %v1899_v36 = vrot.slane %v1898_v60, 4 }
 0x269   :  { %v2000_v40 = vrot.slane %v1986_v27, %v4733_v46 }
 0x26a   :  { %v1879_v29 = vmin.f32 %v1877_v24, %v1878_v31  ;;  %v1900_v15 = vmin.f32 %v1898_v60, %v1899_v36 }
 0x26c   :  { %v1880_v55 = vrot.slane %v1879_v29, 2  ;;  %v1901_v62 = vrot.slane %v1900_v15, 2 }
 0x26e   :  { %v1881_v6 = vmin.f32 %v1879_v29, %v1880_v55  ;;  %v1902_v25 = vmin.f32 %v1900_v15, %v1901_v62 }
 0x270   :  { %v1882_v52 = vrot.slane %v1881_v6, 1  ;;  %v1903_v13 = vrot.slane %v1902_v25, 1 }
 0x272   :  { %v1883_v26 = vmin.f32 %v1881_v6, %v1882_v52  ;;  %v1904_v19 = vmin.f32 %v1902_v25, %v1903_v13 }
 0x274   :  { %v2021_v2 = vtrunc.f32 %v1883_v26  ;;  %v2023_v34 = vtrunc.f32 %v1904_v19 }
 0x276   :  { %v2022_v11 = vcvt.f32.s32 %v2021_v2  ;;  %v2024_v50 = vcvt.f32.s32 %v2023_v34 }
 0x278   :  { %v1985_v43 = vcombine.low %v2022_v11, %v2024_v50 }
 0x27a   :  { %v1993_v37 = vrot.slane %v1985_v43, %v4733_v46 }
 0x27c   :  { %v2001_v1 = vcombine.low %v1993_v37, %v2000_v40 }
 0x27e   :  { %v2008_v4 = vrot.slane %v2001_v1, %v4733_v46 }
 0x280   :  { %2009 = vst.msk [vmem:[%s4991_s3] sm:$0xf] %vm4832_vm14, %v2008_v4 }

// kernel: _proposal_mask_target_device.3
= control target key start
LH: loop header
LB: loop body
LE: loop exit
PB: predicated region body
PF: predicated region fallthrough
CT: control target
= control target key end

     0   :  { %v410_v1 = vmov 0   ;;  %s411_s20 = smov 2   ;;  %v412_v3 = vmov 2   ;;  %s413_s23 = smov 126   ;;  %v414_v15 = vmov 1   ;;  %v415_v17 = vmov 3   ;;  %s732_s0 = inlined_call_operand.vmem [shape: f32[8,4], index: 0, kind: input, shape index: {}]   ;;  %s733_s1 = inlined_call_operand.vmem [shape: f32[8,4], index: 1, kind: input, shape index: {}]   ;;  %s734_s2 = inlined_call_operand.vmem [shape: f32[8,1], index: 2, kind: input, shape index: {}]   ;;  %s735_s3 = inlined_call_operand.vmem [shape: f32[8,784], index: 3, kind: input, shape index: {}]   ;;  %s736_s4 = inlined_call_operand.vmem [shape: f32[8,128], index: 4, kind: output, shape index: {0}]   ;;  %s737_s5 = inlined_call_operand.vmem [shape: f32[8,784], index: 5, kind: output, shape index: {1}]  }
   0x1   :  { %v19_v0 = vld [vmem:[%s732_s0] sm:$0xff]  ;;  %391 = vset.pattern.permute.xlu1 %v410_v1  ;;  %394 = vset.pattern.permute.xlu0 %v412_v3  ;;  %v58_v36 = vlaneseq }
   0x2   :  { %22 = vrot.lane.b32.xlu0 %v19_v0, %s411_s20  ;;  %v20_v2 = vld [vmem:[%s733_s1] sm:$0xff] }
   0x3   :  { %v101_v30 = vld [vmem:[%s734_s2] sm:$0xff]  ;;  %v107_v38 = vshrl.u32 %v58_v36, 7 }
   0x4   :  { %v375_v34 = vld [vmem:[%s735_s3 + $0x2] ss:$8 sm:$0xf]  ;;  %v373_v42 = vld [vmem:[%s735_s3 + $0x1] ss:$8 sm:$0xf] }
   0x5   :  { %v376_v35 = vld [vmem:[%s735_s3 + $0x2] ss:$8 sm:$0x70]  ;;  %v474_v41 = vsub.s32 0, %v107_v38  ;;  %v479_v43 = vsub.s32 1, %v107_v38  ;;  %v485_v46 = vsub.s32 2, %v107_v38 }
   0x6   :  { %34 = vrot.lane.b32.xlu0 %v20_v2, %s411_s20  ;;  %v100_v37 = vor.u32 %v376_v35, %v375_v34  ;;  %v374_v44 = vld [vmem:[%s735_s3 + $0x1] ss:$8 sm:$0x70]  ;;  %v488_v49 = vsub.s32 3, %v107_v38  ;;  %v491_v51 = vsub.s32 4, %v107_v38  ;;  %v494_v54 = vsub.s32 5, %v107_v38 }
   0x7   :  { %v96_v52 = vor.u32 %v374_v44, %v373_v42  ;;  %v497_v56 = vsub.s32 6, %v107_v38  ;;  %v90_v34 = vld [vmem:[%s735_s3] ss:$8 sm:$0xf] }
   0x8   :  { %v103_v40 = vadd.f32 0.5, %v100_v37  ;;  %v91_v35 = vld [vmem:[%s735_s3] ss:$8 sm:$0x70] }
   0xa   :  { %v109_v45 = vrot.slane %v103_v40, %v474_v41  ;;  %v113_v48 = vrot.slane %v103_v40, %v479_v43  ;;  %v117_v50 = vrot.slane %v103_v40, %v485_v46  ;;  %v121_v53 = vrot.slane %v103_v40, %v488_v49 }
   0xb   :  { %v125_v55 = vrot.slane %v103_v40, %v491_v51  ;;  %v129_v58 = vrot.slane %v103_v40, %v494_v54  ;;  %v133_v61 = vrot.slane %v103_v40, %v497_v56 }
  0x74   :  { %v23_v4 = vpop.permute.xlu0 %22 }
  0x75   :  { %v25_v5 = vsub.f32 %v19_v0, %v23_v4 }
  0x77   :  { %v26_v6 = vadd.f32 1.0, %v25_v5  ;;  %v102_v12 = vmax.f32 %v25_v5, 1.0 }
  0x78   :  { %v35_v7 = vpop.permute.xlu0 %34 }
  0x79   :  { %404 = vrcp.f32 %v26_v6  ;;  %v37_v8 = vsub.f32 %v20_v2, %v35_v7  ;;  %48 = vrot.lane.b32.xlu1 %v26_v6, %s413_s23  ;;  %v27_v10 = vmul.f32 0.5, %v26_v6  ;;  %v104_v16 = vmul.f32 0.071428575, %v102_v12 }
  0x7b   :  { %v38_v9 = vadd.f32 1.0, %v37_v8 }
  0x7d   :  { %v39_v11 = vmul.f32 0.5, %v38_v9  ;;  %29 = vrot.lane.b32.xlu1 %v27_v10, %s413_s23 }
  0x7f   :  { %41 = vrot.lane.b32.xlu0 %v39_v11, %s413_s23 }
  0x81   :  { %154 = vperm.xlu1 %391, %v19_v0  }
  0x83   :  { %v405_v13 = vpop.eup %404  ;;  %235 = vperm.xlu0 %394, %v20_v2  }
  0x84   :  { %v54_v14 = vmul.f32 %v405_v13, %v38_v9 }
  0x85   :  { %392 = vset.pattern.permute.xlu1 %v414_v15 }
  0x86   :  { %406 = vlog2.f32 %v54_v14  ;;  %213 = vperm.xlu1 %392, %v19_v0  }
  0x87   :  { %397 = vset.pattern.permute.xlu0 %v415_v17 }
  0x88   :  { %202 = vperm.xlu0 %397, %v104_v16  }
  0x8a   :  { %393 = vset.pattern.permute.xlu1 %v410_v1 }
  0x8b   :  { %224 = vperm.xlu1 %393, %v20_v2  }
  0x8c   :  { %399 = vset.pattern.permute.xlu0 %v414_v15 }
  0x8f   :  { %395 = vset.pattern.permute.xlu1 %v414_v15 }
  0x90   :  { %v407_v18 = vpop.eup %406  ;;  %253 = vperm.xlu1 %395, %v20_v2  }
  0x91   :  { %v56_v19 = vmul.f32 0.6931472, %v407_v18 }
  0x93   :  { %v57_v20 = vmul.f32 5.0, %v56_v19 }
  0x94   :  { %396 = vset.pattern.permute.xlu1 %v412_v3 }
  0x95   :  { %143 = vperm.xlu1 %396, %v104_v16  }
  0x99   :  { %77 = vperm.xlu1 %396, %v57_v20  }
  0x9d   :  { %398 = vset.pattern.permute.xlu1 %v410_v1 }
  0xeb   :  { %v49_v21 = vpop.permute.xlu1 %48 }
  0xec   :  { %408 = vrcp.f32 %v49_v21 }
  0xef   :  { %v30_v22 = vpop.permute.xlu1 %29 }
  0xf0   :  { %v32_v24 = vadd.f32 %v30_v22, %v19_v0  ;;  %v164_v0 = vadd.f32 0.5, %v96_v52 }
  0xf1   :  { %v42_v23 = vpop.permute.xlu0 %41 }
  0xf2   :  { %v44_v25 = vadd.f32 %v42_v23, %v20_v2  ;;  %v169_v8 = vrot.slane %v164_v0, %v474_v41  ;;  %v173_v11 = vrot.slane %v164_v0, %v479_v43  ;;  %v177_v13 = vrot.slane %v164_v0, %v485_v46 }
  0xf3   :  { %v181_v15 = vrot.slane %v164_v0, %v488_v49  ;;  %v185_v16 = vrot.slane %v164_v0, %v491_v51  ;;  %v189_v19 = vrot.slane %v164_v0, %v494_v54  ;;  %v193_v22 = vrot.slane %v164_v0, %v497_v56 }
  0xf4   :  { %v45_v26 = vsub.f32 %v44_v25, %v32_v24  ;;  %v59_v25 = vand.u32 127, %v58_v36 }
  0xf6   :  { %v409_v27 = vpop.eup %408  ;;  %v46_v28 = vmul.f32 10.0, %v45_v26 }
  0xf8   :  { %v52_v29 = vmul.f32 %v409_v27, %v46_v28 }
  0xfa   :  { %69 = vperm.xlu0 %399, %v52_v29   ;;  %63 = vperm.xlu1 %398, %v52_v29  }
  0xfe   :  { %400 = vset.pattern.permute.xlu0 %v415_v17  ;;  %401 = vset.pattern.permute.xlu1 %v415_v17 }
  0xff   :  { %271 = vperm.xlu0 %400, %v20_v2   ;;  %84 = vperm.xlu1 %401, %v57_v20  }
 0x100   :  { %v155_v31 = vpop.permute.xlu1 %154 }
 0x102   :  { %v236_v60 = vpop.permute.xlu0 %235 }
 0x103   :  { %402 = vset.pattern.permute.xlu1 %v410_v1  ;;  %403 = vset.pattern.permute.xlu0 %v410_v1 }
 0x104   :  { %340 = vperm.xlu1 %402, %v101_v30  }
 0x105   :  { %v461_v32 = vpop.permute.xlu1 %213 }
 0x107   :  { %v203_v9 = vpop.permute.xlu0 %202 }
 0x108   :  { %v205_v17 = vmul.f32 %v203_v9, %v169_v8  ;;  %v206_v20 = vmul.f32 %v203_v9, %v173_v11  ;;  %v207_v23 = vmul.f32 %v203_v9, %v177_v13  ;;  %v208_v27 = vmul.f32 %v203_v9, %v181_v15 }
 0x109   :  { %v209_v29 = vmul.f32 %v203_v9, %v185_v16  ;;  %v210_v36 = vmul.f32 %v203_v9, %v189_v19  ;;  %v211_v40 = vmul.f32 %v203_v9, %v193_v22 }
 0x10a   :  { %v463_v33 = vpop.permute.xlu1 %224  ;;  %v216_v30 = vadd.f32 %v461_v32, %v205_v17  ;;  %v217_v37 = vadd.f32 %v461_v32, %v206_v20  ;;  %v218_v42 = vadd.f32 %v461_v32, %v207_v23 }
 0x10f   :  { %v472_v39 = vpop.permute.xlu1 %253 }
 0x114   :  { %v144_v47 = vpop.permute.xlu1 %143 }
 0x115   :  { %v146_v57 = vmul.f32 %v144_v47, %v109_v45  ;;  %v147_v59 = vmul.f32 %v144_v47, %v113_v48  ;;  %v148_v62 = vmul.f32 %v144_v47, %v117_v50  ;;  %v149_v63 = vmul.f32 %v144_v47, %v121_v53 }
 0x116   :  { %v150_v1 = vmul.f32 %v144_v47, %v125_v55  ;;  %v151_v3 = vmul.f32 %v144_v47, %v129_v58  ;;  %v152_v5 = vmul.f32 %v144_v47, %v133_v61  ;;  %v219_v48 = vadd.f32 %v461_v32, %v208_v27 }
 0x117   :  { %v157_v2 = vadd.f32 %v155_v31, %v146_v57  ;;  %v158_v4 = vadd.f32 %v155_v31, %v147_v59  ;;  %v159_v6 = vadd.f32 %v155_v31, %v148_v62  ;;  %v160_v7 = vadd.f32 %v155_v31, %v149_v63 }
 0x118   :  { %v161_v10 = vadd.f32 %v155_v31, %v150_v1  ;;  %v162_v12 = vadd.f32 %v155_v31, %v151_v3  ;;  %v163_v14 = vadd.f32 %v155_v31, %v152_v5  ;;  %v78_v26 = vpop.permute.xlu1 %77  ;;  %v220_v55 = vadd.f32 %v461_v32, %v209_v29 }
 0x119   :  { %vm227_vm0 = vcmp.ge.f32.partialorder %v157_v2, %v463_v33  ;;  %vm238_vm1 = vcmp.le.f32.partialorder %v157_v2, %v236_v60  ;;  %vm228_vm2 = vcmp.ge.f32.partialorder %v158_v4, %v463_v33  ;;  %vm239_vm3 = vcmp.le.f32.partialorder %v158_v4, %v236_v60 }
 0x11a   :  { %vm229_vm4 = vcmp.ge.f32.partialorder %v159_v6, %v463_v33  ;;  %vm240_vm5 = vcmp.le.f32.partialorder %v159_v6, %v236_v60  ;;  %vm230_vm6 = vcmp.ge.f32.partialorder %v160_v7, %v463_v33  ;;  %vm241_vm7 = vcmp.le.f32.partialorder %v160_v7, %v236_v60  ;;  %vm510_vm8 = vmand %vm227_vm0, %vm238_vm1 }
 0x11b   :  { %vm231_vm9 = vcmp.ge.f32.partialorder %v161_v10, %v463_v33  ;;  %vm242_vm10 = vcmp.le.f32.partialorder %v161_v10, %v236_v60  ;;  %vm518_vm11 = vmand %vm228_vm2, %vm239_vm3  ;;  %vm232_vm12 = vcmp.ge.f32.partialorder %v162_v12, %v463_v33  ;;  %vm243_vm13 = vcmp.le.f32.partialorder %v162_v12, %v236_v60 }
 0x11c   :  { %vm527_vm14 = vmand %vm229_vm4, %vm240_vm5  ;;  %vm233_vm15 = vcmp.ge.f32.partialorder %v163_v14, %v463_v33  ;;  %vm244_vm0 = vcmp.le.f32.partialorder %v163_v14, %v236_v60  ;;  %vm60_vm3 = vcmp.eq.s32.totalorder %v59_v25, 0  ;;  %vm67_vm4 = vcmp.eq.s32.totalorder %v59_v25, 1 }
 0x11d   :  { %vm536_vm1 = vmand %vm230_vm6, %vm241_vm7  ;;  %vm256_vm7 = vcmp.ge.f32.partialorder %v216_v30, %v472_v39  ;;  %v578_v33 = vor.u32 %v91_v35, %v90_v34  ;;  %v221_v59 = vadd.f32 %v461_v32, %v210_v36  ;;  %v222_v62 = vadd.f32 %v461_v32, %v211_v40 }
 0x11e   :  { %vm544_vm2 = vmand %vm231_vm9, %vm242_vm10  ;;  %vm74_vm9 = vcmp.eq.s32.totalorder %v59_v25, 2  ;;  %vm257_vm10 = vcmp.ge.f32.partialorder %v217_v37, %v472_v39 }
 0x11f   :  { %vm558_vm5 = vmand %vm232_vm12, %vm243_vm13  ;;  %vm258_vm13 = vcmp.ge.f32.partialorder %v218_v42, %v472_v39  ;;  %v80_v61 = vsel %vm74_vm9, %v78_v26, 0.0  ;;  %vm262_vm9 = vcmp.ge.f32.partialorder %v222_v62, %v472_v39  ;;  %v306_v4 = vrot.slane %v578_v33, %v474_v41 }
 0x120   :  { %vm565_vm6 = vmand %vm233_vm15, %vm244_vm0  ;;  %v310_v41 = vrot.slane %v578_v33, %v479_v43  ;;  %v314_v8 = vrot.slane %v578_v33, %v485_v46  ;;  %v318_v9 = vrot.slane %v578_v33, %v488_v49  ;;  %v322_v10 = vrot.slane %v578_v33, %v491_v51 }
 0x121   :  { %vm574_vm12 = vmand %vm510_vm8, %vm256_vm7  ;;  %vm259_vm8 = vcmp.ge.f32.partialorder %v219_v48, %v472_v39  ;;  %vm261_vm7 = vcmp.ge.f32.partialorder %v221_v59, %v472_v39  ;;  %v326_v11 = vrot.slane %v578_v33, %v494_v54  ;;  %v330_v43 = vrot.slane %v578_v33, %v497_v56 }
 0x122   :  { %vm586_vm15 = vmand %vm518_vm11, %vm257_vm10  ;;  %vm260_vm11 = vcmp.ge.f32.partialorder %v220_v55, %v472_v39  ;;  %v416_v49 = vmov 0.0  }
 0x123   :  { %vm594_vm0 = vmand %vm527_vm14, %vm258_vm13 }
 0x124   :  { %vm610_vm14 = vmand %vm544_vm2, %vm260_vm11 }
 0x125   :  { %vm617_vm10 = vmand %vm558_vm5, %vm261_vm7 }
 0x179   :  { %v64_v45 = vpop.permute.xlu1 %63  ;;  %v70_v47 = vpop.permute.xlu0 %69 }
 0x17a   :  { %v66_v52 = vsel %vm60_vm3, %v64_v45, 0.0  ;;  %v72_v53 = vsel %vm67_vm4, %v70_v47, 0.0  ;;  %vm82_vm3 = vcmp.eq.s32.totalorder %v59_v25, 3  ;;  %vm603_vm4 = vmand %vm536_vm1, %vm259_vm8 }
 0x17b   :  { %v73_v58 = vadd.f32 %v72_v53, %v66_v52  ;;  %vm625_vm1 = vmand %vm565_vm6, %vm262_vm9 }
 0x17d   :  { %v81_v0 = vadd.f32 %v80_v61, %v73_v58 }
 0x17e   :  { %v85_v2 = vpop.permute.xlu1 %84  ;;  %v272_v3 = vpop.permute.xlu0 %271 }
 0x17f   :  { %v87_v5 = vsel %vm82_vm3, %v85_v2, 0.0  ;;  %vm274_vm2 = vcmp.le.f32.partialorder %v216_v30, %v272_v3  ;;  %vm275_vm13 = vcmp.le.f32.partialorder %v217_v37, %v272_v3  ;;  %vm276_vm8 = vcmp.le.f32.partialorder %v218_v42, %v272_v3 }
 0x180   :  { %v88_v39 = vadd.f32 %v87_v5, %v81_v0  ;;  %vm277_vm11 = vcmp.le.f32.partialorder %v219_v48, %v272_v3  ;;  %vm631_vm5 = vmand %vm574_vm12, %vm274_vm2  ;;  %vm278_vm6 = vcmp.le.f32.partialorder %v220_v55, %v272_v3  ;;  %vm279_vm12 = vcmp.le.f32.partialorder %v221_v59, %v272_v3 }
 0x181   :  { %vm282_vm3 = vmand %vm586_vm15, %vm275_vm13  ;;  %vm363_vm15 = vcmask 130048   ;;  %vm280_vm9 = vcmp.le.f32.partialorder %v222_v62, %v272_v3  ;;  %v377_v51 = vsel %vm631_vm5, 1.0, %v416_v49 }
 0x182   :  { %89 = vst [vmem:[%s736_s4] sm:$0xff] %v88_v39  ;;  %vm283_vm7 = vmand %vm594_vm0, %vm276_vm8  ;;  %v378_v54 = vsel %vm282_vm3, 1.0, %v416_v49 }
 0x183   :  { %vm284_vm2 = vmand %vm603_vm4, %vm277_vm11  ;;  %v341_v46 = vpop.permute.xlu1 %340  ;;  %v379_v12 = vsel %vm283_vm7, 1.0, %v416_v49 }
 0x184   :  { %vm285_vm0 = vmand %vm610_vm14, %vm278_vm6  ;;  %v380_v13 = vsel %vm284_vm2, 1.0, %v416_v49  ;;  %vm662_vm13 = vcmp.eq.f32.partialorder %v306_v4, %v341_v46  ;;  %vm666_vm8 = vcmp.eq.f32.partialorder %v310_v41, %v341_v46  ;;  %vm670_vm4 = vcmp.eq.f32.partialorder %v314_v8, %v341_v46 }
 0x185   :  { %vm286_vm11 = vmand %vm617_vm10, %vm279_vm12  ;;  %v381_v16 = vsel %vm285_vm0, 1.0, %v416_v49  ;;  %vm677_vm5 = vcmp.eq.f32.partialorder %v318_v9, %v341_v46  ;;  %vm681_vm14 = vcmp.eq.f32.partialorder %v322_v10, %v341_v46  ;;  %vm685_vm6 = vcmp.eq.f32.partialorder %v326_v11, %v341_v46 }
 0x186   :  { %vm287_vm3 = vmand %vm625_vm1, %vm280_vm9  ;;  %v382_v20 = vsel %vm286_vm11, 1.0, %v416_v49  ;;  %vm692_vm7 = vcmp.eq.f32.partialorder %v330_v43, %v341_v46  ;;  %v350_v22 = vsel %vm662_vm13, %v377_v51, -1.0  ;;  %v351_v23 = vsel %vm666_vm8, %v378_v54, -1.0 }
 0x187   :  { %v383_v24 = vsel %vm287_vm3, 1.0, %v416_v49  ;;  %v352_v25 = vsel %vm670_vm4, %v379_v12, -1.0  ;;  %v353_v26 = vsel %vm677_vm5, %v380_v13, -1.0  ;;  %v354_v27 = vsel %vm681_vm14, %v381_v16, -1.0  ;;  %357 = vst [vmem:[%s737_s5] sm:$0xff] %v350_v22  ;;  %358 = vst [vmem:[%s737_s5 + $0x8] sm:$0xff] %v351_v23 }
 0x188   :  { %v355_v28 = vsel %vm685_vm6, %v382_v20, -1.0  ;;  %v356_v29 = vsel %vm692_vm7, %v383_v24, -1.0  ;;  %359 = vst [vmem:[%s737_s5 + $0x10] sm:$0xff] %v352_v25  ;;  %360 = vst [vmem:[%s737_s5 + $0x18] sm:$0xff] %v353_v26 }
 0x189   :  { %361 = vst [vmem:[%s737_s5 + $0x20] sm:$0xff] %v354_v27  ;;  %362 = vst [vmem:[%s737_s5 + $0x28] sm:$0xff] %v355_v28 }
 0x18a   :  { %364 = vst.msk [vmem:[%s737_s5 + $0x30] sm:$0xff] %vm363_vm15, %v356_v29 }

</bundles_post_ra>
